<compile_context>
chip_gen: v7x
topology: tpu7x:2x2x1
jax: 0.10.0
libtpu: 0.0.40
codegen_flags: <defaults>
</compile_context>

<pallas_src>
import functools

import jax
import jax.numpy as jnp
from jax.experimental import pallas as pl
from jax.experimental.pallas import tpu as pltpu


# ----------------------------------------------------------------------------
# Fused kernel: stem (both branches) + global-average-pool + DSN head + softmax
# ----------------------------------------------------------------------------
def _dsn_fused_kernel(x_ref, y_ref,          # (1, Cin, S) f32 lane-dense image rows
                      w_stem_ref,            # (C, 2*Cin) f32  [face | tongue]
                      b_stem_ref,            # (C, 2)     f32  [face | tongue]
                      w_heads_ref,           # (3K, 2*C)  f32  [Wx|0 ; 0|Wy ; Wfc]
                      b_heads_ref,           # (3K, 1)    f32  [bx ; by ; bfc]
                      out_ref,               # (1, 4K, 1) f32  [xl ; yl ; cl ; prob]
                      *, inv_s):
    C, two_cin = w_stem_ref.shape
    cin = two_cin // 2
    k = w_heads_ref.shape[0] // 3

    def stem_pool(img, w, b):
        # img: (Cin, S) lane-dense, w: (C, Cin), b: (C, 1).
        # 1x1 conv as Cin unrolled VPU outer-product MACs (no padded MXU push),
        # then ReLU and spatial-sum (lane reduction) for the global avg pool.
        f = w[:, 0:1] * img[0:1, :]                       # (C, 1) * (1, S) -> (C, S)
        for j in range(1, cin):
            f = f + w[:, j:j + 1] * img[j:j + 1, :]
        f = jnp.maximum(f + b, 0.0)                       # (C, S) f32
        return jnp.sum(f, axis=1, keepdims=True) * inv_s  # (C, 1) pooled mean

    px = stem_pool(x_ref[0], w_stem_ref[:, 0:cin],        b_stem_ref[:, 0:1])
    py = stem_pool(y_ref[0], w_stem_ref[:, cin:2 * cin],  b_stem_ref[:, 1:2])

    # Single packed head: [x_logits ; y_logits ; concat_logits] in one shot.
    # fc on cat([px, py]) is expressed as a split matmul (no in-kernel concat).
    logits = (jnp.dot(w_heads_ref[:, 0:C], px, preferred_element_type=jnp.float32)
              + jnp.dot(w_heads_ref[:, C:2 * C], py, preferred_element_type=jnp.float32)
              + b_heads_ref[...])                         # (3K, 1)

    # Softmax(dim=1) over the classes of concat_logits (exact divide).
    cl = logits[2 * k:3 * k, :]
    m = jnp.max(cl, axis=0, keepdims=True)
    e = jnp.exp(cl - m)
    prob = e / jnp.sum(e, axis=0, keepdims=True)          # (K, 1)

    # Merged epilogue: one packed output block, two contiguous column stores.
    out_ref[0, 0:3 * k, :] = logits
    out_ref[0, 3 * k:4 * k, :] = prob


def dsn_fused_forward(x_rows, y_rows, w_stem, b_stem, w_heads, b_heads):
    """x_rows / y_rows: (N, Cin, S) f32.  Returns packed (N, 4K, 1) f32."""
    N, cin, S = x_rows.shape
    C = w_stem.shape[0]
    three_k = w_heads.shape[0]
    k = three_k // 3

    kernel = functools.partial(_dsn_fused_kernel, inv_s=1.0 / float(S))

    def _const_spec(shape):
        return pl.BlockSpec(shape, lambda n, _s=shape: (0,) * len(_s))

    img_spec = pl.BlockSpec((1, cin, S), lambda n: (n, 0, 0))

    return pl.pallas_call(
        kernel,
        out_shape=jax.ShapeDtypeStruct((N, 4 * k, 1), jnp.float32),
        grid=(N,),
        in_specs=[
            img_spec, img_spec,
            _const_spec((C, 2 * cin)),
            _const_spec((C, 2)),
            _const_spec((three_k, 2 * C)),
            _const_spec((three_k, 1)),
        ],
        out_specs=pl.BlockSpec((1, 4 * k, 1), lambda n: (n, 0, 0)),
        compiler_params=pltpu.CompilerParams(
            dimension_semantics=("parallel",),          # batch -> v7x megacore
            vmem_limit_bytes=32 * 1024 * 1024),
    )(x_rows, y_rows, w_stem, b_stem, w_heads, b_heads)


# ----------------------------------------------------------------------------
# Parameter construction / packing (layout plumbing only, tiny & one-off)
# ----------------------------------------------------------------------------
def xavier_uniform(key, shape):
    # torch nn.init.xavier_uniform_ on an (out, in) weight.
    fan_out, fan_in = shape
    bound = (6.0 / (fan_in + fan_out)) ** 0.5
    return jax.random.uniform(key, shape, jnp.float32, -bound, bound)


def init_params(key, cin, fc_cells_each, n_cls):
    # Weights in torch layout: conv1x1 (out, in), Linear (out, in).
    # Biases are given small random values (torch init uses 0) purely so the
    # bias paths are exercised by the numeric check.
    ks = jax.random.split(key, 10)
    C = fc_cells_each
    return {
        "w_face":   xavier_uniform(ks[0], (C, cin)),
        "b_face":   0.05 * jax.random.normal(ks[1], (C,), jnp.float32),
        "w_tongue": xavier_uniform(ks[2], (C, cin)),
        "b_tongue": 0.05 * jax.random.normal(ks[3], (C,), jnp.float32),
        "w_x_out":  xavier_uniform(ks[4], (n_cls, C)),
        "b_x_out":  0.05 * jax.random.normal(ks[5], (n_cls,), jnp.float32),
        "w_y_out":  xavier_uniform(ks[6], (n_cls, C)),
        "b_y_out":  0.05 * jax.random.normal(ks[7], (n_cls,), jnp.float32),
        "w_fc":     xavier_uniform(ks[8], (n_cls, 2 * C)),
        "b_fc":     0.05 * jax.random.normal(ks[9], (n_cls,), jnp.float32),
    }


def pack_params(params):
    C, cin = params["w_face"].shape
    k = params["w_x_out"].shape[0]
    w_stem = jnp.concatenate([params["w_face"], params["w_tongue"]], axis=1)   # (C, 2Cin)
    b_stem = jnp.stack([params["b_face"], params["b_tongue"]], axis=1)         # (C, 2)
    w_heads = jnp.zeros((3 * k, 2 * C), jnp.float32)
    w_heads = w_heads.at[0:k, 0:C].set(params["w_x_out"])
    w_heads = w_heads.at[k:2 * k, C:2 * C].set(params["w_y_out"])
    w_heads = w_heads.at[2 * k:3 * k, :].set(params["w_fc"])
    b_heads = jnp.concatenate(
        [params["b_x_out"], params["b_y_out"], params["b_fc"]]).reshape(3 * k, 1)
    return w_stem, b_stem, w_heads, b_heads


# ----------------------------------------------------------------------------
# Model wrapper: free NCHW -> (N, Cin, S) reshape, one pallas_call, unpack.
# ----------------------------------------------------------------------------
def dsn_model_forward(params, x_nchw, y_nchw):
    """DSNModel.forward (include_top=True, out_layer=Softmax(dim=1), dropout=0)."""
    N, cin, H, W = x_nchw.shape
    S = H * W
    xr = x_nchw.reshape(N, cin, S)      # free reshape, S on the lane axis
    yr = y_nchw.reshape(N, cin, S)

    w_stem, b_stem, w_heads, b_heads = pack_params(params)
    packed = dsn_fused_forward(xr, yr, w_stem, b_stem, w_heads, b_heads)

    k = params["w_x_out"].shape[0]
    flat = packed[:, :, 0]              # (N, 4K)
    return {
        "x_logits":      flat[:, 0:k],
        "y_logits":      flat[:, k:2 * k],
        "concat_logits": flat[:, 2 * k:3 * k],
        "prob":          flat[:, 3 * k:4 * k],
    }


# ----------------------------------------------------------------------------
# Pure-JAX reference (same f32 math)
# ----------------------------------------------------------------------------
def reference_forward(params, x_nchw, y_nchw):
    N, cin, H, W = x_nchw.shape
    S = H * W

    def stem_pool(img, w, b):           # w: (C, Cin), b: (C,)
        r = img.reshape(N, cin, S)
        f = jnp.einsum("ki,nis->nks", w, r) + b[None, :, None]
        f = jnp.maximum(f, 0.0)
        return jnp.mean(f, axis=2)      # (N, C)

    px = stem_pool(x_nchw, params["w_face"], params["b_face"])
    py = stem_pool(y_nchw, params["w_tongue"], params["b_tongue"])
    xl = px @ params["w_x_out"].T + params["b_x_out"]
    yl = py @ params["w_y_out"].T + params["b_y_out"]
    feat = jnp.concatenate([px, py], axis=1)
    cl = feat @ params["w_fc"].T + params["b_fc"]
    prob = jax.nn.softmax(cl, axis=1)
    return {"x_logits": xl, "y_logits": yl, "concat_logits": cl, "prob": prob}


if __name__ == "__main__":
    # Small shapes consistent with the module forward: two image inputs
    # (face, tongue) in NCHW; stand-in backbone feature channels = 128 per
    # branch (lane-dense); n_cls = 8 classes.
    N, CIN, H, W = 2, 3, 32, 32
    FC_CELLS_EACH = 128
    N_CLS = 8

    key = jax.random.PRNGKey(0)
    k_params, k_x, k_y = jax.random.split(key, 3)
    params = init_params(k_params, CIN, FC_CELLS_EACH, N_CLS)

    x = jax.random.normal(k_x, (N, CIN, H, W), jnp.float32)
    y = jax.random.normal(k_y, (N, CIN, H, W), jnp.float32)

    out = dsn_model_forward(params, x, y)
    out = jax.tree_util.tree_map(jax.block_until_ready, out)

    ref = reference_forward(params, x, y)
    # Everything runs in f32 (VPU stem, f32-accumulated head matmuls, exact
    # softmax); tolerance only needs to cover accumulation-order differences.
    for name in ("x_logits", "y_logits", "concat_logits", "prob"):
        assert out[name].shape == ref[name].shape, name
        assert jnp.allclose(out[name], ref[name], atol=1e-3, rtol=1e-3), name

    print("KERNEL_OK")
</pallas_src>

<mosaic_0001>
module attributes {stable_mosaic.version = 11 : i64} {
  func.func @_dsn_fused_kernel(%arg0: i32, %arg1: memref<1x3x1024xf32, #tpu.memory_space<vmem>>, %arg2: memref<1x3x1024xf32, #tpu.memory_space<vmem>>, %arg3: memref<128x6xf32, #tpu.memory_space<vmem>>, %arg4: memref<128x2xf32, #tpu.memory_space<vmem>>, %arg5: memref<24x256xf32, #tpu.memory_space<vmem>>, %arg6: memref<24x1xf32, #tpu.memory_space<vmem>>, %arg7: memref<1x32x1xf32, #tpu.memory_space<vmem>>) attributes {dimension_semantics = [#tpu.dimension_semantics<parallel>], iteration_bounds = array<i64: 2>, scalar_prefetch = 0 : i64, scratch_operands = 0 : i64, tpu.core_type = #tpu.core_type<tc>, window_params = [{transform_indices = @transform_0, window_bounds = array<i64: 1, 3, 1024>}, {transform_indices = @transform_1, window_bounds = array<i64: 1, 3, 1024>}, {pipeline_mode = #tpu.pipeline_mode<synchronous>, transform_indices = @transform_2, window_bounds = array<i64: 128, 6>}, {pipeline_mode = #tpu.pipeline_mode<synchronous>, transform_indices = @transform_3, window_bounds = array<i64: 128, 2>}, {pipeline_mode = #tpu.pipeline_mode<synchronous>, transform_indices = @transform_4, window_bounds = array<i64: 24, 256>}, {pipeline_mode = #tpu.pipeline_mode<synchronous>, transform_indices = @transform_5, window_bounds = array<i64: 24, 1>}, {transform_indices = @transform_6, window_bounds = array<i64: 1, 32, 1>}]} {
    %c0 = arith.constant 0 : index
    %c0_0 = arith.constant 0 : index
    %c0_1 = arith.constant 0 : index
    %0 = vector.load %arg1[%c0, %c0_0, %c0_1] : memref<1x3x1024xf32, #tpu.memory_space<vmem>>, vector<1x3x1024xf32>
    %1 = vector.shape_cast %0 : vector<1x3x1024xf32> to vector<3x1024xf32>
    %c0_2 = arith.constant 0 : index
    %c0_3 = arith.constant 0 : index
    %2 = vector.load %arg3[%c0_2, %c0_3] : memref<128x6xf32, #tpu.memory_space<vmem>>, vector<128x3xf32>
    %c0_4 = arith.constant 0 : index
    %c0_5 = arith.constant 0 : index
    %3 = vector.load %arg4[%c0_4, %c0_5] : memref<128x2xf32, #tpu.memory_space<vmem>>, vector<128x1xf32>
    %4 = vector.extract_strided_slice %2 {offsets = [0, 0], sizes = [128, 1], strides = [1, 1]} : vector<128x3xf32> to vector<128x1xf32>
    %5 = vector.extract_strided_slice %1 {offsets = [0, 0], sizes = [1, 1024], strides = [1, 1]} : vector<3x1024xf32> to vector<1x1024xf32>
    %6 = vector.broadcast %4 : vector<128x1xf32> to vector<128x1024xf32>
    %7 = vector.broadcast %5 : vector<1x1024xf32> to vector<128x1024xf32>
    %8 = arith.mulf %6, %7 : vector<128x1024xf32>
    %9 = vector.extract_strided_slice %2 {offsets = [0, 1], sizes = [128, 1], strides = [1, 1]} : vector<128x3xf32> to vector<128x1xf32>
    %10 = vector.extract_strided_slice %1 {offsets = [1, 0], sizes = [1, 1024], strides = [1, 1]} : vector<3x1024xf32> to vector<1x1024xf32>
    %11 = vector.broadcast %9 : vector<128x1xf32> to vector<128x1024xf32>
    %12 = vector.broadcast %10 : vector<1x1024xf32> to vector<128x1024xf32>
    %13 = arith.mulf %11, %12 : vector<128x1024xf32>
    %14 = arith.addf %8, %13 : vector<128x1024xf32>
    %15 = vector.extract_strided_slice %2 {offsets = [0, 2], sizes = [128, 1], strides = [1, 1]} : vector<128x3xf32> to vector<128x1xf32>
    %16 = vector.extract_strided_slice %1 {offsets = [2, 0], sizes = [1, 1024], strides = [1, 1]} : vector<3x1024xf32> to vector<1x1024xf32>
    %17 = vector.broadcast %15 : vector<128x1xf32> to vector<128x1024xf32>
    %18 = vector.broadcast %16 : vector<1x1024xf32> to vector<128x1024xf32>
    %19 = arith.mulf %17, %18 : vector<128x1024xf32>
    %20 = arith.addf %14, %19 : vector<128x1024xf32>
    %21 = vector.broadcast %3 : vector<128x1xf32> to vector<128x1024xf32>
    %22 = arith.addf %20, %21 : vector<128x1024xf32>
    %cst = arith.constant 0.000000e+00 : f32
    %23 = vector.broadcast %cst : f32 to vector<128x1024xf32>
    %24 = arith.maximumf %22, %23 : vector<128x1024xf32>
    %cst_6 = arith.constant dense<0.000000e+00> : vector<128xf32>
    %25 = vector.multi_reduction <add>, %24, %cst_6 [1] : vector<128x1024xf32> to vector<128xf32>
    %26 = vector.shape_cast %25 : vector<128xf32> to vector<128x1xf32>
    %cst_7 = arith.constant 9.765625E-4 : f32
    %27 = vector.broadcast %cst_7 : f32 to vector<128x1xf32>
    %28 = arith.mulf %26, %27 : vector<128x1xf32>
    %c0_8 = arith.constant 0 : index
    %c0_9 = arith.constant 0 : index
    %c0_10 = arith.constant 0 : index
    %29 = vector.load %arg2[%c0_8, %c0_9, %c0_10] : memref<1x3x1024xf32, #tpu.memory_space<vmem>>, vector<1x3x1024xf32>
    %30 = vector.shape_cast %29 : vector<1x3x1024xf32> to vector<3x1024xf32>
    %c0_11 = arith.constant 0 : index
    %c3 = arith.constant 3 : index
    %31 = vector.load %arg3[%c0_11, %c3] : memref<128x6xf32, #tpu.memory_space<vmem>>, vector<128x3xf32>
    %c0_12 = arith.constant 0 : index
    %c1 = arith.constant 1 : index
    %32 = vector.load %arg4[%c0_12, %c1] : memref<128x2xf32, #tpu.memory_space<vmem>>, vector<128x1xf32>
    %33 = vector.extract_strided_slice %31 {offsets = [0, 0], sizes = [128, 1], strides = [1, 1]} : vector<128x3xf32> to vector<128x1xf32>
    %34 = vector.extract_strided_slice %30 {offsets = [0, 0], sizes = [1, 1024], strides = [1, 1]} : vector<3x1024xf32> to vector<1x1024xf32>
    %35 = vector.broadcast %33 : vector<128x1xf32> to vector<128x1024xf32>
    %36 = vector.broadcast %34 : vector<1x1024xf32> to vector<128x1024xf32>
    %37 = arith.mulf %35, %36 : vector<128x1024xf32>
    %38 = vector.extract_strided_slice %31 {offsets = [0, 1], sizes = [128, 1], strides = [1, 1]} : vector<128x3xf32> to vector<128x1xf32>
    %39 = vector.extract_strided_slice %30 {offsets = [1, 0], sizes = [1, 1024], strides = [1, 1]} : vector<3x1024xf32> to vector<1x1024xf32>
    %40 = vector.broadcast %38 : vector<128x1xf32> to vector<128x1024xf32>
    %41 = vector.broadcast %39 : vector<1x1024xf32> to vector<128x1024xf32>
    %42 = arith.mulf %40, %41 : vector<128x1024xf32>
    %43 = arith.addf %37, %42 : vector<128x1024xf32>
    %44 = vector.extract_strided_slice %31 {offsets = [0, 2], sizes = [128, 1], strides = [1, 1]} : vector<128x3xf32> to vector<128x1xf32>
    %45 = vector.extract_strided_slice %30 {offsets = [2, 0], sizes = [1, 1024], strides = [1, 1]} : vector<3x1024xf32> to vector<1x1024xf32>
    %46 = vector.broadcast %44 : vector<128x1xf32> to vector<128x1024xf32>
    %47 = vector.broadcast %45 : vector<1x1024xf32> to vector<128x1024xf32>
    %48 = arith.mulf %46, %47 : vector<128x1024xf32>
    %49 = arith.addf %43, %48 : vector<128x1024xf32>
    %50 = vector.broadcast %32 : vector<128x1xf32> to vector<128x1024xf32>
    %51 = arith.addf %49, %50 : vector<128x1024xf32>
    %cst_13 = arith.constant 0.000000e+00 : f32
    %52 = vector.broadcast %cst_13 : f32 to vector<128x1024xf32>
    %53 = arith.maximumf %51, %52 : vector<128x1024xf32>
    %cst_14 = arith.constant dense<0.000000e+00> : vector<128xf32>
    %54 = vector.multi_reduction <add>, %53, %cst_14 [1] : vector<128x1024xf32> to vector<128xf32>
    %55 = vector.shape_cast %54 : vector<128xf32> to vector<128x1xf32>
    %cst_15 = arith.constant 9.765625E-4 : f32
    %56 = vector.broadcast %cst_15 : f32 to vector<128x1xf32>
    %57 = arith.mulf %55, %56 : vector<128x1xf32>
    %c0_16 = arith.constant 0 : index
    %c0_17 = arith.constant 0 : index
    %58 = vector.load %arg5[%c0_16, %c0_17] : memref<24x256xf32, #tpu.memory_space<vmem>>, vector<24x128xf32>
    %cst_18 = arith.constant dense<0.000000e+00> : vector<24x1xf32>
    %59 = tpu.matmul %58, %28, %cst_18 {dimension_numbers = #tpu.dot_dimension_numbers<[1], [0], [0], [1], [0, 0, 1, 1], [], []>} : vector<24x128xf32>, vector<128x1xf32>, vector<24x1xf32> -> vector<24x1xf32>
    %c0_19 = arith.constant 0 : index
    %c128 = arith.constant 128 : index
    %60 = vector.load %arg5[%c0_19, %c128] : memref<24x256xf32, #tpu.memory_space<vmem>>, vector<24x128xf32>
    %cst_20 = arith.constant dense<0.000000e+00> : vector<24x1xf32>
    %61 = tpu.matmul %60, %57, %cst_20 {dimension_numbers = #tpu.dot_dimension_numbers<[1], [0], [0], [1], [0, 0, 1, 1], [], []>} : vector<24x128xf32>, vector<128x1xf32>, vector<24x1xf32> -> vector<24x1xf32>
    %62 = arith.addf %59, %61 : vector<24x1xf32>
    %c0_21 = arith.constant 0 : index
    %c0_22 = arith.constant 0 : index
    %63 = vector.load %arg6[%c0_21, %c0_22] : memref<24x1xf32, #tpu.memory_space<vmem>>, vector<24x1xf32>
    %64 = arith.addf %62, %63 : vector<24x1xf32>
    %65 = vector.extract_strided_slice %64 {offsets = [16, 0], sizes = [8, 1], strides = [1, 1]} : vector<24x1xf32> to vector<8x1xf32>
    %cst_23 = arith.constant dense<0xFF800000> : vector<1xf32>
    %66 = vector.multi_reduction <maximumf>, %65, %cst_23 [0] : vector<8x1xf32> to vector<1xf32>
    %67 = vector.shape_cast %66 : vector<1xf32> to vector<1x1xf32>
    %68 = vector.broadcast %67 : vector<1x1xf32> to vector<8x1xf32>
    %69 = arith.subf %65, %68 : vector<8x1xf32>
    %70 = math.exp %69 : vector<8x1xf32>
    %cst_24 = arith.constant dense<0.000000e+00> : vector<1xf32>
    %71 = vector.multi_reduction <add>, %70, %cst_24 [0] : vector<8x1xf32> to vector<1xf32>
    %72 = vector.shape_cast %71 : vector<1xf32> to vector<1x1xf32>
    %73 = vector.broadcast %72 : vector<1x1xf32> to vector<8x1xf32>
    %74 = arith.divf %70, %73 : vector<8x1xf32>
    %c0_25 = arith.constant 0 : index
    %c0_26 = arith.constant 0 : index
    %c0_27 = arith.constant 0 : index
    %75 = vector.load %arg7[%c0_25, %c0_26, %c0_27] : memref<1x32x1xf32, #tpu.memory_space<vmem>>, vector<1x24x1xf32>
    %76 = vector.shape_cast %75 : vector<1x24x1xf32> to vector<24x1xf32>
    %77 = vector.shape_cast %64 : vector<24x1xf32> to vector<1x24x1xf32>
    tpu.vector_store %arg7[%c0_25, %c0_26, %c0_27], %77 {strides = array<i32>} : memref<1x32x1xf32, #tpu.memory_space<vmem>>, vector<1x24x1xf32>,
    %c0_28 = arith.constant 0 : index
    %c24 = arith.constant 24 : index
    %c0_29 = arith.constant 0 : index
    %78 = vector.load %arg7[%c0_28, %c24, %c0_29] : memref<1x32x1xf32, #tpu.memory_space<vmem>>, vector<1x8x1xf32>
    %79 = vector.shape_cast %78 : vector<1x8x1xf32> to vector<8x1xf32>
    %80 = vector.shape_cast %74 : vector<8x1xf32> to vector<1x8x1xf32>
    tpu.vector_store %arg7[%c0_28, %c24, %c0_29], %80 {strides = array<i32>} : memref<1x32x1xf32, #tpu.memory_space<vmem>>, vector<1x8x1xf32>,
    return
  }
  func.func @transform_0(%arg0: i32) -> (i32, i32, i32) {
    %c0_i32 = arith.constant 0 : i32
    %c0_i32_0 = arith.constant 0 : i32
    %c0_i32_1 = arith.constant 0 : i32
    return %arg0, %c0_i32, %c0_i32_0 : i32, i32, i32
  }
  func.func @transform_1(%arg0: i32) -> (i32, i32, i32) {
    %c0_i32 = arith.constant 0 : i32
    %c0_i32_0 = arith.constant 0 : i32
    %c0_i32_1 = arith.constant 0 : i32
    return %arg0, %c0_i32, %c0_i32_0 : i32, i32, i32
  }
  func.func @transform_2(%arg0: i32) -> (i32, i32) {
    %c0_i32 = arith.constant 0 : i32
    %c0_i32_0 = arith.constant 0 : i32
    %c0_i32_1 = arith.constant 0 : i32
    return %c0_i32, %c0_i32_0 : i32, i32
  }
  func.func @transform_3(%arg0: i32) -> (i32, i32) {
    %c0_i32 = arith.constant 0 : i32
    %c0_i32_0 = arith.constant 0 : i32
    %c0_i32_1 = arith.constant 0 : i32
    return %c0_i32, %c0_i32_0 : i32, i32
  }
  func.func @transform_4(%arg0: i32) -> (i32, i32) {
    %c0_i32 = arith.constant 0 : i32
    %c0_i32_0 = arith.constant 0 : i32
    %c0_i32_1 = arith.constant 0 : i32
    return %c0_i32, %c0_i32_0 : i32, i32
  }
  func.func @transform_5(%arg0: i32) -> (i32, i32) {
    %c0_i32 = arith.constant 0 : i32
    %c0_i32_0 = arith.constant 0 : i32
    %c0_i32_1 = arith.constant 0 : i32
    return %c0_i32, %c0_i32_0 : i32, i32
  }
  func.func @transform_6(%arg0: i32) -> (i32, i32, i32) {
    %c0_i32 = arith.constant 0 : i32
    %c0_i32_0 = arith.constant 0 : i32
    %c0_i32_1 = arith.constant 0 : i32
    return %arg0, %c0_i32, %c0_i32_0 : i32, i32, i32
  }
}

</mosaic_0001>

<bundles_post_ra>
// kernel: tpu_custom_call.1
= control target key start
LH: loop header
LB: loop body
LE: loop exit
PB: predicated region body
PF: predicated region fallthrough
CT: control target
= control target key end

     0   :  { %s3998_s21 = smov 0   ;;  %s7818_s0 = inlined_call_operand.vmem [shape: f32[2,3,1024], index: 0, kind: input, shape index: {}]   ;;  %s7819_s1 = inlined_call_operand.vmem [shape: f32[2,3,1024], index: 1, kind: input, shape index: {}]   ;;  %s7820_s2 = inlined_call_operand.vmem [shape: f32[128,6], index: 2, kind: input, shape index: {}]   ;;  %s7821_s3 = inlined_call_operand.vmem [shape: f32[128,2], index: 3, kind: input, shape index: {}]   ;;  %s7822_s4 = inlined_call_operand.vmem [shape: f32[24,256], index: 4, kind: input, shape index: {}]   ;;  %s7823_s5 = inlined_call_operand.vmem [shape: f32[24,1], index: 5, kind: input, shape index: {}]   ;;  %s7824_s6 = inlined_call_operand.vmem [shape: f32[2,32,1], index: 6, kind: output, shape index: {}]  }
   0x1 LB: > { %s3671_s22 = sadd.s32 4294967295, %s3952_s21   ;;  %p3675_p0 = scmp.ge.s32.totalorder %s3952_s21, 1  ;;  %s3952_s21 = sphi %s3998_s21, %s16_s21  }
   0x2   : > { %p222_p1 = scmp.lt.s32.totalorder %s3952_s21, 3 }
   0x4   : > { %p223_p2 = pnand %p3675_p0, %p222_p1 }
   0x6   : > { %226 = sbr.rel (%p223_p2) target bundleno = 1173 (0x495), region = 44 }
   0xd   : > { %v4009_v0 = vld [vmem:[%s7820_s2 + $0x10] sm:$0xff]  ;;  %v4014_v1 = vld [vmem:[%s7820_s2] sm:$0xff]  ;;  %v7836_v2 = vmov 5   ;;  %v7825_v3 = vmov 0   ;;  %v4023_v4 = vld [vmem:[%s7820_s2 + $0x18] sm:$0xff]  ;;  %v7829_v6 = vmov 4   ;;  %v392_v29 = vlaneseq }
   0xe   : > { %3877 = vset.pattern.permute.xlu0 %v7836_v2  ;;  %3872 = vset.pattern.permute.xlu1 %v7825_v3  ;;  %v4030_v5 = vld [vmem:[%s7820_s2 + $0x28] sm:$0xff]  ;;  %v4038_v7 = vld [vmem:[%s7820_s2 + $0x38] sm:$0xff]  ;;  %v7831_v9 = vmov 3   ;;  %v4061_v12 = vld [vmem:[%s7820_s2 + $0x20] sm:$0xff]  ;;  %v7833_v15 = vmov 1   ;;  %v7827_v17 = vmov 2  }
   0xf   : > { %320 = vperm.xlu1 %3872, %v4009_v0   ;;  %2537 = vperm.xlu0 %3877, %v4014_v1   ;;  %v4043_v8 = vld [vmem:[%s7820_s2 + $0x8] sm:$0xff]  ;;  %v287_v11 = vld [vmem:[%s7820_s2 + $0x58] sm:$0xff]  ;;  %v4079_v16 = vld [vmem:[%s7820_s2 + $0x30] sm:$0xff]  ;;  %p257_p3 = scmp.lt.s32.totalorder %s3671_s22, 1  ;;  %v393_v33 = vshrl.u32 %v392_v29, 7  ;;  %vm3961_vm0 = vmmov 0  }
  0x10   : > { %v4050_v10 = vld [vmem:[%s7820_s2 + $0x48] sm:$0xff]  ;;  %v291_v14 = vld [vmem:[%s7820_s2 + $0x78] sm:$0xff]  ;;  %v4086_v18 = vld [vmem:[%s7820_s2 + $0x40] sm:$0xff]  ;;  %vm3580_vm1 = vcmask 7168  }
  0x11   : > { %8135 = vst [vmem:[#allocation2_spill] sm:$0xff] %v4050_v10  ;;  %v289_v13 = vld [vmem:[%s7820_s2 + $0x68] sm:$0xff]  ;;  %8136 = vst [vmem:[#allocation3_spill] sm:$0xff] %v4086_v18  ;;  %v4093_v19 = vld [vmem:[%s7820_s2 + $0x50] sm:$0xff]  ;;  %s9153_s22 = smov (!%p257_p3, %s3671_s22), 1  ;;  %v4197_v36 = vsub.s32 0, %v393_v33 }
  0x12   : > { %v4100_v20 = vld [vmem:[%s7820_s2 + $0x60] sm:$0xff]  ;;  %v4107_v21 = vld [vmem:[%s7820_s2 + $0x70] sm:$0xff]  ;;  %v293_v24 = vld [vmem:[%s7821_s3 + $0x8] sm:$0xff]  ;;  %s4184_s27 = sshll.u32 %s9153_s22, 5  ;;  %v4202_v38 = vsub.s32 4, %v393_v33  ;;  %v4223_v47 = vsub.s32 1, %v393_v33 }
  0x13   : > { %325 = vperm.xlu1 %3872, %v4023_v4   ;;  %2549 = vperm.xlu0 %3877, %v4023_v4   ;;  %v4138_v22 = vld [vmem:[%s7821_s3 + $0x10] sm:$0xff]  ;;  %v4145_v23 = vld [vmem:[%s7821_s3 + $0x20] sm:$0xff]  ;;  %s261_s30 = scalar_lea.vmem %s7818_s0, %s4184_s27  ;;  %v4225_v48 = vsub.s32 5, %v393_v33  ;;  %s266_s8 = scalar_lea.vmem %s7819_s1, %s4184_s27 }
  0x14   : > { %v4155_v25 = vld [vmem:[%s7821_s3 + $0x30] sm:$0xff]  ;;  %v300_v26 = vld [vmem:[%s7821_s3 + $0x40] sm:$0xff]  ;;  %v4204_v39 = vld [vmem:[%s261_s30 + $0x8] sm:$0x77]  ;;  %s7797_s28 = scalar_lea.vmem %s7824_s6, %s4184_s27 }
  0x15   : > { %8137 = vst [vmem:[#allocation4_spill] sm:$0xff] %v4155_v25  ;;  %v4166_v27 = vld [vmem:[%s7821_s3] sm:$0xff]  ;;  %v302_v28 = vld [vmem:[%s7821_s3 + $0x50] sm:$0xff]  ;;  %v403_v44 = vrot.slane %v4204_v39, %v4197_v36  ;;  %v4221_v46 = vld [vmem:[%s261_s30 + $0x18] sm:$0x77]  ;;  %v407_v50 = vrot.slane %v4204_v39, %v4202_v38  ;;  %v667_v61 = vrot.slane %v4204_v39, %v4223_v47  ;;  %v671_v62 = vrot.slane %v4204_v39, %v4225_v48 }
  0x16   : > { %v304_v30 = vld [vmem:[%s7821_s3 + $0x60] sm:$0xff]  ;;  %v4219_v45 = vld [vmem:[%s261_s30 + $0x10] sm:$0x77]  ;;  %v419_v54 = vrot.slane %v4221_v46, %v4197_v36  ;;  %v423_v58 = vrot.slane %v4221_v46, %v4202_v38 }
  0x17   : > { %335 = vperm.xlu1 %3872, %v4030_v5   ;;  %3886 = vset.pattern.permute.xlu0 %v7829_v6  ;;  %v4200_v37 = vld [vmem:[%s261_s30] sm:$0x77]  ;;  %v411_v52 = vrot.slane %v4219_v45, %v4197_v36  ;;  %v415_v53 = vrot.slane %v4219_v45, %v4202_v38  ;;  %v4249_v57 = vrot.slane %v403_v44, %v4197_v36 }
  0x18   : > { %2165 = vperm.xlu0 %3886, %v4030_v5   ;;  %v395_v42 = vrot.slane %v4200_v37, %v4197_v36  ;;  %v399_v43 = vrot.slane %v4200_v37, %v4202_v38  ;;  %v659_v59 = vrot.slane %v4200_v37, %v4223_v47  ;;  %v663_v60 = vrot.slane %v4200_v37, %v4225_v48 }
  0x19   : > { %8141 = vst [vmem:[#allocation8_spill] sm:$0xff] %v4249_v57  ;;  %v4293_v29 = vrot.slane %v419_v54, %v4197_v36  ;;  %v4309_v44 = vrot.slane %v671_v62, %v4223_v47 }
  0x1a   : > { %v4233_v51 = vrot.slane %v395_v42, %v4197_v36  ;;  %v4246_v56 = vrot.slane %v399_v43, %v4197_v36  ;;  %v4303_v42 = vrot.slane %v663_v60, %v4223_v47  ;;  %v4306_v43 = vrot.slane %v667_v61, %v4223_v47 }
  0x1b   : > { %345 = vperm.xlu1 %3872, %v4038_v7   ;;  %8145 = vst [vmem:[#allocation12_spill] sm:$0xff] %v4293_v29  ;;  %8148 = vst [vmem:[#allocation15_spill] sm:$0xff] %v4309_v44 }
  0x1c   : > { %3887 = vset.pattern.permute.xlu0 %v7831_v9  ;;  %8139 = vst [vmem:[#allocation6_spill] sm:$0xff] %v4233_v51  ;;  %8140 = vst [vmem:[#allocation7_spill] sm:$0xff] %v4246_v56 }
  0x1d   : > { %1881 = vperm.xlu0 %3887, %v4043_v8   ;;  %8147 = vst [vmem:[#allocation14_spill] sm:$0xff] %v4306_v43 }
  0x1f   : > { %355 = vperm.xlu1 %3872, %v4050_v10  }
  0x21   : > { %1889 = vperm.xlu0 %3887, %v4023_v4  }
  0x23   : > { %365 = vperm.xlu1 %3872, %v287_v11  }
  0x25   : > { %1893 = vperm.xlu0 %3887, %v4061_v12  }
  0x27   : > { %375 = vperm.xlu1 %3872, %v289_v13  }
  0x29   : > { %1905 = vperm.xlu0 %3887, %v4038_v7  }
  0x2b   : > { %385 = vperm.xlu1 %3872, %v291_v14  }
  0x2d   : > { %1913 = vperm.xlu0 %3887, %v4050_v10  }
  0x2f   : > { %3873 = vset.pattern.permute.xlu1 %v7833_v15 }
  0x30   : > { %597 = vperm.xlu1 %3873, %v4043_v8  }
  0x31   : > { %1921 = vperm.xlu0 %3887, %v287_v11  }
  0x34   : > { %601 = vperm.xlu1 %3873, %v4009_v0  }
  0x35   : > { %1929 = vperm.xlu0 %3887, %v289_v13  }
  0x38   : > { %609 = vperm.xlu1 %3873, %v4061_v12  }
  0x39   : > { %1937 = vperm.xlu0 %3887, %v291_v14  }
  0x3c   : > { %617 = vperm.xlu1 %3873, %v4079_v16  }
  0x3d   : > { %3917 = vset.pattern.permute.xlu0 %v7827_v17 }
  0x3e   : > { %989 = vperm.xlu0 %3917, %v4043_v8  }
  0x40   : > { %625 = vperm.xlu1 %3873, %v4086_v18  }
  0x42   : > { %1001 = vperm.xlu0 %3917, %v4061_v12  }
  0x44   : > { %633 = vperm.xlu1 %3873, %v4093_v19  }
  0x46   : > { %1009 = vperm.xlu0 %3917, %v4079_v16  }
  0x48   : > { %641 = vperm.xlu1 %3873, %v4100_v20  }
  0x4a   : > { %1017 = vperm.xlu0 %3917, %v4086_v18  }
  0x4c   : > { %649 = vperm.xlu1 %3873, %v4107_v21  }
  0x4e   : > { %1025 = vperm.xlu0 %3917, %v4093_v19  }
  0x50   : > { %3874 = vset.pattern.permute.xlu1 %v7827_v17 }
  0x51   : > { %985 = vperm.xlu1 %3874, %v4014_v1  }
  0x52   : > { %1033 = vperm.xlu0 %3917, %v4100_v20  }
  0x55   : > { %993 = vperm.xlu1 %3874, %v4009_v0  }
  0x56   : > { %1041 = vperm.xlu0 %3917, %v4107_v21  }
  0x59   : > { %997 = vperm.xlu1 %3874, %v4023_v4  }
  0x5a   : > { %3919 = vset.pattern.permute.xlu0 %v7833_v15 }
  0x5b   : > { %593 = vperm.xlu0 %3919, %v4014_v1  }
  0x5d   : > { %3875 = vset.pattern.permute.xlu1 %v7831_v9 }
  0x5e   : > { %1877 = vperm.xlu1 %3875, %v4014_v1  }
  0x5f   : > { %605 = vperm.xlu0 %3919, %v4023_v4  }
  0x62   : > { %3876 = vset.pattern.permute.xlu1 %v7829_v6 }
  0x63   : > { %613 = vperm.xlu0 %3919, %v4030_v5   ;;  %2145 = vperm.xlu1 %3876, %v4014_v1  }
  0x67   : > { %621 = vperm.xlu0 %3919, %v4038_v7   ;;  %2149 = vperm.xlu1 %3876, %v4043_v8  }
  0x6b   : > { %629 = vperm.xlu0 %3919, %v4050_v10   ;;  %3878 = vset.pattern.permute.xlu1 %v7836_v2 }
  0x6c   : > { %2541 = vperm.xlu1 %3878, %v4043_v8  }
  0x6f   : > { %637 = vperm.xlu0 %3919, %v287_v11   ;;  %v4271_v11 = vsub.s32 2, %v393_v33 }
  0x70   : > { %3879 = vset.pattern.permute.xlu1 %v7831_v9 }
  0x71   : > { %1885 = vperm.xlu1 %3879, %v4009_v0   ;;  %v1051_v60 = vrot.slane %v4200_v37, %v4271_v11  ;;  %v1059_v62 = vrot.slane %v4204_v39, %v4271_v11 }
  0x73   : > { %645 = vperm.xlu0 %3919, %v289_v13   ;;  %v4273_v13 = vsub.s32 6, %v393_v33  ;;  %v4300_v33 = vrot.slane %v659_v59, %v4223_v47  ;;  %v4327_v59 = vld [vmem:[%s266_s8 + $0x8] sm:$0x77] }
  0x75   : > { %3880 = vset.pattern.permute.xlu1 %v7829_v6  ;;  %v1055_v61 = vrot.slane %v4200_v37, %v4273_v13  ;;  %v1071_v37 = vrot.slane %v4219_v45, %v4273_v13 }
  0x76   : > { %2153 = vperm.xlu1 %3880, %v4009_v0  }
  0x77   : > { %653 = vperm.xlu0 %3919, %v291_v14   ;;  %v4276_v14 = vrot.slane %v407_v50, %v4197_v36 }
  0x79   : > { %8142 = vst [vmem:[#allocation9_spill] sm:$0xff] %v4276_v14 }
  0x7a   : > { %2157 = vperm.xlu1 %3880, %v4023_v4   ;;  %v683_v4 = vrot.slane %v4221_v46, %v4223_v47 }
  0x7b   : > { %2937 = vperm.xlu0 %3919, %v4138_v22  }
  0x7e   : > { %3881 = vset.pattern.permute.xlu1 %v7825_v3 }
  0x7f   : > { %2945 = vperm.xlu0 %3919, %v4145_v23   ;;  %1383 = vperm.xlu1 %3881, %v293_v24  }
  0x83   : > { %2953 = vperm.xlu0 %3919, %v4155_v25   ;;  %3882 = vset.pattern.permute.xlu1 %v7836_v2 }
  0x84   : > { %2545 = vperm.xlu1 %3882, %v4009_v0   ;;  %v675_v0 = vrot.slane %v4219_v45, %v4223_v47 }
  0x87   : > { %2961 = vperm.xlu0 %3919, %v300_v26  }
  0x88   : > { %3883 = vset.pattern.permute.xlu1 %v7833_v15  ;;  %v1955_v15 = vrot.slane %v4327_v59, %v4197_v36 }
  0x89   : > { %2929 = vperm.xlu1 %3883, %v4166_v27  }
  0x8b   : > { %2969 = vperm.xlu0 %3919, %v302_v28   ;;  %v4290_v28 = vrot.slane %v415_v53, %v4197_v36 }
  0x8d   : > { %2933 = vperm.xlu1 %3883, %v293_v24   ;;  %v4279_v24 = vrot.slane %v411_v52, %v4197_v36  ;;  %8144 = vst [vmem:[#allocation11_spill] sm:$0xff] %v4290_v28  ;;  %v4314_v52 = vrot.slane %v675_v0, %v4223_v47  ;;  %v1063_v0 = vrot.slane %v4204_v39, %v4273_v13 }
  0x8e   : > { %v4180_v31 = vpop.permute.xlu1 %320  ;;  %v4182_v32 = vpop.permute.xlu0 %2537  ;;  %v1079_v39 = vrot.slane %v4221_v46, %v4273_v13 }
  0x8f   : > { %2977 = vperm.xlu0 %3919, %v304_v30   ;;  %8143 = vst [vmem:[#allocation10_spill] sm:$0xff] %v4279_v24  ;;  %v4296_v30 = vrot.slane %v423_v58, %v4197_v36  ;;  %8150 = vst [vmem:[#allocation17_spill] sm:$0xff] %v4314_v52  ;;  %v4325_v58 = vld [vmem:[%s266_s8] sm:$0x77] }
  0x91   : > { %3884 = vset.pattern.permute.xlu1 %v7831_v9  ;;  %8146 = vst [vmem:[#allocation13_spill] sm:$0xff] %v4296_v30  ;;  %v1951_v9 = vrot.slane %v4325_v58, %v4202_v38 }
  0x92   : > { %v4191_v34 = vpop.permute.xlu1 %325  ;;  %1897 = vperm.xlu1 %3884, %v4030_v5   ;;  %v4194_v35 = vpop.permute.xlu0 %2549 }
  0x93   : > { %3923 = vset.pattern.permute.xlu0 %v7825_v3 }
  0x94   : > { %310 = vperm.xlu0 %3923, %v4014_v1   ;;  %v679_v1 = vrot.slane %v4219_v45, %v4225_v48 }
  0x96   : > { %v4206_v40 = vpop.permute.xlu1 %335  ;;  %3885 = vset.pattern.permute.xlu1 %v7829_v6  ;;  %v4317_v53 = vrot.slane %v679_v1, %v4223_v47  ;;  %v4337_v1 = vld [vmem:[%s266_s8 + $0x10] sm:$0x77]  ;;  %v1947_v6 = vrot.slane %v4325_v58, %v4197_v36 }
  0x97   : > { %2161 = vperm.xlu1 %3885, %v4061_v12   ;;  %v4210_v41 = vpop.permute.xlu0 %2165 }
  0x98   : > { %8138 = vst [vmem:[#allocation5_spill] sm:$0xff] %v4210_v41  ;;  %315 = vperm.xlu0 %3923, %v4043_v8   ;;  %v687_v8 = vrot.slane %v4221_v46, %v4225_v48  ;;  %8151 = vst [vmem:[#allocation18_spill] sm:$0xff] %v4317_v53  ;;  %v4376_v41 = vrot.slane %v1055_v61, %v4271_v11  ;;  %v4397_v61 = vrot.slane %v1079_v39, %v4271_v11 }
  0x9a   : > { %v4227_v49 = vpop.permute.xlu1 %345  ;;  %v4323_v54 = vrot.slane %v687_v8, %v4223_v47  ;;  %8157 = vst [vmem:[#allocation24_spill] sm:$0xff] %v4376_v41  ;;  %8164 = vst [vmem:[#allocation31_spill] sm:$0xff] %v4397_v61  ;;  %v2623_v61 = vrot.slane %v4337_v1, %v4273_v13  ;;  %v2227_v41 = vrot.slane %v4337_v1, %v4223_v47 }
  0x9b   : > { %3888 = vset.pattern.permute.xlu1 %v7827_v17  ;;  %v1075_v17 = vrot.slane %v4221_v46, %v4271_v11  ;;  %v1963_v46 = vrot.slane %v4337_v1, %v4197_v36 }
  0x9c   : > { %330 = vperm.xlu0 %3923, %v4061_v12   ;;  %1005 = vperm.xlu1 %3888, %v4030_v5   ;;  %v4243_v55 = vpop.permute.xlu0 %1881  ;;  %8153 = vst [vmem:[#allocation20_spill] sm:$0xff] %v4323_v54  ;;  %v4382_v54 = vrot.slane %v1063_v0, %v4271_v11  ;;  %v4403_v0 = vrot.slane %v1951_v9, %v4197_v36 }
  0x9e   : > { %v4261_v63 = vpop.permute.xlu1 %355  ;;  %8159 = vst [vmem:[#allocation26_spill] sm:$0xff] %v4382_v54  ;;  %8166 = vst [vmem:[#allocation33_spill] sm:$0xff] %v4403_v0 }
  0xa0   : > { %340 = vperm.xlu0 %3923, %v4079_v16   ;;  %3889 = vset.pattern.permute.xlu1 %v7825_v3  ;;  %v4287_v26 = vpop.permute.xlu0 %1889  ;;  %v1067_v3 = vrot.slane %v4219_v45, %v4271_v11  ;;  %v1959_v45 = vrot.slane %v4327_v59, %v4202_v38 }
  0xa1   : > { %1388 = vperm.xlu1 %3889, %v4138_v22   ;;  %v4320_v22 = vrot.slane %v683_v4, %v4223_v47  ;;  %v4339_v4 = vld [vmem:[%s266_s8 + $0x18] sm:$0x77] }
  0xa2   : > { %v4311_v50 = vpop.permute.xlu1 %365  ;;  %v1971_v25 = vrot.slane %v4339_v4, %v4197_v36  ;;  %v1975_v10 = vrot.slane %v4339_v4, %v4202_v38  ;;  %v4388_v53 = vrot.slane %v1067_v3, %v4271_v11  ;;  %v4409_v3 = vrot.slane %v1959_v45, %v4197_v36 }
  0xa3   : > { %8149 = vst [vmem:[#allocation16_spill] sm:$0xff] %v4311_v50  ;;  %8152 = vst [vmem:[#allocation19_spill] sm:$0xff] %v4320_v22  ;;  %v2607_v45 = vrot.slane %v4325_v58, %v4273_v13  ;;  %v2631_v54 = vrot.slane %v4339_v4, %v4273_v13 }
  0xa4   : > { %350 = vperm.xlu0 %3923, %v4086_v18   ;;  %v4342_v8 = vpop.permute.xlu0 %1893  ;;  %v4373_v18 = vrot.slane %v1051_v60, %v4271_v11  ;;  %8161 = vst [vmem:[#allocation28_spill] sm:$0xff] %v4388_v53  ;;  %v4394_v60 = vrot.slane %v1075_v17, %v4271_v11  ;;  %8168 = vst [vmem:[#allocation35_spill] sm:$0xff] %v4409_v3  ;;  %v4415_v17 = vrot.slane %v1963_v46, %v4197_v36 }
  0xa5   : > { %8154 = vst [vmem:[#allocation21_spill] sm:$0xff] %v4342_v8  ;;  %3890 = vset.pattern.permute.xlu1 %v7836_v2  ;;  %v1967_v2 = vrot.slane %v4337_v1, %v4202_v38  ;;  %v4391_v38 = vrot.slane %v1071_v37, %v4271_v11  ;;  %v4424_v9 = vrot.slane %v1975_v10, %v4197_v36  ;;  %v295_v10 = vld [vmem:[%s7821_s3 + $0x18] sm:$0xff] }
  0xa6   : > { %v4361_v8 = vpop.permute.xlu1 %375  ;;  %2553 = vperm.xlu1 %3890, %v4061_v12   ;;  %8156 = vst [vmem:[#allocation23_spill] sm:$0xff] %v4373_v18  ;;  %v4379_v12 = vrot.slane %v1059_v62, %v4271_v11  ;;  %8163 = vst [vmem:[#allocation30_spill] sm:$0xff] %v4394_v60  ;;  %v4400_v62 = vrot.slane %v1947_v6, %v4197_v36  ;;  %v4421_v6 = vrot.slane %v1971_v25, %v4197_v36 }
  0xa7   : > { %8155 = vst [vmem:[#allocation22_spill] sm:$0xff] %v4361_v8  ;;  %8162 = vst [vmem:[#allocation29_spill] sm:$0xff] %v4391_v38  ;;  %v4418_v39 = vrot.slane %v1967_v2, %v4197_v36  ;;  %v2615_v46 = vrot.slane %v4327_v59, %v4273_v13  ;;  %v2211_v25 = vrot.slane %v4325_v58, %v4223_v47 }
  0xa8   : > { %8158 = vst [vmem:[#allocation25_spill] sm:$0xff] %v4379_v12  ;;  %360 = vperm.xlu0 %3923, %v4093_v19   ;;  %v4385_v22 = vpop.permute.xlu0 %1905  ;;  %8165 = vst [vmem:[#allocation32_spill] sm:$0xff] %v4400_v62  ;;  %v4406_v19 = vrot.slane %v1955_v15, %v4197_v36  ;;  %v2603_v15 = vrot.slane %v4325_v58, %v4271_v11  ;;  %v2619_v36 = vrot.slane %v4337_v1, %v4271_v11  ;;  %v8175_v12 = vmov 1  }
  0xa9   : > { %8160 = vst [vmem:[#allocation27_spill] sm:$0xff] %v4385_v22  ;;  %8170 = vst [vmem:[#allocation37_spill] sm:$0xff] %v4415_v17  ;;  %v2627_v60 = vrot.slane %v4339_v4, %v4271_v11  ;;  %v2219_v38 = vrot.slane %v4327_v59, %v4223_v47  ;;  %v2223_v53 = vrot.slane %v4327_v59, %v4225_v48 }
  0xaa   : > { %8167 = vst [vmem:[#allocation34_spill] sm:$0xff] %v4406_v19  ;;  %v4411_v37 = vpop.permute.xlu1 %385  ;;  %2557 = vperm.xlu1 %3890, %v4030_v5   ;;  %8171 = vst [vmem:[#allocation38_spill] sm:$0xff] %v4418_v39  ;;  %v2611_v5 = vrot.slane %v4327_v59, %v4271_v11  ;;  %v2231_v18 = vrot.slane %v4337_v1, %v4225_v48  ;;  %v2239_v22 = vrot.slane %v4339_v4, %v4225_v48 }
  0xab   : > { %8169 = vst [vmem:[#allocation36_spill] sm:$0xff] %v4411_v37  ;;  %8172 = vst [vmem:[#allocation39_spill] sm:$0xff] %v4421_v6  ;;  %v4468_v59 = vrot.slane %v2603_v15, %v4271_v11  ;;  %v4471_v13 = vrot.slane %v2607_v45, %v4271_v11  ;;  %v4477_v1 = vrot.slane %v2615_v46, %v4271_v11 }
  0xac   : > { %8173 = vst [vmem:[#allocation40_spill] sm:$0xff] %v4424_v9  ;;  %370 = vperm.xlu0 %3923, %v4100_v20   ;;  %v4435_v2 = vpop.permute.xlu0 %1913  ;;  %v2215_v20 = vrot.slane %v4325_v58, %v4225_v48  ;;  %v2235_v58 = vrot.slane %v4339_v4, %v4223_v47  ;;  %v4483_v48 = vrot.slane %v2211_v25, %v4223_v47 }
  0xad   : > { %8174 = vst [vmem:[#allocation41_spill] sm:$0xff] %v4435_v2  ;;  %8176 = vst [vmem:[#allocation42_spill] sm:$0xff] %v4468_v59  ;;  %v4486_v4 = vrot.slane %v2619_v36, %v4271_v11  ;;  %v4489_v15 = vrot.slane %v2623_v61, %v4271_v11  ;;  %v4492_v45 = vrot.slane %v2627_v60, %v4271_v11 }
  0xae   : > { %3891 = vset.pattern.permute.xlu1 %v8175_v12  ;;  %8177 = vst [vmem:[#allocation43_spill] sm:$0xff] %v4471_v13  ;;  %v4474_v12 = vrot.slane %v2611_v5, %v4271_v11  ;;  %8179 = vst [vmem:[#allocation45_spill] sm:$0xff] %v4477_v1  ;;  %v4495_v5 = vrot.slane %v2215_v20, %v4223_v47  ;;  %v4498_v46 = vrot.slane %v2219_v38, %v4223_v47 }
  0xaf   : > { %v4465_v2 = vpop.permute.xlu1 %597  ;;  %2941 = vperm.xlu1 %3891, %v295_v10   ;;  %8181 = vst [vmem:[#allocation47_spill] sm:$0xff] %v4483_v48  ;;  %8182 = vst [vmem:[#allocation48_spill] sm:$0xff] %v4486_v4  ;;  %v4504_v25 = vrot.slane %v2631_v54, %v4271_v11  ;;  %v4507_v36 = vrot.slane %v2227_v41, %v4223_v47  ;;  %v4510_v61 = vrot.slane %v2231_v18, %v4223_v47 }
  0xb0   : > { %8178 = vst [vmem:[#allocation44_spill] sm:$0xff] %v4474_v12  ;;  %380 = vperm.xlu0 %3923, %v4107_v21   ;;  %v4480_v52 = vpop.permute.xlu0 %1921  ;;  %8183 = vst [vmem:[#allocation49_spill] sm:$0xff] %v4489_v15  ;;  %v4501_v21 = vrot.slane %v2223_v53, %v4223_v47  ;;  %v4513_v60 = vrot.slane %v2235_v58, %v4223_v47  ;;  %v4516_v20 = vrot.slane %v2239_v22, %v4223_v47 }
  0xb1   : > { %8180 = vst [vmem:[#allocation46_spill] sm:$0xff] %v4480_v52  ;;  %8184 = vst [vmem:[#allocation50_spill] sm:$0xff] %v4492_v45  ;;  %v8193_v52 = vmov 3   ;;  %v4523_v11 = vmul.f32 %v4468_v59, %v4182_v32  ;;  %v4527_v41 = vmul.f32 %v4471_v13, %v4182_v32  ;;  %v4531_v18 = vmul.f32 %v4474_v12, %v4182_v32 }
  0xb2   : > { %8185 = vst [vmem:[#allocation51_spill] sm:$0xff] %v4495_v5  ;;  %8186 = vst [vmem:[#allocation52_spill] sm:$0xff] %v4498_v46  ;;  %v4535_v47 = vmul.f32 %v4477_v1, %v4182_v32  ;;  %v4543_v22 = vmul.f32 %v4486_v4, %v4182_v32  ;;  %v4547_v54 = vmul.f32 %v4489_v15, %v4182_v32 }
  0xb3   : > { %8187 = vst [vmem:[#allocation53_spill] sm:$0xff] %v4501_v21  ;;  %8188 = vst [vmem:[#allocation54_spill] sm:$0xff] %v4504_v25  ;;  %v4518_v38 = vpop.permute.xlu1 %601  ;;  %3892 = vset.pattern.permute.xlu1 %v8193_v52  ;;  %v4551_v58 = vmul.f32 %v4492_v45, %v4182_v32  ;;  %v4597_v52 = vmul.f32 %v4249_v57, %v4191_v34 }
  0xb4   : > { %8189 = vst [vmem:[#allocation55_spill] sm:$0xff] %v4507_v36  ;;  %8190 = vst [vmem:[#allocation56_spill] sm:$0xff] %v4510_v61  ;;  %1378 = vperm.xlu0 %3923, %v4166_v27   ;;  %1901 = vperm.xlu1 %3892, %v4079_v16   ;;  %v4539_v53 = vpop.permute.xlu0 %1929  ;;  %v4559_v27 = vmul.f32 %v4233_v51, %v4180_v31 }
  0xb5   : > { %8191 = vst [vmem:[#allocation57_spill] sm:$0xff] %v4513_v60  ;;  %8192 = vst [vmem:[#allocation58_spill] sm:$0xff] %v4516_v20 }
  0xb6   : > { %8194 = vst [vmem:[#allocation59_spill] sm:$0xff] %v4523_v11  ;;  %8195 = vst [vmem:[#allocation60_spill] sm:$0xff] %v4527_v41  ;;  %v4589_v41 = vmul.f32 %v4233_v51, %v4191_v34  ;;  %v4593_v11 = vmul.f32 %v4246_v56, %v4191_v34 }
  0xb7   : > { %8196 = vst [vmem:[#allocation61_spill] sm:$0xff] %v4531_v18  ;;  %8197 = vst [vmem:[#allocation62_spill] sm:$0xff] %v4535_v47  ;;  %v4555_v47 = vmul.f32 %v4504_v25, %v4182_v32  ;;  %v4575_v32 = vmul.f32 %v4279_v24, %v4180_v31  ;;  %v4585_v18 = vpop.permute.xlu1 %609 }
  0xb8   : > { %8198 = vst [vmem:[#allocation63_spill] sm:$0xff] %v4539_v53  ;;  %8199 = vst [vmem:[#allocation64_spill] sm:$0xff] %v4543_v22  ;;  %v4563_v53 = vmul.f32 %v4246_v56, %v4180_v31  ;;  %v4567_v22 = vmul.f32 %v4249_v57, %v4180_v31  ;;  %1393 = vperm.xlu0 %3923, %v295_v10   ;;  %v4626_v10 = vmul.f32 %v4293_v29, %v4191_v34 }
  0xb9   : > { %8200 = vst [vmem:[#allocation65_spill] sm:$0xff] %v4547_v54  ;;  %8201 = vst [vmem:[#allocation66_spill] sm:$0xff] %v4551_v58  ;;  %v4571_v54 = vmul.f32 %v4276_v14, %v4180_v31  ;;  %v4583_v58 = vmul.f32 %v4293_v29, %v4180_v31 }
  0xba   : > { %8202 = vst [vmem:[#allocation67_spill] sm:$0xff] %v4555_v47  ;;  %v4579_v47 = vmul.f32 %v4290_v28, %v4180_v31  ;;  %8205 = vst [vmem:[#allocation70_spill] sm:$0xff] %v4585_v18  ;;  %v4604_v18 = vpop.permute.xlu0 %1937 }
  0xbb   : > { %8204 = vst [vmem:[#allocation69_spill] sm:$0xff] %v4583_v58  ;;  %8206 = vst [vmem:[#allocation71_spill] sm:$0xff] %v4589_v41  ;;  %v8209_v58 = vmov 4   ;;  %v4608_v41 = vmul.f32 %v4276_v14, %v4191_v34 }
  0xbc   : > { %8203 = vst [vmem:[#allocation68_spill] sm:$0xff] %v4579_v47  ;;  %8207 = vst [vmem:[#allocation72_spill] sm:$0xff] %v4593_v11  ;;  %v4601_v47 = vmul.f32 %v4296_v30, %v4180_v31  ;;  %3893 = vset.pattern.permute.xlu1 %v8209_v58  ;;  %v4612_v11 = vmul.f32 %v4279_v24, %v4191_v34  ;;  %v4622_v31 = vld [vmem:[%s7821_s3 + $0x28] sm:$0xff]  ;;  %v4646_v58 = vmul.f32 %v4477_v1, %v4194_v35 }
  0xbd   : > { %8208 = vst [vmem:[#allocation73_spill] sm:$0xff] %v4597_v52  ;;  %8210 = vst [vmem:[#allocation74_spill] sm:$0xff] %v4604_v18  ;;  %v4616_v52 = vmul.f32 %v4290_v28, %v4191_v34  ;;  %2169 = vperm.xlu1 %3893, %v4079_v16   ;;  %v4630_v18 = vmul.f32 %v4296_v30, %v4191_v34  ;;  %v4650_v34 = vmul.f32 %v4486_v4, %v4194_v35 }
  0xbe   : > { %8211 = vst [vmem:[#allocation75_spill] sm:$0xff] %v4608_v41  ;;  %8212 = vst [vmem:[#allocation76_spill] sm:$0xff] %v4612_v11  ;;  %v4634_v11 = vmul.f32 %v4468_v59, %v4194_v35  ;;  %v4642_v41 = vmul.f32 %v4474_v12, %v4194_v35  ;;  %1403 = vperm.xlu0 %3923, %v4622_v31   ;;  %v4729_v4 = vmul.f32 %v4290_v28, %v4227_v49 }
  0xbf   : > { %8213 = vst [vmem:[#allocation77_spill] sm:$0xff] %v4616_v52  ;;  %8214 = vst [vmem:[#allocation78_spill] sm:$0xff] %v4626_v10  ;;  %v4638_v52 = vmul.f32 %v4471_v13, %v4194_v35  ;;  %v4681_v10 = vmul.f32 %v4276_v14, %v4206_v40  ;;  %v4760_v1 = vmul.f32 %v4418_v39, %v4243_v55  ;;  %v8248_v13 = vmov 2  }
  0xc0   : > { %8215 = vst [vmem:[#allocation79_spill] sm:$0xff] %v4630_v18  ;;  %8216 = vst [vmem:[#allocation80_spill] sm:$0xff] %v4634_v11  ;;  %v4654_v18 = vmul.f32 %v4489_v15, %v4194_v35  ;;  %v4656_v11 = vpop.permute.xlu1 %617  ;;  %v4685_v15 = vmul.f32 %v4279_v24, %v4206_v40  ;;  %v4764_v12 = vmul.f32 %v4421_v6, %v4243_v55 }
  0xc1   : > { %8217 = vst [vmem:[#allocation81_spill] sm:$0xff] %v4638_v52  ;;  %8218 = vst [vmem:[#allocation82_spill] sm:$0xff] %v4642_v41  ;;  %v4660_v52 = vmul.f32 %v4233_v51, %v4206_v40  ;;  %v4664_v41 = vmul.f32 %v4246_v56, %v4206_v40  ;;  %2173 = vperm.xlu1 %3893, %v4038_v7   ;;  %v4775_v59 = vmul.f32 %v4246_v56, %v4261_v63 }
  0xc2   : > { %8219 = vst [vmem:[#allocation83_spill] sm:$0xff] %v4646_v58  ;;  %8220 = vst [vmem:[#allocation84_spill] sm:$0xff] %v4650_v34  ;;  %v4668_v58 = vmul.f32 %v4492_v45, %v4194_v35  ;;  %v4672_v34 = vmul.f32 %v4504_v25, %v4194_v35  ;;  %v4692_v35 = vpop.permute.xlu0 %989  ;;  %v4721_v25 = vmul.f32 %v4276_v14, %v4227_v49 }
  0xc3   : > { %8221 = vst [vmem:[#allocation85_spill] sm:$0xff] %v4654_v18  ;;  %8222 = vst [vmem:[#allocation86_spill] sm:$0xff] %v4656_v11  ;;  %v4677_v18 = vmul.f32 %v4249_v57, %v4206_v40  ;;  %v4725_v45 = vmul.f32 %v4279_v24, %v4227_v49 }
  0xc4   : > { %8223 = vst [vmem:[#allocation87_spill] sm:$0xff] %v4668_v58  ;;  %8224 = vst [vmem:[#allocation88_spill] sm:$0xff] %v4672_v34  ;;  %v4689_v58 = vmul.f32 %v4290_v28, %v4206_v40  ;;  %v4717_v34 = vmul.f32 %v4249_v57, %v4227_v49 }
  0xc5   : > { %8225 = vst [vmem:[#allocation89_spill] sm:$0xff] %v4677_v18  ;;  %8226 = vst [vmem:[#allocation90_spill] sm:$0xff] %v4681_v10  ;;  %v4697_v18 = vld [vmem:[%s7821_s3 + $0x38] sm:$0xff]  ;;  %v4701_v10 = vmul.f32 %v4233_v51, %v4227_v49  ;;  %3894 = vset.pattern.permute.xlu1 %v8248_v13 }
  0xc6   : > { %8227 = vst [vmem:[#allocation91_spill] sm:$0xff] %v4685_v15  ;;  %8228 = vst [vmem:[#allocation92_spill] sm:$0xff] %v4689_v58  ;;  %v4705_v15 = vmul.f32 %v4246_v56, %v4227_v49  ;;  %v4709_v58 = vmul.f32 %v4293_v29, %v4206_v40  ;;  %1413 = vperm.xlu0 %3923, %v4697_v18   ;;  %1013 = vperm.xlu1 %3894, %v4038_v7  }
  0xc7   : > { %8229 = vst [vmem:[#allocation93_spill] sm:$0xff] %v4692_v35  ;;  %8230 = vst [vmem:[#allocation94_spill] sm:$0xff] %v4697_v18  ;;  %v4713_v35 = vmul.f32 %v4296_v30, %v4206_v40  ;;  %v4735_v40 = vmul.f32 %v4400_v62, %v4243_v55  ;;  %v4771_v18 = vmul.f32 %v4233_v51, %v4261_v63 }
  0xc8   : > { %8231 = vst [vmem:[#allocation95_spill] sm:$0xff] %v4701_v10  ;;  %8232 = vst [vmem:[#allocation96_spill] sm:$0xff] %v4705_v15 }
  0xc9   : > { %8233 = vst [vmem:[#allocation97_spill] sm:$0xff] %v4709_v58  ;;  %8234 = vst [vmem:[#allocation98_spill] sm:$0xff] %v4713_v35  ;;  %v4731_v58 = vpop.permute.xlu1 %625  ;;  %v4756_v35 = vmul.f32 %v4415_v17, %v4243_v55 }
  0xca   : > { %8235 = vst [vmem:[#allocation99_spill] sm:$0xff] %v4717_v34  ;;  %8236 = vst [vmem:[#allocation100_spill] sm:$0xff] %v4721_v25  ;;  %v4739_v34 = vmul.f32 %v4403_v0, %v4243_v55  ;;  %v4743_v25 = vmul.f32 %v4406_v19, %v4243_v55 }
  0xcb   : > { %8237 = vst [vmem:[#allocation101_spill] sm:$0xff] %v4725_v45  ;;  %8238 = vst [vmem:[#allocation102_spill] sm:$0xff] %v4729_v4  ;;  %v4747_v45 = vmul.f32 %v4293_v29, %v4227_v49  ;;  %v4752_v4 = vmul.f32 %v4409_v3, %v4243_v55 }
  0xcc   : > { %8239 = vst [vmem:[#allocation103_spill] sm:$0xff] %v4731_v58  ;;  %8240 = vst [vmem:[#allocation104_spill] sm:$0xff] %v4735_v40 }
  0xcd   : > { %8241 = vst [vmem:[#allocation105_spill] sm:$0xff] %v4739_v34  ;;  %8242 = vst [vmem:[#allocation106_spill] sm:$0xff] %v4743_v25  ;;  %v4801_v25 = vmul.f32 %v4279_v24, %v4261_v63  ;;  %v4836_v24 = vmul.f32 %v4421_v6, %v4287_v26 }
  0xce   : > { %8243 = vst [vmem:[#allocation107_spill] sm:$0xff] %v4747_v45  ;;  %8244 = vst [vmem:[#allocation108_spill] sm:$0xff] %v4752_v4  ;;  %v4767_v45 = vpop.permute.xlu0 %1001  ;;  %v4797_v4 = vmul.f32 %v4276_v14, %v4261_v63  ;;  %v4840_v14 = vmul.f32 %v4424_v9, %v4287_v26 }
  0xcf   : > { %8245 = vst [vmem:[#allocation109_spill] sm:$0xff] %v4756_v35  ;;  %8246 = vst [vmem:[#allocation110_spill] sm:$0xff] %v4760_v1  ;;  %v4780_v1 = vld [vmem:[%s7821_s3 + $0x48] sm:$0xff]  ;;  %v4793_v35 = vmul.f32 %v4249_v57, %v4261_v63 }
  0xd0   : > { %8247 = vst [vmem:[#allocation111_spill] sm:$0xff] %v4764_v12  ;;  %8249 = vst [vmem:[#allocation112_spill] sm:$0xff] %v4767_v45  ;;  %v4784_v12 = vmul.f32 %v4424_v9, %v4243_v55  ;;  %v4788_v45 = vmul.f32 %v4296_v30, %v4227_v49  ;;  %v4805_v55 = vmul.f32 %v4290_v28, %v4261_v63  ;;  %v4807_v49 = vpop.permute.xlu1 %633  ;;  %1423 = vperm.xlu0 %3923, %v4780_v1  }
  0xd1   : > { %8250 = vst [vmem:[#allocation113_spill] sm:$0xff] %v4771_v18  ;;  %8251 = vst [vmem:[#allocation114_spill] sm:$0xff] %v4775_v59  ;;  %v4832_v28 = vmul.f32 %v4418_v39, %v4287_v26 }
  0xd2   : > { %8252 = vst [vmem:[#allocation115_spill] sm:$0xff] %v4780_v1  ;;  %8253 = vst [vmem:[#allocation116_spill] sm:$0xff] %v4784_v12  ;;  %v4842_v57 = vpop.permute.xlu0 %1009  ;;  %v4846_v1 = vmul.f32 %v4233_v51, %v4311_v50 }
  0xd3   : > { %8254 = vst [vmem:[#allocation117_spill] sm:$0xff] %v4788_v45  ;;  %8255 = vst [vmem:[#allocation118_spill] sm:$0xff] %v4793_v35  ;;  %v4811_v45 = vmul.f32 %v4400_v62, %v4287_v26  ;;  %v4815_v35 = vmul.f32 %v4403_v0, %v4287_v26 }
  0xd4   : > { %8256 = vst [vmem:[#allocation119_spill] sm:$0xff] %v4797_v4  ;;  %8257 = vst [vmem:[#allocation120_spill] sm:$0xff] %v4801_v25  ;;  %v4819_v4 = vmul.f32 %v4406_v19, %v4287_v26  ;;  %v4823_v25 = vmul.f32 %v4409_v3, %v4287_v26 }
  0xd5   : > { %8258 = vst [vmem:[#allocation121_spill] sm:$0xff] %v4805_v55  ;;  %8259 = vst [vmem:[#allocation122_spill] sm:$0xff] %v4807_v49  ;;  %v4828_v55 = vmul.f32 %v4415_v17, %v4287_v26  ;;  %v4861_v26 = vmul.f32 %v4296_v30, %v4261_v63  ;;  %v4893_v30 = vmul.f32 %v4306_v43, %v4465_v2 }
  0xd6   : > { %8260 = vst [vmem:[#allocation123_spill] sm:$0xff] %v4811_v45  ;;  %8261 = vst [vmem:[#allocation124_spill] sm:$0xff] %v4815_v35  ;;  %v4915_v35 = vpop.permute.xlu0 %1017 }
  0xd7   : > { %8262 = vst [vmem:[#allocation125_spill] sm:$0xff] %v4819_v4  ;;  %8263 = vst [vmem:[#allocation126_spill] sm:$0xff] %v4823_v25  ;;  %v4874_v25 = vmul.f32 %v4233_v51, %v4411_v37  ;;  %v8289_v4 = vld [vmem:[#allocation20_spill] sm:$0xff] }
  0xd8   : > { %8264 = vst [vmem:[#allocation127_spill] sm:$0xff] %v4828_v55  ;;  %8265 = vst [vmem:[#allocation128_spill] sm:$0xff] %v4832_v28  ;;  %v4850_v55 = vmul.f32 %v4246_v56, %v4311_v50  ;;  %v303_v28 = vld [vmem:[%s7821_s3 + $0x58] sm:$0xff]  ;;  %v4870_v50 = vmul.f32 %v4246_v56, %v4361_v8  ;;  %v751_v34 = vmul.f32 %v8289_v4, %v4518_v38 }
  0xd9   : > { %8266 = vst [vmem:[#allocation129_spill] sm:$0xff] %v4836_v24  ;;  %8267 = vst [vmem:[#allocation130_spill] sm:$0xff] %v4840_v14  ;;  %v4857_v24 = vmul.f32 %v4293_v29, %v4261_v63  ;;  %v4866_v14 = vmul.f32 %v4233_v51, %v4361_v8  ;;  %v4880_v63 = vpop.permute.xlu1 %641  ;;  %v4889_v8 = vmul.f32 %v4303_v42, %v4465_v2  ;;  %1433 = vperm.xlu0 %3923, %v303_v28   ;;  %v8283_v29 = vld [vmem:[#allocation17_spill] sm:$0xff]  ;;  %v8287_v51 = vld [vmem:[#allocation19_spill] sm:$0xff] }
  0xda   : > { %8268 = vst [vmem:[#allocation131_spill] sm:$0xff] %v4842_v57  ;;  %8269 = vst [vmem:[#allocation132_spill] sm:$0xff] %v4846_v1  ;;  %v8273_v57 = vmov 0   ;;  %v305_v28 = vld [vmem:[%s7821_s3 + $0x68] sm:$0xff]  ;;  %v4968_v1 = vpop.permute.xlu0 %1025 }
  0xdb   : > { %8270 = vst [vmem:[#allocation133_spill] sm:$0xff] %v4850_v55  ;;  %8271 = vst [vmem:[#allocation134_spill] sm:$0xff] %v4857_v24  ;;  %3895 = vset.pattern.permute.xlu1 %v8273_v57  ;;  %v4878_v24 = vmul.f32 %v4246_v56, %v4411_v37  ;;  %v4897_v37 = vmul.f32 %v4309_v44, %v4465_v2  ;;  %v8285_v56 = vld [vmem:[#allocation18_spill] sm:$0xff] }
  0xdc   : > { %8272 = vst [vmem:[#allocation135_spill] sm:$0xff] %v4861_v26  ;;  %8274 = vst [vmem:[#allocation136_spill] sm:$0xff] %v4866_v14  ;;  %1398 = vperm.xlu1 %3895, %v4145_v23   ;;  %v4885_v26 = vmul.f32 %v4300_v33, %v4465_v2  ;;  %v4901_v23 = vmul.f32 %v8283_v29, %v4465_v2  ;;  %v749_v45 = vmul.f32 %v8285_v56, %v4518_v38 }
  0xdd   : > { %8275 = vst [vmem:[#allocation137_spill] sm:$0xff] %v4870_v50  ;;  %8276 = vst [vmem:[#allocation138_spill] sm:$0xff] %v4874_v25  ;;  %v8295_v25 = vmov 5   ;;  %1443 = vperm.xlu0 %3923, %v305_v28  }
  0xde   : > { %8277 = vst [vmem:[#allocation139_spill] sm:$0xff] %v4878_v24  ;;  %8278 = vst [vmem:[#allocation140_spill] sm:$0xff] %v4880_v63  ;;  %v4938_v24 = vpop.permute.xlu1 %649 }
  0xdf   : > { %8279 = vst [vmem:[#allocation141_spill] sm:$0xff] %v4885_v26  ;;  %8280 = vst [vmem:[#allocation142_spill] sm:$0xff] %v4889_v8  ;;  %v4905_v26 = vmul.f32 %v8285_v56, %v4465_v2  ;;  %v4909_v8 = vmul.f32 %v8287_v51, %v4465_v2 }
  0xe0   : > { %8281 = vst [vmem:[#allocation143_spill] sm:$0xff] %v4893_v30  ;;  %8282 = vst [vmem:[#allocation144_spill] sm:$0xff] %v4897_v37  ;;  %v4913_v30 = vmul.f32 %v8289_v4, %v4465_v2  ;;  %v8292_v37 = vld [vmem:[#allocation5_spill] sm:$0xff]  ;;  %v746_v2 = vmul.f32 %v4306_v43, %v4518_v38  ;;  %3896 = vset.pattern.permute.xlu1 %v8295_v25 }
  0xe1   : > { %8284 = vst [vmem:[#allocation145_spill] sm:$0xff] %v4901_v23  ;;  %8286 = vst [vmem:[#allocation146_spill] sm:$0xff] %v4905_v26  ;;  %v4922_v23 = vmul.f32 %v4483_v48, %v8292_v37  ;;  %v744_v26 = vmul.f32 %v4300_v33, %v4518_v38  ;;  %v4943_v50 = vmul.f32 %v4495_v5, %v8292_v37  ;;  %2561 = vperm.xlu1 %3896, %v4079_v16  }
  0xe2   : > { %8288 = vst [vmem:[#allocation147_spill] sm:$0xff] %v4909_v8  ;;  %8290 = vst [vmem:[#allocation148_spill] sm:$0xff] %v4913_v30  ;;  %v745_v8 = vmul.f32 %v4303_v42, %v4518_v38  ;;  %v748_v30 = vmul.f32 %v8283_v29, %v4518_v38  ;;  %v4947_v14 = vmul.f32 %v4498_v46, %v8292_v37 }
  0xe3   : > { %8291 = vst [vmem:[#allocation149_spill] sm:$0xff] %v4915_v35  ;;  %8293 = vst [vmem:[#allocation5_spill] sm:$0xff] %v4922_v23  ;;  %v747_v35 = vmul.f32 %v4309_v44, %v4518_v38  ;;  %v750_v23 = vmul.f32 %v8287_v51, %v4518_v38  ;;  %v4951_v12 = vmul.f32 %v4501_v21, %v8292_v37  ;;  %v307_v38 = vld [vmem:[%s7821_s3 + $0x78] sm:$0xff] }
  0xe4   : > { %8294 = vst [vmem:[#allocation150_spill] sm:$0xff] %v4938_v24  ;;  %8296 = vst [vmem:[#allocation151_spill] sm:$0xff] %v4943_v50  ;;  %v4958_v55 = vmul.f32 %v4507_v36, %v8292_v37  ;;  %v4962_v50 = vmul.f32 %v4510_v61, %v8292_v37  ;;  %v4975_v16 = vmul.f32 %v4516_v20, %v8292_v37  ;;  %1453 = vperm.xlu0 %3923, %v307_v38  }
  0xe5   : > { %8297 = vst [vmem:[#allocation152_spill] sm:$0xff] %v4947_v14  ;;  %8298 = vst [vmem:[#allocation153_spill] sm:$0xff] %v4951_v12  ;;  %v4966_v14 = vmul.f32 %v4513_v60, %v8292_v37  ;;  %v4978_v28 = vadd.f32 %v744_v26, %v4559_v27  ;;  %v8304_v12 = vld [vmem:[#allocation68_spill] sm:$0xff]  ;;  %v8305_v37 = vld [vmem:[#allocation69_spill] sm:$0xff]  ;;  %2565 = vperm.xlu1 %3896, %v4038_v7   ;;  %v5034_v7 = vmul.f32 %v4303_v42, %v4807_v49 }
  0xe6   : > { %8299 = vst [vmem:[#allocation154_spill] sm:$0xff] %v4958_v55  ;;  %8300 = vst [vmem:[#allocation155_spill] sm:$0xff] %v4962_v50  ;;  %v4981_v55 = vadd.f32 %v745_v8, %v4563_v53  ;;  %v4984_v50 = vadd.f32 %v746_v2, %v4567_v22  ;;  %v4993_v40 = vadd.f32 %v749_v45, %v8304_v12  ;;  %v8306_v27 = vld [vmem:[#allocation70_spill] sm:$0xff]  ;;  %v986_v12 = vpop.permute.xlu1 %985 }
  0xe7   : > { %8301 = vst [vmem:[#allocation156_spill] sm:$0xff] %v4966_v14  ;;  %8302 = vst [vmem:[#allocation157_spill] sm:$0xff] %v4968_v1  ;;  %v4987_v14 = vadd.f32 %v747_v35, %v4571_v54  ;;  %v4990_v1 = vadd.f32 %v748_v30, %v4575_v32  ;;  %v5000_v26 = vmul.f32 %v4300_v33, %v8306_v27  ;;  %v5026_v32 = vpop.permute.xlu0 %1033  ;;  %v8319_v2 = vld [vmem:[#allocation46_spill] sm:$0xff] }
  0xe8   : > { %8303 = vst [vmem:[#allocation158_spill] sm:$0xff] %v4975_v16  ;;  %v4996_v16 = vadd.f32 %v750_v23, %v8305_v37  ;;  %v5004_v8 = vmul.f32 %v4303_v42, %v8306_v27  ;;  %v5008_v53 = vmul.f32 %v4300_v33, %v4656_v11  ;;  %v5011_v30 = vadd.f32 %v751_v34, %v4601_v47  ;;  %v8316_v34 = vld [vmem:[#allocation41_spill] sm:$0xff] }
  0xe9   : > { %8307 = vst [vmem:[#allocation68_spill] sm:$0xff] %v5000_v26  ;;  %v5016_v45 = vmul.f32 %v4303_v42, %v4656_v11  ;;  %v5020_v22 = vmul.f32 %v4300_v33, %v4731_v58  ;;  %v5024_v54 = vmul.f32 %v4303_v42, %v4731_v58  ;;  %8313 = vst [vmem:[#allocation163_spill] sm:$0xff] %v5026_v32  ;;  %v8322_v58 = vld [vmem:[#allocation27_spill] sm:$0xff] }
  0xea   : > { %8308 = vst [vmem:[#allocation69_spill] sm:$0xff] %v5004_v8  ;;  %8309 = vst [vmem:[#allocation159_spill] sm:$0xff] %v5008_v53  ;;  %v5030_v47 = vmul.f32 %v4300_v33, %v4807_v49  ;;  %v5038_v35 = vmul.f32 %v4400_v62, %v8316_v34  ;;  %v5042_v23 = vmul.f32 %v4403_v0, %v8316_v34  ;;  %v8352_v53 = vld [vmem:[#allocation30_spill] sm:$0xff] }
  0xeb   : > { %8310 = vst [vmem:[#allocation160_spill] sm:$0xff] %v5016_v45  ;;  %8311 = vst [vmem:[#allocation161_spill] sm:$0xff] %v5020_v22  ;;  %v5046_v38 = vmul.f32 %v4400_v62, %v8319_v2  ;;  %v5050_v37 = vmul.f32 %v4403_v0, %v8319_v2  ;;  %v5054_v49 = vmul.f32 %v4400_v62, %v8322_v58 }
  0xec   : > { %8312 = vst [vmem:[#allocation162_spill] sm:$0xff] %v5024_v54  ;;  %8314 = vst [vmem:[#allocation164_spill] sm:$0xff] %v5030_v47  ;;  %v5058_v11 = vmul.f32 %v4403_v0, %v8322_v58  ;;  %v5062_v34 = vmul.f32 %v4406_v19, %v8322_v58  ;;  %v5070_v2 = vmul.f32 %v4415_v17, %v8322_v58  ;;  %v8345_v47 = vld [vmem:[#allocation26_spill] sm:$0xff]  ;;  %v8348_v54 = vld [vmem:[#allocation28_spill] sm:$0xff] }
  0xed   : > { %8315 = vst [vmem:[#allocation165_spill] sm:$0xff] %v5034_v7  ;;  %8317 = vst [vmem:[#allocation166_spill] sm:$0xff] %v5038_v35  ;;  %v994_v35 = vpop.permute.xlu1 %993  ;;  %v5130_v22 = vmul.f32 %v8348_v54, %v986_v12  ;;  %v5166_v59 = vmul.f32 %v8283_v29, %v8306_v27 }
  0xee   : > { %8318 = vst [vmem:[#allocation167_spill] sm:$0xff] %v5042_v23  ;;  %8320 = vst [vmem:[#allocation168_spill] sm:$0xff] %v5046_v38  ;;  %v5066_v23 = vmul.f32 %v4409_v3, %v8322_v58  ;;  %v8329_v38 = vmov 1   ;;  %v1142_v18 = vmul.f32 %v8352_v53, %v994_v35 }
  0xef   : > { %8321 = vst [vmem:[#allocation169_spill] sm:$0xff] %v5050_v37  ;;  %8323 = vst [vmem:[#allocation27_spill] sm:$0xff] %v5054_v49  ;;  %v5074_v37 = vmul.f32 %v4418_v39, %v8322_v58  ;;  %3897 = vset.pattern.permute.xlu1 %v8329_v38  ;;  %v5098_v49 = vmul.f32 %v4300_v33, %v4938_v24  ;;  %3927 = vset.pattern.permute.xlu0 %v8329_v38 }
  0xf0   : > { %8324 = vst [vmem:[#allocation170_spill] sm:$0xff] %v5058_v11  ;;  %8325 = vst [vmem:[#allocation171_spill] sm:$0xff] %v5062_v34  ;;  %v5079_v11 = vmul.f32 %v4300_v33, %v4880_v63  ;;  %v5083_v34 = vmul.f32 %v4303_v42, %v4880_v63  ;;  %2949 = vperm.xlu1 %3897, %v4622_v31   ;;  %v5102_v63 = vmul.f32 %v4303_v42, %v4938_v24 }
  0xf1   : > { %8326 = vst [vmem:[#allocation172_spill] sm:$0xff] %v5066_v23  ;;  %8327 = vst [vmem:[#allocation173_spill] sm:$0xff] %v5070_v2  ;;  %v5087_v23 = vmul.f32 %v4421_v6, %v8322_v58  ;;  %v5091_v2 = vmul.f32 %v4424_v9, %v8322_v58  ;;  %v5122_v24 = vmul.f32 %v8345_v47, %v986_v12  ;;  %v998_v8 = vpop.permute.xlu1 %997 }
  0xf2   : > { %8328 = vst [vmem:[#allocation174_spill] sm:$0xff] %v5074_v37  ;;  %8330 = vst [vmem:[#allocation175_spill] sm:$0xff] %v5079_v11  ;;  %v5094_v37 = vpop.permute.xlu0 %1041 }
  0xf3   : > { %8331 = vst [vmem:[#allocation176_spill] sm:$0xff] %v5083_v34  ;;  %8332 = vst [vmem:[#allocation177_spill] sm:$0xff] %v5087_v23  ;;  %v8337_v34 = vld [vmem:[#allocation23_spill] sm:$0xff]  ;;  %v8339_v23 = vld [vmem:[#allocation24_spill] sm:$0xff] }
  0xf4   : > { %8333 = vst [vmem:[#allocation178_spill] sm:$0xff] %v5091_v2  ;;  %8334 = vst [vmem:[#allocation179_spill] sm:$0xff] %v5094_v37  ;;  %v5105_v11 = vmul.f32 %v8337_v34, %v986_v12  ;;  %v5108_v7 = vmul.f32 %v8339_v23, %v986_v12  ;;  %v5112_v58 = vmul.f32 %v8337_v34, %v5026_v32  ;;  %v8343_v2 = vld [vmem:[#allocation25_spill] sm:$0xff] }
  0xf5   : > { %8335 = vst [vmem:[#allocation180_spill] sm:$0xff] %v5098_v49  ;;  %8336 = vst [vmem:[#allocation181_spill] sm:$0xff] %v5102_v63  ;;  %v5116_v31 = vmul.f32 %v8339_v23, %v5026_v32  ;;  %v5119_v49 = vmul.f32 %v8343_v2, %v986_v12  ;;  %v5127_v63 = vmul.f32 %v8343_v2, %v5026_v32  ;;  %v8354_v32 = vmov 3  }
  0xf6   : > { %8338 = vst [vmem:[#allocation182_spill] sm:$0xff] %v5105_v11  ;;  %8340 = vst [vmem:[#allocation183_spill] sm:$0xff] %v5108_v7  ;;  %v1136_v26 = vmul.f32 %v8337_v34, %v994_v35  ;;  %v1139_v7 = vmul.f32 %v8345_v47, %v994_v35  ;;  %3898 = vset.pattern.permute.xlu1 %v8354_v32  ;;  %v5157_v38 = vmul.f32 %v8337_v34, %v5094_v37 }
  0xf7   : > { %8341 = vst [vmem:[#allocation184_spill] sm:$0xff] %v5112_v58  ;;  %8342 = vst [vmem:[#allocation185_spill] sm:$0xff] %v5116_v31  ;;  %v8350_v58 = vld [vmem:[#allocation29_spill] sm:$0xff]  ;;  %v5136_v31 = vmul.f32 %v8352_v53, %v986_v12  ;;  %v5161_v32 = vmul.f32 %v8339_v23, %v5094_v37  ;;  %v5195_v10 = vmul.f32 %v8339_v23, %v998_v8 }
  0xf8   : > { %8344 = vst [vmem:[#allocation186_spill] sm:$0xff] %v5119_v49  ;;  %8346 = vst [vmem:[#allocation187_spill] sm:$0xff] %v5122_v24  ;;  %v5133_v45 = vmul.f32 %v8350_v58, %v986_v12  ;;  %v1137_v24 = vmul.f32 %v8339_v23, %v994_v35  ;;  %v1138_v49 = vmul.f32 %v8343_v2, %v994_v35 }
  0xf9   : > { %8347 = vst [vmem:[#allocation188_spill] sm:$0xff] %v5127_v63  ;;  %8349 = vst [vmem:[#allocation189_spill] sm:$0xff] %v5130_v22  ;;  %v8355_v63 = vld [vmem:[#allocation31_spill] sm:$0xff]  ;;  %v1140_v22 = vmul.f32 %v8348_v54, %v994_v35  ;;  %v5180_v25 = vadd.f32 %v1136_v26, %v4978_v28  ;;  %v5214_v26 = vmul.f32 %v8352_v53, %v998_v8 }
  0xfa   : > { %8351 = vst [vmem:[#allocation190_spill] sm:$0xff] %v5133_v45  ;;  %8353 = vst [vmem:[#allocation191_spill] sm:$0xff] %v5136_v31  ;;  %v5144_v11 = vmul.f32 %v8355_v63, %v986_v12  ;;  %v5149_v45 = vmul.f32 %v4306_v43, %v8306_v27  ;;  %v5153_v31 = vmul.f32 %v4309_v44, %v8306_v27  ;;  %v594_v12 = vpop.permute.xlu0 %593 }
  0xfb   : > { %8359 = vst [vmem:[#allocation195_spill] sm:$0xff] %v5157_v38  ;;  %8360 = vst [vmem:[#allocation196_spill] sm:$0xff] %v5161_v32  ;;  %v1141_v38 = vmul.f32 %v8350_v58, %v994_v35  ;;  %v1143_v32 = vmul.f32 %v8355_v63, %v994_v35  ;;  %v5183_v15 = vadd.f32 %v1137_v24, %v4981_v55  ;;  %v8370_v55 = vmov 4  }
  0xfc   : > { %8356 = vst [vmem:[#allocation192_spill] sm:$0xff] %v5144_v11  ;;  %8357 = vst [vmem:[#allocation193_spill] sm:$0xff] %v5149_v45  ;;  %v8361_v11 = vld [vmem:[#allocation3_spill] sm:$0xff]  ;;  %v5170_v45 = vmul.f32 %v8285_v56, %v8306_v27  ;;  %v5198_v35 = vmul.f32 %v8343_v2, %v998_v8  ;;  %v5201_v28 = vadd.f32 %v1140_v22, %v4990_v1 }
  0xfd   : > { %8358 = vst [vmem:[#allocation194_spill] sm:$0xff] %v5153_v31  ;;  %1909 = vperm.xlu1 %3898, %v8361_v11   ;;  %8362 = vst [vmem:[#allocation3_spill] sm:$0xff] %v5166_v59  ;;  %v5174_v31 = vmul.f32 %v8343_v2, %v5094_v37  ;;  %v5186_v59 = vadd.f32 %v1138_v49, %v4984_v50  ;;  %v1878_v37 = vpop.permute.xlu1 %1877  ;;  %v5205_v50 = vmul.f32 %v8345_v47, %v998_v8 }
  0xfe   : > { %8363 = vst [vmem:[#allocation197_spill] sm:$0xff] %v5170_v45  ;;  %8365 = vst [vmem:[#allocation199_spill] sm:$0xff] %v5180_v25  ;;  %v5189_v45 = vadd.f32 %v1139_v7, %v4987_v14  ;;  %v606_v24 = vpop.permute.xlu0 %605  ;;  %v5208_v14 = vmul.f32 %v8348_v54, %v998_v8  ;;  %v5211_v49 = vmul.f32 %v8350_v58, %v998_v8 }
  0xff   : > { %8364 = vst [vmem:[#allocation198_spill] sm:$0xff] %v5174_v31  ;;  %8366 = vst [vmem:[#allocation200_spill] sm:$0xff] %v5183_v15  ;;  %v5192_v31 = vmul.f32 %v8337_v34, %v998_v8  ;;  %v5217_v7 = vmul.f32 %v4300_v33, %v594_v12  ;;  %v5220_v1 = vmul.f32 %v4303_v42, %v594_v12 }
 0x100   : > { %8367 = vst [vmem:[#allocation201_spill] sm:$0xff] %v5186_v59  ;;  %8368 = vst [vmem:[#allocation202_spill] sm:$0xff] %v5189_v45  ;;  %v5223_v22 = vmul.f32 %v4306_v43, %v594_v12  ;;  %v5230_v45 = vmul.f32 %v4309_v44, %v594_v12  ;;  %v5233_v59 = vmul.f32 %v8283_v29, %v594_v12 }
 0x101   : > { %8369 = vst [vmem:[#allocation203_spill] sm:$0xff] %v5201_v28  ;;  %3899 = vset.pattern.permute.xlu1 %v8370_v55  ;;  %8371 = vst [vmem:[#allocation204_spill] sm:$0xff] %v5211_v49  ;;  %v5227_v28 = vmul.f32 %v8355_v63, %v998_v8  ;;  %v5236_v15 = vmul.f32 %v8285_v56, %v594_v12  ;;  %v5239_v25 = vmul.f32 %v8287_v51, %v594_v12  ;;  %v2146_v54 = vpop.permute.xlu1 %2145 }
 0x102   : > { %8372 = vst [vmem:[#allocation205_spill] sm:$0xff] %v5214_v26  ;;  %8373 = vst [vmem:[#allocation206_spill] sm:$0xff] %v5217_v7  ;;  %2177 = vperm.xlu1 %3899, %v8361_v11   ;;  %v752_v53 = vmul.f32 %v4300_v33, %v606_v24  ;;  %v753_v58 = vmul.f32 %v4303_v42, %v606_v24  ;;  %v5244_v11 = vmul.f32 %v8289_v4, %v594_v12  ;;  %v5249_v63 = vpop.permute.xlu0 %613 }
 0x103   : > { %8374 = vst [vmem:[#allocation207_spill] sm:$0xff] %v5220_v1  ;;  %8375 = vst [vmem:[#allocation208_spill] sm:$0xff] %v5223_v22  ;;  %v5247_v8 = vadd.f32 %v1141_v38, %v4993_v40  ;;  %v2016_v47 = vmul.f32 %v4400_v62, %v1878_v37  ;;  %v5253_v2 = vadd.f32 %v1142_v18, %v4996_v16  ;;  %v5306_v22 = vld [vmem:[%s7820_s2 + $0x48] sm:$0xff] }
 0x104   : > { %8376 = vst [vmem:[#allocation209_spill] sm:$0xff] %v5227_v28  ;;  %8377 = vst [vmem:[#allocation210_spill] sm:$0xff] %v5230_v45  ;;  %v5256_v23 = vadd.f32 %v1143_v32, %v5011_v30  ;;  %v5260_v34 = vmul.f32 %v8287_v51, %v8306_v27  ;;  %v754_v12 = vmul.f32 %v4306_v43, %v606_v24  ;;  %v8387_v27 = vld [vmem:[#allocation71_spill] sm:$0xff] }
 0x105   : > { %8378 = vst [vmem:[#allocation211_spill] sm:$0xff] %v5233_v59  ;;  %8379 = vst [vmem:[#allocation212_spill] sm:$0xff] %v5236_v15  ;;  %v2017_v40 = vmul.f32 %v4403_v0, %v1878_v37  ;;  %v2018_v38 = vmul.f32 %v4406_v19, %v1878_v37  ;;  %v755_v18 = vmul.f32 %v4309_v44, %v606_v24  ;;  %v5283_v59 = vpop.permute.xlu1 %2149  ;;  %v8390_v62 = vld [vmem:[#allocation75_spill] sm:$0xff] }
 0x106   : > { %8380 = vst [vmem:[#allocation213_spill] sm:$0xff] %v5239_v25  ;;  %8381 = vst [vmem:[#allocation214_spill] sm:$0xff] %v5244_v11  ;;  %v8386_v11 = vld [vmem:[#allocation2_spill] sm:$0xff]  ;;  %v2020_v16 = vmul.f32 %v4415_v17, %v1878_v37  ;;  %v2021_v30 = vmul.f32 %v4418_v39, %v1878_v37  ;;  %v2022_v32 = vmul.f32 %v4421_v6, %v1878_v37  ;;  %v5281_v15 = vpop.permute.xlu0 %621  ;;  %v8389_v17 = vld [vmem:[#allocation73_spill] sm:$0xff] }
 0x107   : > { %8382 = vst [vmem:[#allocation215_spill] sm:$0xff] %v5247_v8  ;;  %8383 = vst [vmem:[#allocation216_spill] sm:$0xff] %v5253_v2  ;;  %2181 = vperm.xlu1 %3899, %v8386_v11   ;;  %v2019_v8 = vmul.f32 %v4409_v3, %v1878_v37  ;;  %v2023_v11 = vmul.f32 %v4424_v9, %v1878_v37  ;;  %v5279_v25 = vmul.f32 %v8283_v29, %v606_v24 }
 0x108   : > { %8384 = vst [vmem:[#allocation217_spill] sm:$0xff] %v5256_v23  ;;  %8385 = vst [vmem:[#allocation218_spill] sm:$0xff] %v5260_v34  ;;  %v5272_v34 = vadd.f32 %v752_v53, %v8387_v27  ;;  %v8388_v23 = vld [vmem:[#allocation72_spill] sm:$0xff]  ;;  %v2280_v45 = vmul.f32 %v4483_v48, %v2146_v54  ;;  %v2281_v39 = vmul.f32 %v4495_v5, %v2146_v54 }
 0x109   : > { %v5275_v2 = vadd.f32 %v753_v58, %v8388_v23  ;;  %v2282_v6 = vmul.f32 %v4498_v46, %v2146_v54  ;;  %v5289_v27 = vmul.f32 %v8285_v56, %v606_v24  ;;  %v768_v53 = vmul.f32 %v4300_v33, %v5249_v63 }
 0x10a   : > { %v2283_v23 = vmul.f32 %v4501_v21, %v2146_v54  ;;  %v5296_v37 = vmul.f32 %v8287_v51, %v606_v24  ;;  %v5299_v58 = vmul.f32 %v8289_v4, %v606_v24  ;;  %v769_v9 = vmul.f32 %v4303_v42, %v5249_v63  ;;  %v5322_v4 = vpop.permute.xlu0 %629 }
 0x10b   : > { %3900 = vset.pattern.permute.xlu1 %v8248_v13  ;;  %v2284_v1 = vmul.f32 %v4507_v36, %v2146_v54  ;;  %v2285_v7 = vmul.f32 %v4510_v61, %v2146_v54  ;;  %v5312_v3 = vadd.f32 %v754_v12, %v8389_v17  ;;  %v784_v24 = vmul.f32 %v4300_v33, %v5281_v15 }
 0x10c   : > { %1021 = vperm.xlu1 %3900, %v5306_v22   ;;  %v785_v19 = vmul.f32 %v4303_v42, %v5281_v15  ;;  %v2286_v0 = vmul.f32 %v4513_v60, %v2146_v54  ;;  %v5320_v13 = vadd.f32 %v755_v18, %v8390_v62  ;;  %8391 = vst [vmem:[#allocation2_spill] sm:$0xff] %v5322_v4  ;;  %v5336_v62 = vpop.permute.xlu1 %2541 }
 0x10d   : > { %v2287_v51 = vmul.f32 %v4516_v20, %v2146_v54  ;;  %v2408_v56 = vadd.f32 %v2280_v45, %v2016_v47  ;;  %v2409_v29 = vadd.f32 %v2281_v39, %v2017_v40  ;;  %v2410_v28 = vadd.f32 %v2282_v6, %v2018_v38  ;;  %v8397_v40 = vld [vmem:[#allocation96_spill] sm:$0xff] }
 0x10e   : > { %v5327_v17 = vmul.f32 %v4306_v43, %v5249_v63  ;;  %v5331_v12 = vmul.f32 %v4309_v44, %v5249_v63  ;;  %v5334_v26 = vadd.f32 %v768_v53, %v4660_v52  ;;  %v2411_v18 = vadd.f32 %v2283_v23, %v2019_v8  ;;  %v8395_v52 = vld [vmem:[#allocation95_spill] sm:$0xff]  ;;  %v5357_v38 = vpop.permute.xlu0 %637 }
 0x10f   : > { %v5339_v49 = vadd.f32 %v769_v9, %v4664_v41  ;;  %v5343_v39 = vmul.f32 %v4306_v43, %v5281_v15  ;;  %v2412_v6 = vadd.f32 %v2284_v1, %v2020_v16  ;;  %v2413_v45 = vadd.f32 %v2285_v7, %v2021_v30  ;;  %v8399_v9 = vld [vmem:[#allocation4_spill] sm:$0xff]  ;;  %8400 = vst [vmem:[#allocation96_spill] sm:$0xff] %v5357_v38  ;;  %v8401_v23 = vld [vmem:[#allocation59_spill] sm:$0xff]  ;;  %v8403_v16 = vld [vmem:[#allocation61_spill] sm:$0xff] }
 0x110   : > { %8392 = vst [vmem:[#allocation71_spill] sm:$0xff] %v5334_v26  ;;  %3901 = vset.pattern.permute.xlu1 %v8273_v57  ;;  %v5348_v54 = vmul.f32 %v4309_v44, %v5281_v15  ;;  %v5351_v47 = vadd.f32 %v784_v24, %v8395_v52  ;;  %v5354_v8 = vadd.f32 %v785_v19, %v8397_v40  ;;  %v8402_v7 = vld [vmem:[#allocation60_spill] sm:$0xff]  ;;  %v8411_v52 = vld [vmem:[#allocation65_spill] sm:$0xff] }
 0x111   : > { %8393 = vst [vmem:[#allocation72_spill] sm:$0xff] %v5339_v49  ;;  %1408 = vperm.xlu1 %3901, %v8399_v9   ;;  %v2414_v41 = vadd.f32 %v2286_v0, %v2022_v32  ;;  %v2415_v53 = vadd.f32 %v2287_v51, %v2023_v11  ;;  %v5360_v49 = vadd.f32 %v8401_v23, %v2408_v56  ;;  %v8405_v51 = vld [vmem:[#allocation62_spill] sm:$0xff] }
 0x112   : > { %8394 = vst [vmem:[#allocation73_spill] sm:$0xff] %v5348_v54  ;;  %8396 = vst [vmem:[#allocation75_spill] sm:$0xff] %v5351_v47  ;;  %v5363_v1 = vadd.f32 %v8402_v7, %v2409_v29  ;;  %v5366_v30 = vadd.f32 %v8403_v16, %v2410_v28  ;;  %v800_v24 = vmul.f32 %v4300_v33, %v5322_v4  ;;  %v5383_v29 = vpop.permute.xlu1 %1885  ;;  %v8409_v28 = vld [vmem:[#allocation64_spill] sm:$0xff]  ;;  %v8413_v7 = vmov 5  }
 0x113   : > { %8398 = vst [vmem:[#allocation95_spill] sm:$0xff] %v5354_v8  ;;  %v801_v19 = vmul.f32 %v4303_v42, %v5322_v4  ;;  %v5374_v0 = vmul.f32 %v4306_v43, %v5322_v4  ;;  %v5377_v32 = vadd.f32 %v8405_v51, %v2411_v18  ;;  %v5381_v56 = vmul.f32 %v4309_v44, %v5322_v4  ;;  %v5402_v51 = vpop.permute.xlu0 %645  ;;  %v8441_v4 = vld [vmem:[#allocation44_spill] sm:$0xff] }
 0x114   : > { %8408 = vst [vmem:[#allocation61_spill] sm:$0xff] %v5383_v29  ;;  %v5386_v11 = vadd.f32 %v8409_v28, %v2412_v6  ;;  %v5389_v40 = vadd.f32 %v8411_v52, %v2413_v45  ;;  %v2288_v9 = vmul.f32 %v4483_v48, %v5283_v59  ;;  %v816_v23 = vmul.f32 %v4300_v33, %v5357_v38  ;;  %v3933_v45 = vld [vmem:[%s7820_s2 + $0x40] sm:$0xff]  ;;  %v8417_v29 = vld [vmem:[#allocation67_spill] sm:$0xff] }
 0x115   : > { %8404 = vst [vmem:[#allocation4_spill] sm:$0xff] %v5374_v0  ;;  %8406 = vst [vmem:[#allocation59_spill] sm:$0xff] %v5377_v32  ;;  %v817_v18 = vmul.f32 %v4303_v42, %v5357_v38  ;;  %3902 = vset.pattern.permute.xlu1 %v8413_v7  ;;  %v2289_v16 = vmul.f32 %v4495_v5, %v5283_v59  ;;  %v2290_v6 = vmul.f32 %v4498_v46, %v5283_v59  ;;  %v8415_v28 = vld [vmem:[#allocation66_spill] sm:$0xff]  ;;  %v8419_v0 = vld [vmem:[#allocation113_spill] sm:$0xff] }
 0x116   : > { %8407 = vst [vmem:[#allocation60_spill] sm:$0xff] %v5381_v56  ;;  %8410 = vst [vmem:[#allocation62_spill] sm:$0xff] %v5386_v11  ;;  %2569 = vperm.xlu1 %3902, %v3933_v45   ;;  %v5408_v52 = vadd.f32 %v8415_v28, %v2414_v41  ;;  %v5411_v8 = vadd.f32 %v8417_v29, %v2415_v53  ;;  %v2291_v47 = vmul.f32 %v4501_v21, %v5283_v59  ;;  %v8421_v7 = vld [vmem:[#allocation114_spill] sm:$0xff] }
 0x117   : > { %8412 = vst [vmem:[#allocation64_spill] sm:$0xff] %v5389_v40  ;;  %8414 = vst [vmem:[#allocation65_spill] sm:$0xff] %v5402_v51  ;;  %v2292_v56 = vmul.f32 %v4507_v36, %v5283_v59  ;;  %v5418_v26 = vadd.f32 %v800_v24, %v8419_v0  ;;  %v5421_v57 = vadd.f32 %v801_v19, %v8421_v7  ;;  %v8425_v0 = vld [vmem:[#allocation104_spill] sm:$0xff] }
 0x118   : > { %8416 = vst [vmem:[#allocation66_spill] sm:$0xff] %v5408_v52  ;;  %8418 = vst [vmem:[#allocation67_spill] sm:$0xff] %v5411_v8  ;;  %v2293_v45 = vmul.f32 %v4510_v61, %v5283_v59  ;;  %v2294_v41 = vmul.f32 %v4513_v60, %v5283_v59  ;;  %v5429_v53 = vmul.f32 %v4306_v43, %v5357_v38  ;;  %v8426_v7 = vld [vmem:[#allocation132_spill] sm:$0xff]  ;;  %v5444_v8 = vpop.permute.xlu1 %2153  ;;  %v8431_v52 = vld [vmem:[#allocation105_spill] sm:$0xff] }
 0x119   : > { %8420 = vst [vmem:[#allocation113_spill] sm:$0xff] %v5418_v26  ;;  %8422 = vst [vmem:[#allocation114_spill] sm:$0xff] %v5421_v57  ;;  %v5433_v29 = vmul.f32 %v4309_v44, %v5357_v38  ;;  %v2295_v24 = vmul.f32 %v4516_v20, %v5283_v59  ;;  %v2416_v19 = vadd.f32 %v2288_v9, %v8425_v0  ;;  %v8428_v57 = vld [vmem:[#allocation133_spill] sm:$0xff]  ;;  %v5452_v38 = vpop.permute.xlu0 %653  ;;  %v8434_v9 = vld [vmem:[#allocation108_spill] sm:$0xff] }
 0x11a   : > { %8423 = vst [vmem:[#allocation219_spill] sm:$0xff] %v5429_v53  ;;  %v5439_v28 = vadd.f32 %v816_v23, %v8426_v7  ;;  %v5442_v26 = vadd.f32 %v817_v18, %v8428_v57  ;;  %8430 = vst [vmem:[#allocation133_spill] sm:$0xff] %v5444_v8  ;;  %v2417_v40 = vadd.f32 %v2289_v16, %v8431_v52  ;;  %v8432_v53 = vld [vmem:[#allocation106_spill] sm:$0xff]  ;;  %2573 = vperm.xlu1 %3902, %v5306_v22   ;;  %v8435_v57 = vld [vmem:[#allocation109_spill] sm:$0xff] }
 0x11b   : > { %8424 = vst [vmem:[#allocation220_spill] sm:$0xff] %v5433_v29  ;;  %v2418_v11 = vadd.f32 %v2290_v6, %v8432_v53  ;;  %v832_v29 = vmul.f32 %v4300_v33, %v5402_v51  ;;  %v833_v59 = vmul.f32 %v4303_v42, %v5402_v51  ;;  %8433 = vst [vmem:[#allocation105_spill] sm:$0xff] %v5452_v38  ;;  %v8436_v0 = vld [vmem:[#allocation110_spill] sm:$0xff]  ;;  %v8439_v53 = vld [vmem:[#allocation43_spill] sm:$0xff] }
 0x11c   : > { %8427 = vst [vmem:[#allocation104_spill] sm:$0xff] %v5439_v28  ;;  %8429 = vst [vmem:[#allocation132_spill] sm:$0xff] %v5442_v26  ;;  %v2419_v23 = vadd.f32 %v2291_v47, %v8434_v9  ;;  %v2420_v18 = vadd.f32 %v2292_v56, %v8435_v57  ;;  %v2421_v7 = vadd.f32 %v2293_v45, %v8436_v0  ;;  %v8437_v26 = vld [vmem:[#allocation111_spill] sm:$0xff]  ;;  %v8438_v6 = vld [vmem:[#allocation42_spill] sm:$0xff] }
 0x11d   : > { %v2422_v16 = vadd.f32 %v2294_v41, %v8437_v26  ;;  %v2680_v52 = vmul.f32 %v8438_v6, %v5336_v62  ;;  %v2681_v28 = vmul.f32 %v8439_v53, %v5336_v62  ;;  %v8440_v8 = vld [vmem:[#allocation116_spill] sm:$0xff]  ;;  %v2682_v54 = vmul.f32 %v8441_v4, %v5336_v62  ;;  %v8442_v22 = vld [vmem:[#allocation45_spill] sm:$0xff]  ;;  %v2158_v41 = vpop.permute.xlu1 %2157 }
 0x11e   : > { %v2423_v32 = vadd.f32 %v2295_v24, %v8440_v8  ;;  %v2683_v47 = vmul.f32 %v8442_v22, %v5336_v62  ;;  %v8443_v56 = vld [vmem:[#allocation48_spill] sm:$0xff]  ;;  %v5472_v26 = vmul.f32 %v4306_v43, %v5402_v51  ;;  %v5476_v45 = vmul.f32 %v4309_v44, %v5402_v51  ;;  %v8446_v24 = vld [vmem:[#allocation49_spill] sm:$0xff]  ;;  %v5491_v51 = vpop.permute.xlu0 %2937 }
 0x11f   : > { %v2684_v9 = vmul.f32 %v8443_v56, %v5336_v62  ;;  %v848_v8 = vmul.f32 %v4300_v33, %v5452_v38  ;;  %v2685_v57 = vmul.f32 %v8446_v24, %v5336_v62  ;;  %v8447_v0 = vld [vmem:[#allocation136_spill] sm:$0xff]  ;;  %v8449_v4 = vld [vmem:[#allocation137_spill] sm:$0xff]  ;;  %v8451_v53 = vmov 1   ;;  %8452 = vst [vmem:[#allocation111_spill] sm:$0xff] %v5491_v51  ;;  %v8455_v24 = vld [vmem:[#allocation94_spill] sm:$0xff] }
 0x120   : > { %8444 = vst [vmem:[#allocation106_spill] sm:$0xff] %v5472_v26  ;;  %8445 = vst [vmem:[#allocation108_spill] sm:$0xff] %v5476_v45  ;;  %v5483_v22 = vadd.f32 %v832_v29, %v8447_v0  ;;  %v5486_v56 = vadd.f32 %v833_v59, %v8449_v4  ;;  %v849_v26 = vmul.f32 %v4303_v42, %v5452_v38  ;;  %3903 = vset.pattern.permute.xlu1 %v8451_v53  ;;  %v8453_v45 = vld [vmem:[#allocation50_spill] sm:$0xff] }
 0x121   : > { %v2686_v33 = vmul.f32 %v8453_v45, %v5336_v62  ;;  %v5497_v6 = vmul.f32 %v4306_v43, %v5452_v38  ;;  %2957 = vperm.xlu1 %3903, %v8455_v24   ;;  %v8456_v29 = vld [vmem:[#allocation54_spill] sm:$0xff]  ;;  %v5502_v59 = vadd.f32 %v2680_v52, %v2416_v19  ;;  %v5504_v0 = vadd.f32 %v2681_v28, %v2417_v40  ;;  %v8460_v19 = vld [vmem:[#allocation139_spill] sm:$0xff]  ;;  %v5526_v52 = vpop.permute.xlu1 %1383 }
 0x122   : > { %8448 = vst [vmem:[#allocation109_spill] sm:$0xff] %v5483_v22  ;;  %8450 = vst [vmem:[#allocation110_spill] sm:$0xff] %v5486_v56  ;;  %v2687_v4 = vmul.f32 %v8456_v29, %v5336_v62  ;;  %v5508_v42 = vmul.f32 %v4309_v44, %v5452_v38  ;;  %v5510_v56 = vadd.f32 %v2682_v54, %v2418_v11  ;;  %v5528_v54 = vpop.permute.xlu0 %2945  ;;  %v8470_v44 = vld [vmem:[#allocation123_spill] sm:$0xff] }
 0x123   : > { %8454 = vst [vmem:[#allocation116_spill] sm:$0xff] %v5497_v6  ;;  %v5512_v22 = vadd.f32 %v2683_v47, %v2419_v23  ;;  %v5514_v51 = vadd.f32 %v2684_v9, %v2420_v18  ;;  %v8458_v6 = vld [vmem:[#allocation138_spill] sm:$0xff]  ;;  %v5519_v24 = vadd.f32 %v2685_v57, %v2421_v7  ;;  %v2304_v62 = vmul.f32 %v4483_v48, %v2158_v41 }
 0x124   : > { %8457 = vst [vmem:[#allocation136_spill] sm:$0xff] %v5508_v42  ;;  %v5517_v43 = vadd.f32 %v848_v8, %v8458_v6  ;;  %v2305_v40 = vmul.f32 %v4495_v5, %v2158_v41  ;;  %v5524_v28 = vadd.f32 %v849_v26, %v8460_v19  ;;  %8462 = vst [vmem:[#allocation138_spill] sm:$0xff] %v5526_v52  ;;  %v8464_v6 = vmov 3   ;;  %v5543_v8 = vld [vmem:[%s7820_s2 + $0x50] sm:$0xff] }
 0x125   : > { %8463 = vst [vmem:[#allocation139_spill] sm:$0xff] %v5528_v54  ;;  %v5530_v11 = vadd.f32 %v2686_v33, %v2422_v16  ;;  %v2306_v23 = vmul.f32 %v4498_v46, %v2158_v41  ;;  %v2307_v18 = vmul.f32 %v4501_v21, %v2158_v41  ;;  %3904 = vset.pattern.permute.xlu1 %v8464_v6  ;;  %v8465_v16 = vld [vmem:[#allocation76_spill] sm:$0xff]  ;;  %v8466_v33 = vld [vmem:[#allocation77_spill] sm:$0xff] }
 0x126   : > { %8459 = vst [vmem:[#allocation137_spill] sm:$0xff] %v5517_v43  ;;  %8461 = vst [vmem:[#allocation94_spill] sm:$0xff] %v5524_v28  ;;  %v5535_v7 = vadd.f32 %v2687_v4, %v2423_v32  ;;  %v2308_v47 = vmul.f32 %v4507_v36, %v2158_v41  ;;  %v2309_v9 = vmul.f32 %v4510_v61, %v2158_v41  ;;  %1917 = vperm.xlu1 %3904, %v5543_v8   ;;  %v8467_v4 = vld [vmem:[#allocation78_spill] sm:$0xff]  ;;  %v8468_v43 = vld [vmem:[#allocation79_spill] sm:$0xff] }
 0x127   : > { %v2310_v26 = vmul.f32 %v4513_v60, %v2158_v41  ;;  %v884_v57 = vadd.f32 %v5279_v25, %v8465_v16  ;;  %v885_v32 = vadd.f32 %v5289_v27, %v8466_v33  ;;  %v886_v19 = vadd.f32 %v5296_v37, %v8467_v4  ;;  %v8471_v52 = vld [vmem:[#allocation124_spill] sm:$0xff]  ;;  %v5561_v25 = vpop.permute.xlu0 %2953  ;;  %v8487_v4 = vld [vmem:[#allocation130_spill] sm:$0xff]  ;;  %v8510_v36 = vld [vmem:[#allocation97_spill] sm:$0xff] }
 0x128   : > { %v2311_v28 = vmul.f32 %v4516_v20, %v2158_v41  ;;  %v887_v42 = vadd.f32 %v5299_v58, %v8468_v43  ;;  %v5557_v38 = vadd.f32 %v5192_v31, %v5272_v34  ;;  %v2432_v54 = vadd.f32 %v2304_v62, %v8470_v44  ;;  %8472 = vst [vmem:[#allocation77_spill] sm:$0xff] %v5561_v25  ;;  %v8475_v41 = vld [vmem:[#allocation125_spill] sm:$0xff]  ;;  %v8476_v58 = vld [vmem:[#allocation126_spill] sm:$0xff]  ;;  %v5573_v34 = vpop.permute.xlu1 %2545  ;;  %v8479_v31 = vld [vmem:[#allocation127_spill] sm:$0xff] }
 0x129   : > { %v2433_v60 = vadd.f32 %v2305_v40, %v8471_v52  ;;  %v5565_v27 = vadd.f32 %v5195_v10, %v5275_v2  ;;  %v5569_v37 = vadd.f32 %v5198_v35, %v5312_v3  ;;  %v2434_v43 = vadd.f32 %v2306_v23, %v8475_v41  ;;  %8477 = vst [vmem:[#allocation123_spill] sm:$0xff] %v5573_v34  ;;  %v8480_v40 = vld [vmem:[#allocation128_spill] sm:$0xff]  ;;  %v8481_v10 = vld [vmem:[#allocation129_spill] sm:$0xff] }
 0x12a   : > { %8469 = vst [vmem:[#allocation76_spill] sm:$0xff] %v5557_v38  ;;  %v2435_v16 = vadd.f32 %v2307_v18, %v8476_v58  ;;  %v5577_v44 = vadd.f32 %v5205_v50, %v5320_v13  ;;  %v2436_v62 = vadd.f32 %v2308_v47, %v8479_v31  ;;  %v2437_v52 = vadd.f32 %v2309_v9, %v8480_v40  ;;  %v8483_v35 = vld [vmem:[#allocation204_spill] sm:$0xff]  ;;  %v8485_v18 = vld [vmem:[#allocation205_spill] sm:$0xff] }
 0x12b   : > { %8473 = vst [vmem:[#allocation78_spill] sm:$0xff] %v5565_v27  ;;  %8474 = vst [vmem:[#allocation79_spill] sm:$0xff] %v5569_v37  ;;  %v2438_v2 = vadd.f32 %v2310_v26, %v8481_v10  ;;  %3905 = vset.pattern.permute.xlu1 %v8370_v55  ;;  %v5584_v3 = vadd.f32 %v5208_v14, %v884_v57  ;;  %v5587_v23 = vadd.f32 %v8483_v35, %v885_v32  ;;  %v8488_v50 = vld [vmem:[#allocation209_spill] sm:$0xff]  ;;  %v8490_v9 = vld [vmem:[#allocation80_spill] sm:$0xff]  ;;  %v5605_v32 = vpop.permute.xlu0 %2961 }
 0x12c   : > { %8478 = vst [vmem:[#allocation124_spill] sm:$0xff] %v5577_v44  ;;  %v5590_v33 = vadd.f32 %v8485_v18, %v886_v19  ;;  %v2439_v13 = vadd.f32 %v2311_v28, %v8487_v4  ;;  %2185 = vperm.xlu1 %3905, %v5543_v8   ;;  %v5595_v47 = vadd.f32 %v8488_v50, %v887_v42  ;;  %v8491_v41 = vld [vmem:[#allocation81_spill] sm:$0xff]  ;;  %8493 = vst [vmem:[#allocation129_spill] sm:$0xff] %v5605_v32  ;;  %v8494_v19 = vld [vmem:[#allocation82_spill] sm:$0xff] }
 0x12d   : > { %8482 = vst [vmem:[#allocation125_spill] sm:$0xff] %v5584_v3  ;;  %8484 = vst [vmem:[#allocation126_spill] sm:$0xff] %v5587_v23  ;;  %v5598_v26 = vadd.f32 %v8490_v9, %v2432_v54  ;;  %v5601_v58 = vadd.f32 %v8491_v41, %v2433_v60  ;;  %v8492_v14 = vld [vmem:[#allocation17_spill] sm:$0xff]  ;;  %v5608_v31 = vadd.f32 %v8494_v19, %v2434_v43  ;;  %v8495_v28 = vld [vmem:[#allocation83_spill] sm:$0xff] }
 0x12e   : > { %8486 = vst [vmem:[#allocation127_spill] sm:$0xff] %v5590_v33  ;;  %8489 = vst [vmem:[#allocation128_spill] sm:$0xff] %v5595_v47  ;;  %v772_v57 = vmul.f32 %v8492_v14, %v5249_v63  ;;  %v5611_v40 = vadd.f32 %v8495_v28, %v2435_v16  ;;  %v8496_v42 = vld [vmem:[#allocation18_spill] sm:$0xff]  ;;  %v8497_v54 = vld [vmem:[#allocation19_spill] sm:$0xff]  ;;  %v2930_v16 = vpop.permute.xlu1 %2929 }
 0x12f   : > { %v773_v10 = vmul.f32 %v8496_v42, %v5249_v63  ;;  %v774_v35 = vmul.f32 %v8497_v54, %v5249_v63  ;;  %v8498_v18 = vld [vmem:[#allocation84_spill] sm:$0xff]  ;;  %v8499_v4 = vld [vmem:[#allocation85_spill] sm:$0xff]  ;;  %v8500_v9 = vld [vmem:[#allocation87_spill] sm:$0xff] }
 0x130   : > { %v5618_v60 = vadd.f32 %v8498_v18, %v2436_v62  ;;  %v5621_v50 = vadd.f32 %v8499_v4, %v2437_v52  ;;  %v5624_v41 = vadd.f32 %v8500_v9, %v2438_v2  ;;  %v8502_v43 = vld [vmem:[#allocation20_spill] sm:$0xff]  ;;  %v8505_v25 = vld [vmem:[#allocation89_spill] sm:$0xff]  ;;  %v788_v62 = vmul.f32 %v8492_v14, %v5281_v15  ;;  %v8506_v18 = vld [vmem:[#allocation90_spill] sm:$0xff]  ;;  %v5654_v9 = vpop.permute.xlu0 %2969 }
 0x131   : > { %v775_v19 = vmul.f32 %v8502_v43, %v5249_v63  ;;  %v8503_v28 = vld [vmem:[#allocation88_spill] sm:$0xff]  ;;  %v5633_v34 = vadd.f32 %v5327_v17, %v8505_v25  ;;  %v789_v52 = vmul.f32 %v8496_v42, %v5281_v15  ;;  %v5642_v2 = vld [vmem:[%s7820_s2 + $0x58] sm:$0xff]  ;;  %v2992_v63 = vadd.f32 %v2930_v16, %v5360_v49  ;;  %v8507_v25 = vld [vmem:[#allocation91_spill] sm:$0xff]  ;;  %8508 = vst [vmem:[#allocation130_spill] sm:$0xff] %v5654_v9 }
 0x132   : > { %8501 = vst [vmem:[#allocation204_spill] sm:$0xff] %v5624_v41  ;;  %v5629_v32 = vadd.f32 %v8503_v28, %v2439_v13  ;;  %2189 = vperm.xlu1 %3905, %v5642_v2   ;;  %v2993_v13 = vadd.f32 %v2930_v16, %v5363_v1  ;;  %v5649_v17 = vadd.f32 %v5331_v12, %v8506_v18  ;;  %v8509_v20 = vld [vmem:[#allocation92_spill] sm:$0xff]  ;;  %v8511_v12 = vld [vmem:[#allocation98_spill] sm:$0xff]  ;;  %v8512_v9 = vld [vmem:[#allocation99_spill] sm:$0xff] }
 0x133   : > { %v5652_v4 = vadd.f32 %v772_v57, %v8507_v25  ;;  %v2994_v28 = vadd.f32 %v2930_v16, %v5366_v30  ;;  %v5658_v61 = vadd.f32 %v773_v10, %v8509_v20  ;;  %v5661_v21 = vadd.f32 %v774_v35, %v8510_v36  ;;  %v2934_v25 = vpop.permute.xlu1 %2933  ;;  %v8514_v20 = vld [vmem:[#allocation100_spill] sm:$0xff]  ;;  %v8515_v10 = vld [vmem:[#allocation73_spill] sm:$0xff]  ;;  %v8559_v27 = vld [vmem:[#allocation210_spill] sm:$0xff] }
 0x134   : > { %8504 = vst [vmem:[#allocation205_spill] sm:$0xff] %v5629_v32  ;;  %v790_v49 = vmul.f32 %v8497_v54, %v5281_v15  ;;  %v3120_v1 = vmax.f32 %v2992_v63, 0.0  ;;  %v3121_v46 = vmax.f32 %v2993_v13, 0.0  ;;  %v5666_v18 = vadd.f32 %v775_v19, %v8511_v12  ;;  %v8517_v35 = vld [vmem:[#allocation101_spill] sm:$0xff]  ;;  %v8519_v63 = vld [vmem:[#allocation102_spill] sm:$0xff] }
 0x135   : > { %v791_v57 = vmul.f32 %v8502_v43, %v5281_v15  ;;  %v5672_v30 = vadd.f32 %v5343_v39, %v8512_v9  ;;  %v5676_v36 = vadd.f32 %v8515_v10, %v8514_v20  ;;  %v5679_v5 = vadd.f32 %v788_v62, %v8517_v35  ;;  %v8522_v32 = vld [vmem:[#allocation2_spill] sm:$0xff]  ;;  %v5692_v9 = vpop.permute.xlu0 %2977  ;;  %v8525_v62 = vld [vmem:[#allocation59_spill] sm:$0xff]  ;;  %v8549_v47 = vld [vmem:[#allocation33_spill] sm:$0xff] }
 0x136   : > { %v5682_v13 = vadd.f32 %v789_v52, %v8519_v63  ;;  %v8521_v19 = vmov 2   ;;  %v3248_v12 = vadd.f32 %v3121_v46, %v3120_v1  ;;  %v3000_v15 = vadd.f32 %v2934_v25, %v5502_v59  ;;  %8524 = vst [vmem:[#allocation84_spill] sm:$0xff] %v5692_v9  ;;  %v8526_v52 = vld [vmem:[#allocation107_spill] sm:$0xff]  ;;  %v8529_v59 = vld [vmem:[#allocation62_spill] sm:$0xff]  ;;  %v8530_v1 = vld [vmem:[#allocation64_spill] sm:$0xff] }
 0x137   : > { %8513 = vst [vmem:[#allocation209_spill] sm:$0xff] %v5672_v30  ;;  %8516 = vst [vmem:[#allocation80_spill] sm:$0xff] %v5676_v36  ;;  %3906 = vset.pattern.permute.xlu1 %v8521_v19  ;;  %v3001_v48 = vadd.f32 %v2934_v25, %v5504_v0  ;;  %v5689_v39 = vmul.f32 %v8492_v14, %v8522_v32  ;;  %v2995_v20 = vadd.f32 %v2930_v16, %v8525_v62  ;;  %v8532_v9 = vld [vmem:[#allocation67_spill] sm:$0xff]  ;;  %v8550_v23 = vld [vmem:[#allocation13_spill] sm:$0xff] }
 0x138   : > { %8518 = vst [vmem:[#allocation81_spill] sm:$0xff] %v5679_v5  ;;  %8520 = vst [vmem:[#allocation82_spill] sm:$0xff] %v5682_v13  ;;  %1029 = vperm.xlu1 %3906, %v5642_v2   ;;  %v3122_v10 = vmax.f32 %v2994_v28, 0.0  ;;  %v5696_v35 = vadd.f32 %v790_v49, %v8526_v52  ;;  %v5700_v46 = vmul.f32 %v8496_v42, %v8522_v32  ;;  %v3128_v14 = vmax.f32 %v3000_v15, 0.0  ;;  %v8531_v13 = vld [vmem:[#allocation66_spill] sm:$0xff]  ;;  %v5713_v52 = vpop.permute.xlu1 %1897 }
 0x139   : > { %8523 = vst [vmem:[#allocation83_spill] sm:$0xff] %v5689_v39  ;;  %v2996_v0 = vadd.f32 %v2930_v16, %v8529_v59  ;;  %v5704_v63 = vadd.f32 %v2930_v16, %v8530_v1  ;;  %v3129_v39 = vmax.f32 %v3001_v48, 0.0  ;;  %v5707_v5 = vadd.f32 %v2930_v16, %v8531_v13 }
 0x13a   : > { %8527 = vst [vmem:[#allocation85_spill] sm:$0xff] %v5696_v35  ;;  %8528 = vst [vmem:[#allocation87_spill] sm:$0xff] %v5700_v46  ;;  %v5710_v62 = vadd.f32 %v2930_v16, %v8532_v9  ;;  %v3249_v28 = vadd.f32 %v3248_v12, %v3122_v10  ;;  %v3002_v49 = vadd.f32 %v2934_v25, %v5510_v56  ;;  %v8533_v13 = vmov 0   ;;  %v8534_v12 = vld [vmem:[#allocation117_spill] sm:$0xff] }
 0x13b   : > { %v3003_v42 = vadd.f32 %v2934_v25, %v5512_v22  ;;  %v3004_v59 = vadd.f32 %v2934_v25, %v5514_v51  ;;  %v5718_v1 = vadd.f32 %v2934_v25, %v5519_v24  ;;  %v5721_v48 = vadd.f32 %v2934_v25, %v5530_v11  ;;  %v311_v51 = vpop.permute.xlu0 %310  ;;  %v3936_v24 = vld [vmem:[%s7821_s3 + $0x40] sm:$0xff] }
 0x13c   : > { %3907 = vset.pattern.permute.xlu1 %v8533_v13  ;;  %v3123_v15 = vmax.f32 %v2995_v20, 0.0  ;;  %v5725_v16 = vadd.f32 %v2934_v25, %v5535_v7  ;;  %v5728_v56 = vadd.f32 %v791_v57, %v8534_v12  ;;  %v5732_v22 = vmul.f32 %v8497_v54, %v8522_v32  ;;  %v8546_v25 = vld [vmem:[#allocation32_spill] sm:$0xff] }
 0x13d   : > { %1418 = vperm.xlu1 %3907, %v3936_v24   ;;  %v3124_v11 = vmax.f32 %v2996_v0, 0.0  ;;  %v3125_v9 = vmax.f32 %v5704_v63, 0.0  ;;  %v3257_v20 = vadd.f32 %v3129_v39, %v3128_v14  ;;  %v5740_v7 = vmul.f32 %v8502_v43, %v8522_v32  ;;  %v8538_v0 = vld [vmem:[#allocation6_spill] sm:$0xff]  ;;  %v8539_v63 = vld [vmem:[#allocation7_spill] sm:$0xff]  ;;  %v8540_v39 = vld [vmem:[#allocation8_spill] sm:$0xff]  ;;  %v5749_v32 = vpop.permute.xlu1 %2161 }
 0x13e   : > { %8535 = vst [vmem:[#allocation88_spill] sm:$0xff] %v5728_v56  ;;  %8536 = vst [vmem:[#allocation89_spill] sm:$0xff] %v5732_v22  ;;  %v3126_v57 = vmax.f32 %v5707_v5, 0.0  ;;  %v3250_v10 = vadd.f32 %v3249_v28, %v3123_v15  ;;  %v3130_v12 = vmax.f32 %v3002_v49, 0.0  ;;  %v3131_v54 = vmax.f32 %v3003_v42, 0.0  ;;  %v8544_v42 = vld [vmem:[#allocation9_spill] sm:$0xff] }
 0x13f   : > { %8537 = vst [vmem:[#allocation90_spill] sm:$0xff] %v5740_v7  ;;  %v3132_v22 = vmax.f32 %v3004_v59, 0.0  ;;  %v3133_v46 = vmax.f32 %v5718_v1, 0.0  ;;  %v464_v56 = vmul.f32 %v8538_v0, %v311_v51  ;;  %v465_v14 = vmul.f32 %v8539_v63, %v311_v51  ;;  %8541 = vst [vmem:[#allocation91_spill] sm:$0xff] %v5749_v32  ;;  %v5752_v43 = vpop.permute.xlu0 %315  ;;  %v8545_v59 = vld [vmem:[#allocation10_spill] sm:$0xff]  ;;  %v8547_v7 = vld [vmem:[#allocation11_spill] sm:$0xff] }
 0x140   : > { %v466_v35 = vmul.f32 %v8540_v39, %v311_v51  ;;  %8542 = vst [vmem:[#allocation92_spill] sm:$0xff] %v5752_v43  ;;  %v8543_v28 = vmov 5   ;;  %v467_v49 = vmul.f32 %v8544_v42, %v311_v51  ;;  %v468_v1 = vmul.f32 %v8545_v59, %v311_v51  ;;  %v8548_v32 = vld [vmem:[#allocation12_spill] sm:$0xff]  ;;  %v8551_v59 = vld [vmem:[#allocation34_spill] sm:$0xff] }
 0x141   : > { %3908 = vset.pattern.permute.xlu1 %v8543_v28  ;;  %v3258_v15 = vadd.f32 %v3257_v20, %v3130_v12  ;;  %v5759_v24 = vmul.f32 %v8546_v25, %v5713_v52  ;;  %v469_v36 = vmul.f32 %v8547_v7, %v311_v51  ;;  %v470_v30 = vmul.f32 %v8548_v32, %v311_v51  ;;  %v8552_v12 = vld [vmem:[#allocation35_spill] sm:$0xff]  ;;  %v8554_v32 = vld [vmem:[#allocation206_spill] sm:$0xff] }
 0x142   : > { %2577 = vperm.xlu1 %3908, %v5543_v8   ;;  %v3251_v5 = vadd.f32 %v3250_v10, %v3124_v11  ;;  %v5766_v33 = vmul.f32 %v8549_v47, %v5713_v52  ;;  %v471_v28 = vmul.f32 %v8550_v23, %v311_v51  ;;  %v5771_v20 = vmul.f32 %v8551_v59, %v5713_v52  ;;  %v8553_v8 = vld [vmem:[#allocation37_spill] sm:$0xff]  ;;  %v8555_v10 = vld [vmem:[#allocation207_spill] sm:$0xff]  ;;  %v8556_v47 = vld [vmem:[#allocation208_spill] sm:$0xff] }
 0x143   : > { %v5775_v25 = vmul.f32 %v8552_v12, %v5713_v52  ;;  %v5779_v7 = vmul.f32 %v8553_v8, %v5713_v52  ;;  %v856_v11 = vadd.f32 %v8554_v32, %v464_v56  ;;  %v857_v3 = vadd.f32 %v8555_v10, %v465_v14  ;;  %v8557_v51 = vld [vmem:[#allocation38_spill] sm:$0xff]  ;;  %v5790_v37 = vpop.permute.xlu0 %330  ;;  %v1006_v12 = vpop.permute.xlu1 %1005  ;;  %v8560_v8 = vld [vmem:[#allocation211_spill] sm:$0xff]  ;;  %v8562_v14 = vld [vmem:[#allocation213_spill] sm:$0xff] }
 0x144   : > { %v858_v44 = vadd.f32 %v8556_v47, %v466_v35  ;;  %v5786_v23 = vmul.f32 %v8557_v51, %v5713_v52  ;;  %v472_v59 = vmul.f32 %v8538_v0, %v5752_v43  ;;  %8558 = vst [vmem:[#allocation97_spill] sm:$0xff] %v5790_v37  ;;  %v859_v38 = vadd.f32 %v8559_v27, %v467_v49  ;;  %v8561_v47 = vld [vmem:[#allocation212_spill] sm:$0xff]  ;;  %v8565_v49 = vld [vmem:[#allocation214_spill] sm:$0xff] }
 0x145   : > { %v860_v13 = vadd.f32 %v8560_v8, %v468_v1  ;;  %v3259_v41 = vadd.f32 %v3258_v15, %v3131_v54  ;;  %v473_v56 = vmul.f32 %v8539_v63, %v5752_v43  ;;  %v861_v35 = vadd.f32 %v8561_v47, %v469_v36  ;;  %v8567_v36 = vld [vmem:[#allocation183_spill] sm:$0xff]  ;;  %v8569_v47 = vld [vmem:[#allocation141_spill] sm:$0xff] }
 0x146   : > { %2581 = vperm.xlu1 %3908, %v5642_v2   ;;  %v862_v32 = vadd.f32 %v8562_v14, %v470_v30  ;;  %v3252_v10 = vadd.f32 %v3251_v5, %v3125_v9  ;;  %v5801_v51 = vmul.f32 %v8540_v39, %v5752_v43  ;;  %v5805_v27 = vmul.f32 %v8544_v42, %v5752_v43  ;;  %v8566_v2 = vld [vmem:[#allocation182_spill] sm:$0xff] }
 0x147   : > { %v863_v54 = vadd.f32 %v8565_v49, %v471_v28  ;;  %v3260_v1 = vadd.f32 %v3259_v41, %v3132_v22  ;;  %v496_v15 = vmul.f32 %v8538_v0, %v5790_v37  ;;  %v5811_v8 = vadd.f32 %v8566_v2, %v856_v11  ;;  %v8568_v9 = vld [vmem:[#allocation186_spill] sm:$0xff]  ;;  %v5824_v28 = vpop.permute.xlu0 %340  ;;  %v8572_v41 = vld [vmem:[#allocation187_spill] sm:$0xff] }
 0x148   : > { %8563 = vst [vmem:[#allocation98_spill] sm:$0xff] %v5801_v51  ;;  %8564 = vst [vmem:[#allocation99_spill] sm:$0xff] %v5805_v27  ;;  %v5814_v30 = vadd.f32 %v8567_v36, %v857_v3  ;;  %v5817_v5 = vadd.f32 %v8568_v9, %v858_v44  ;;  %v5820_v14 = vadd.f32 %v8569_v47, %v472_v59  ;;  %v8573_v11 = vld [vmem:[#allocation142_spill] sm:$0xff]  ;;  %v5833_v3 = vpop.permute.xlu1 %1388  ;;  %v8576_v44 = vld [vmem:[#allocation189_spill] sm:$0xff] }
 0x149   : > { %v497_v27 = vmul.f32 %v8539_v63, %v5790_v37  ;;  %8571 = vst [vmem:[#allocation73_spill] sm:$0xff] %v5824_v28  ;;  %v5827_v22 = vadd.f32 %v8572_v41, %v859_v38  ;;  %v3261_v49 = vadd.f32 %v3260_v1, %v3133_v46  ;;  %v5830_v2 = vadd.f32 %v8573_v11, %v473_v56  ;;  %v8577_v59 = vld [vmem:[#allocation190_spill] sm:$0xff]  ;;  %v8580_v46 = vld [vmem:[#allocation115_spill] sm:$0xff]  ;;  %v8582_v41 = vld [vmem:[#allocation192_spill] sm:$0xff] }
 0x14a   : > { %8570 = vst [vmem:[#allocation100_spill] sm:$0xff] %v5820_v14  ;;  %3909 = vset.pattern.permute.xlu1 %v8451_v53  ;;  %8575 = vst [vmem:[#allocation102_spill] sm:$0xff] %v5833_v3  ;;  %v5836_v36 = vadd.f32 %v8576_v44, %v860_v13  ;;  %v5839_v9 = vadd.f32 %v8577_v59, %v861_v35  ;;  %v3253_v47 = vadd.f32 %v3252_v10, %v3126_v57  ;;  %v8581_v56 = vld [vmem:[#allocation191_spill] sm:$0xff]  ;;  %v8583_v11 = vld [vmem:[#allocation68_spill] sm:$0xff] }
 0x14b   : > { %8574 = vst [vmem:[#allocation101_spill] sm:$0xff] %v5830_v2  ;;  %v5843_v14 = vmul.f32 %v8540_v39, %v5790_v37  ;;  %v5847_v38 = vmul.f32 %v8544_v42, %v5790_v37  ;;  %2965 = vperm.xlu1 %3909, %v8580_v46   ;;  %v5851_v1 = vadd.f32 %v8581_v56, %v862_v32  ;;  %v8585_v10 = vld [vmem:[#allocation23_spill] sm:$0xff]  ;;  %v8586_v59 = vld [vmem:[#allocation24_spill] sm:$0xff]  ;;  %v8587_v37 = vld [vmem:[#allocation69_spill] sm:$0xff]  ;;  %v5868_v46 = vpop.permute.xlu0 %350 }
 0x14c   : > { %v5854_v13 = vadd.f32 %v8582_v41, %v863_v54  ;;  %v5857_v35 = vadd.f32 %v8583_v11, %v496_v15  ;;  %v512_v57 = vmul.f32 %v8538_v0, %v5824_v28  ;;  %v1160_v44 = vmul.f32 %v8585_v10, %v1006_v12  ;;  %8589 = vst [vmem:[#allocation64_spill] sm:$0xff] %v5868_v46  ;;  %v8591_v15 = vld [vmem:[#allocation25_spill] sm:$0xff]  ;;  %v8594_v3 = vld [vmem:[#allocation26_spill] sm:$0xff]  ;;  %v8595_v51 = vld [vmem:[#allocation28_spill] sm:$0xff] }
 0x14d   : > { %8578 = vst [vmem:[#allocation2_spill] sm:$0xff] %v5843_v14  ;;  %8579 = vst [vmem:[#allocation59_spill] sm:$0xff] %v5847_v38  ;;  %v1161_v14 = vmul.f32 %v8586_v59, %v1006_v12  ;;  %v5864_v38 = vadd.f32 %v8587_v37, %v497_v27  ;;  %v513_v32 = vmul.f32 %v8539_v63, %v5824_v28  ;;  %v8590_v54 = vmax.f32 %v5721_v48, 0.0  ;;  %v8596_v37 = vld [vmem:[#allocation29_spill] sm:$0xff] }
 0x14e   : > { %8584 = vst [vmem:[#allocation107_spill] sm:$0xff] %v5857_v35  ;;  %v1162_v41 = vmul.f32 %v8591_v15, %v1006_v12  ;;  %v8592_v11 = vmax.f32 %v5710_v62, 0.0  ;;  %v1163_v2 = vmul.f32 %v8594_v3, %v1006_v12  ;;  %v1164_v43 = vmul.f32 %v8595_v51, %v1006_v12  ;;  %v8600_v62 = vld [vmem:[#allocation30_spill] sm:$0xff] }
 0x14f   : > { %8588 = vst [vmem:[#allocation62_spill] sm:$0xff] %v5864_v38  ;;  %v3262_v56 = vadd.f32 %v3261_v49, %v8590_v54  ;;  %v1165_v27 = vmul.f32 %v8596_v37, %v1006_v12  ;;  %v5882_v38 = vmul.f32 %v8540_v39, %v5824_v28  ;;  %v5886_v48 = vmul.f32 %v8544_v42, %v5824_v28  ;;  %v5889_v49 = vpop.permute.xlu1 %2553  ;;  %v8601_v54 = vld [vmem:[#allocation31_spill] sm:$0xff] }
 0x150   : > { %v5875_v35 = vadd.f32 %v3253_v47, %v8592_v11  ;;  %3910 = vset.pattern.permute.xlu1 %v8464_v6  ;;  %8599 = vst [vmem:[#allocation6_spill] sm:$0xff] %v5889_v49  ;;  %v1166_v47 = vmul.f32 %v8600_v62, %v1006_v12  ;;  %v1167_v11 = vmul.f32 %v8601_v54, %v1006_v12  ;;  %v8604_v28 = vld [vmem:[#allocation71_spill] sm:$0xff]  ;;  %v8605_v12 = vld [vmem:[#allocation160_spill] sm:$0xff] }
 0x151   : > { %8597 = vst [vmem:[#allocation67_spill] sm:$0xff] %v5882_v38  ;;  %8598 = vst [vmem:[#allocation117_spill] sm:$0xff] %v5886_v48  ;;  %v528_v37 = vmul.f32 %v8538_v0, %v5868_v46  ;;  %v529_v38 = vmul.f32 %v8539_v63, %v5868_v46  ;;  %v5903_v48 = vld [vmem:[%s7820_s2 + $0x60] sm:$0xff]  ;;  %v5907_v49 = vadd.f32 %v1160_v44, %v8604_v28  ;;  %v8609_v54 = vld [vmem:[#allocation72_spill] sm:$0xff] }
 0x152   : > { %8593 = vst [vmem:[#allocation66_spill] sm:$0xff] %v5875_v35  ;;  %v8602_v35 = vld [vmem:[#allocation159_spill] sm:$0xff]  ;;  %1925 = vperm.xlu1 %3910, %v5903_v48   ;;  %v5910_v6 = vadd.f32 %v8605_v12, %v513_v32  ;;  %v5919_v62 = vadd.f32 %v1161_v14, %v8609_v54  ;;  %v5922_v3 = vadd.f32 %v1162_v41, %v5633_v34  ;;  %v8614_v54 = vld [vmem:[#allocation161_spill] sm:$0xff] }
 0x153   : > { %v5894_v51 = vadd.f32 %v8602_v35, %v512_v57  ;;  %v5912_v35 = vpop.permute.xlu0 %360  ;;  %v8608_v57 = vmax.f32 %v5725_v16, 0.0  ;;  %v5926_v15 = vmul.f32 %v8540_v39, %v5868_v46  ;;  %v5929_v28 = vadd.f32 %v1163_v2, %v5649_v17  ;;  %v2558_v32 = vpop.permute.xlu1 %2557  ;;  %v8613_v17 = vld [vmem:[#allocation40_spill] sm:$0xff] }
 0x154   : > { %8606 = vst [vmem:[#allocation206_spill] sm:$0xff] %v5910_v6  ;;  %8607 = vst [vmem:[#allocation207_spill] sm:$0xff] %v5912_v35  ;;  %v5932_v44 = vadd.f32 %v1164_v43, %v5652_v4  ;;  %v5935_v16 = vadd.f32 %v1165_v27, %v5658_v61  ;;  %v5939_v14 = vmul.f32 %v8544_v42, %v5868_v46  ;;  %v8616_v4 = vld [vmem:[#allocation162_spill] sm:$0xff]  ;;  %v8636_v46 = vld [vmem:[#allocation164_spill] sm:$0xff] }
 0x155   : > { %8603 = vst [vmem:[#allocation7_spill] sm:$0xff] %v5894_v51  ;;  %v5916_v51 = vadd.f32 %v3262_v56, %v8608_v57  ;;  %8610 = vst [vmem:[#allocation208_spill] sm:$0xff] %v5926_v15  ;;  %v5942_v34 = vadd.f32 %v1166_v47, %v5661_v21  ;;  %v8612_v56 = vld [vmem:[#allocation39_spill] sm:$0xff]  ;;  %v2063_v2 = vmul.f32 %v8613_v17, %v5713_v52  ;;  %v8618_v21 = vld [vmem:[#allocation5_spill] sm:$0xff] }
 0x156   : > { %8611 = vst [vmem:[#allocation210_spill] sm:$0xff] %v5939_v14  ;;  %v2062_v41 = vmul.f32 %v8612_v56, %v5713_v52  ;;  %v5949_v43 = vadd.f32 %v8614_v54, %v528_v37  ;;  %v5952_v61 = vadd.f32 %v8616_v4, %v529_v38  ;;  %3911 = vset.pattern.permute.xlu1 %v8370_v55  ;;  %v8620_v52 = vld [vmem:[#allocation151_spill] sm:$0xff]  ;;  %v8621_v38 = vld [vmem:[#allocation152_spill] sm:$0xff]  ;;  %v8622_v4 = vld [vmem:[#allocation153_spill] sm:$0xff] }
 0x157   : > { %v5956_v27 = vadd.f32 %v1167_v11, %v5666_v18  ;;  %v2448_v47 = vadd.f32 %v8618_v21, %v5759_v24  ;;  %v544_v12 = vmul.f32 %v8538_v0, %v5912_v35  ;;  %v5962_v57 = vpop.permute.xlu0 %370  ;;  %2193 = vperm.xlu1 %3911, %v5903_v48   ;;  %v2449_v37 = vadd.f32 %v8620_v52, %v5766_v33  ;;  %v8624_v21 = vld [vmem:[#allocation154_spill] sm:$0xff]  ;;  %v8641_v56 = vld [vmem:[#allocation4_spill] sm:$0xff] }
 0x158   : > { %8615 = vst [vmem:[#allocation211_spill] sm:$0xff] %v5949_v43  ;;  %8617 = vst [vmem:[#allocation212_spill] sm:$0xff] %v5952_v61  ;;  %v2450_v54 = vadd.f32 %v8621_v38, %v5771_v20  ;;  %v2451_v18 = vadd.f32 %v8622_v4, %v5775_v25  ;;  %v545_v11 = vmul.f32 %v8539_v63, %v5912_v35  ;;  %v8626_v43 = vld [vmem:[#allocation155_spill] sm:$0xff]  ;;  %v8629_v25 = vld [vmem:[#allocation156_spill] sm:$0xff] }
 0x159   : > { %8619 = vst [vmem:[#allocation213_spill] sm:$0xff] %v5962_v57  ;;  %v5975_v24 = vmul.f32 %v8540_v39, %v5912_v35  ;;  %v5979_v61 = vadd.f32 %v8624_v21, %v5779_v7  ;;  %v5983_v33 = vadd.f32 %v8626_v43, %v5786_v23  ;;  %v5987_v20 = vmul.f32 %v8544_v42, %v5912_v35  ;;  %v8631_v38 = vld [vmem:[#allocation158_spill] sm:$0xff]  ;;  %v6000_v23 = vpop.permute.xlu1 %2941  ;;  %v8634_v43 = vld [vmem:[#allocation43_spill] sm:$0xff]  ;;  %v8635_v35 = vld [vmem:[#allocation44_spill] sm:$0xff] }
 0x15a   : > { %v5990_v52 = vadd.f32 %v8629_v25, %v2062_v41  ;;  %v5993_v4 = vadd.f32 %v8631_v38, %v2063_v2  ;;  %v8633_v14 = vld [vmem:[#allocation42_spill] sm:$0xff]  ;;  %v560_v7 = vmul.f32 %v8538_v0, %v5962_v57  ;;  %v561_v21 = vmul.f32 %v8539_v63, %v5962_v57  ;;  %v6012_v2 = vld [vmem:[%s7820_s2 + $0x68] sm:$0xff]  ;;  %v8639_v38 = vld [vmem:[#allocation45_spill] sm:$0xff] }
 0x15b   : > { %8623 = vst [vmem:[#allocation214_spill] sm:$0xff] %v5975_v24  ;;  %8625 = vst [vmem:[#allocation182_spill] sm:$0xff] %v5979_v61  ;;  %v2712_v24 = vmul.f32 %v8633_v14, %v2558_v32  ;;  %v2713_v15 = vmul.f32 %v8634_v43, %v2558_v32  ;;  %v6005_v41 = vadd.f32 %v8636_v46, %v544_v12  ;;  %v6007_v25 = vpop.permute.xlu0 %380  ;;  %2197 = vperm.xlu1 %3911, %v6012_v2   ;;  %v8640_v17 = vld [vmem:[#allocation118_spill] sm:$0xff]  ;;  %v8643_v43 = vld [vmem:[#allocation119_spill] sm:$0xff] }
 0x15c   : > { %8627 = vst [vmem:[#allocation183_spill] sm:$0xff] %v5983_v33  ;;  %8628 = vst [vmem:[#allocation186_spill] sm:$0xff] %v5987_v20  ;;  %v2714_v20 = vmul.f32 %v8635_v35, %v2558_v32  ;;  %v2715_v6 = vmul.f32 %v8639_v38, %v2558_v32  ;;  %v6018_v14 = vadd.f32 %v8641_v56, %v8640_v17  ;;  %v8644_v35 = vld [vmem:[#allocation60_spill] sm:$0xff]  ;;  %v8646_v46 = vld [vmem:[#allocation165_spill] sm:$0xff] }
 0x15d   : > { %8630 = vst [vmem:[#allocation141_spill] sm:$0xff] %v5990_v52  ;;  %8632 = vst [vmem:[#allocation187_spill] sm:$0xff] %v5993_v4  ;;  %v6022_v4 = vadd.f32 %v8644_v35, %v8643_v43  ;;  %v6025_v12 = vadd.f32 %v8646_v46, %v545_v11  ;;  %v8649_v52 = vld [vmem:[#allocation48_spill] sm:$0xff]  ;;  %v8650_v61 = vld [vmem:[#allocation49_spill] sm:$0xff]  ;;  %v6039_v56 = vmul.f32 %v8544_v42, %v5962_v57 }
 0x15e   : > { %8637 = vst [vmem:[#allocation142_spill] sm:$0xff] %v6005_v41  ;;  %8638 = vst [vmem:[#allocation189_spill] sm:$0xff] %v6007_v25  ;;  %v6029_v41 = vmul.f32 %v8540_v39, %v5962_v57  ;;  %v6032_v33 = vmul.f32 %v8649_v52, %v2558_v32  ;;  %v6035_v38 = vmul.f32 %v8650_v61, %v2558_v32  ;;  %v8652_v43 = vld [vmem:[#allocation175_spill] sm:$0xff] }
 0x15f   : > { %8642 = vst [vmem:[#allocation190_spill] sm:$0xff] %v6018_v14  ;;  %8645 = vst [vmem:[#allocation115_spill] sm:$0xff] %v6022_v4  ;;  %v6042_v35 = vmul.f32 %v8453_v45, %v2558_v32  ;;  %v6045_v17 = vmul.f32 %v8456_v29, %v2558_v32  ;;  %v6047_v11 = vadd.f32 %v2712_v24, %v2448_v47  ;;  %v1379_v57 = vpop.permute.xlu0 %1378  ;;  %3912 = vset.pattern.permute.xlu1 %v8521_v19  ;;  %v8664_v45 = vld [vmem:[#allocation124_spill] sm:$0xff] }
 0x160   : > { %8647 = vst [vmem:[#allocation191_spill] sm:$0xff] %v6025_v12  ;;  %8648 = vst [vmem:[#allocation192_spill] sm:$0xff] %v6029_v41  ;;  %v6050_v46 = vadd.f32 %v8652_v43, %v560_v7  ;;  %v8654_v41 = vld [vmem:[#allocation176_spill] sm:$0xff]  ;;  %v6055_v4 = vadd.f32 %v2713_v15, %v2449_v37  ;;  %v6057_v14 = vadd.f32 %v2714_v20, %v2450_v54  ;;  %1037 = vperm.xlu1 %3912, %v6012_v2  }
 0x161   : > { %8651 = vst [vmem:[#allocation68_spill] sm:$0xff] %v6039_v56  ;;  %v6053_v12 = vadd.f32 %v8654_v41, %v561_v21  ;;  %v6060_v56 = vpop.permute.xlu1 %1901  ;;  %v3016_v32 = vadd.f32 %v6000_v23, %v5598_v26  ;;  %v3017_v47 = vadd.f32 %v6000_v23, %v5601_v58  ;;  %v3018_v24 = vadd.f32 %v6000_v23, %v5608_v31  ;;  %v8658_v21 = vld [vmem:[#allocation204_spill] sm:$0xff] }
 0x162   : > { %8653 = vst [vmem:[#allocation69_spill] sm:$0xff] %v6050_v46  ;;  %8656 = vst [vmem:[#allocation71_spill] sm:$0xff] %v6060_v56  ;;  %v6068_v7 = vadd.f32 %v2715_v6, %v2451_v18  ;;  %v1456_v15 = vadd.f32 %v1379_v57, %v5811_v8  ;;  %v1457_v37 = vadd.f32 %v1379_v57, %v5814_v30 }
 0x163   : > { %8655 = vst [vmem:[#allocation159_spill] sm:$0xff] %v6053_v12  ;;  %v1458_v54 = vadd.f32 %v1379_v57, %v5817_v5  ;;  %v3019_v20 = vadd.f32 %v6000_v23, %v5611_v40  ;;  %v6078_v26 = vmul.f32 %v8538_v0, %v6007_v25  ;;  %v6082_v58 = vmul.f32 %v8539_v63, %v6007_v25  ;;  %v1394_v0 = vpop.permute.xlu0 %1393  ;;  %v8662_v12 = vld [vmem:[#allocation78_spill] sm:$0xff] }
 0x164   : > { %v6086_v6 = vmul.f32 %v8540_v39, %v6007_v25  ;;  %v1459_v31 = vadd.f32 %v1379_v57, %v5827_v22  ;;  %v1584_v8 = vmax.f32 %v1456_v15, 0.0  ;;  %v1585_v30 = vmax.f32 %v1457_v37, 0.0 }
 0x165   : > { %v6091_v5 = vadd.f32 %v6000_v23, %v5618_v60  ;;  %v6095_v40 = vadd.f32 %v6000_v23, %v5621_v50  ;;  %v1460_v63 = vadd.f32 %v1379_v57, %v5836_v36  ;;  %v1586_v18 = vmax.f32 %v1458_v54, 0.0  ;;  %v6103_v15 = vpop.permute.xlu1 %2169  ;;  %v8661_v60 = vld [vmem:[#allocation76_spill] sm:$0xff]  ;;  %v8663_v50 = vld [vmem:[#allocation79_spill] sm:$0xff] }
 0x166   : > { %8657 = vst [vmem:[#allocation160_spill] sm:$0xff] %v6086_v6  ;;  %v6100_v41 = vadd.f32 %v6000_v23, %v8658_v21  ;;  %v3144_v43 = vmax.f32 %v3016_v32, 0.0  ;;  %v8659_v22 = vmov 0   ;;  %8660 = vst [vmem:[#allocation72_spill] sm:$0xff] %v6103_v15  ;;  %v1712_v37 = vadd.f32 %v1585_v30, %v1584_v8  ;;  %v3939_v36 = vld [vmem:[%s7821_s3 + $0x50] sm:$0xff] }
 0x167   : > { %3913 = vset.pattern.permute.xlu1 %v8659_v22  ;;  %v1480_v6 = vadd.f32 %v1394_v0, %v8661_v60  ;;  %v1481_v46 = vadd.f32 %v1394_v0, %v8662_v12  ;;  %v1482_v39 = vadd.f32 %v1394_v0, %v8663_v50  ;;  %v1461_v54 = vadd.f32 %v1379_v57, %v5839_v9  ;;  %v6113_v60 = vpop.permute.xlu0 %1403  ;;  %v8665_v9 = vld [vmem:[#allocation125_spill] sm:$0xff] }
 0x168   : > { %1428 = vperm.xlu1 %3913, %v3939_v36   ;;  %v1587_v21 = vmax.f32 %v1459_v31, 0.0  ;;  %v3145_v32 = vmax.f32 %v3017_v47, 0.0  ;;  %v3146_v56 = vmax.f32 %v3018_v24, 0.0  ;;  %v1713_v29 = vadd.f32 %v1712_v37, %v1586_v18 }
 0x169   : > { %v1483_v15 = vadd.f32 %v1394_v0, %v8664_v45  ;;  %v1608_v8 = vmax.f32 %v1480_v6, 0.0  ;;  %v1609_v30 = vmax.f32 %v1481_v46, 0.0  ;;  %v1462_v12 = vadd.f32 %v1379_v57, %v5851_v1  ;;  %v6117_v22 = vpop.permute.xlu1 %2173 }
 0x16a   : > { %v1588_v50 = vmax.f32 %v1460_v63, 0.0  ;;  %v3147_v61 = vmax.f32 %v3019_v20, 0.0  ;;  %v3148_v52 = vmax.f32 %v6091_v5, 0.0  ;;  %v1714_v36 = vadd.f32 %v1713_v29, %v1587_v21 }
 0x16b   : > { %v1484_v31 = vadd.f32 %v1394_v0, %v8665_v9  ;;  %v1610_v47 = vmax.f32 %v1482_v39, 0.0  ;;  %v1739_v24 = vadd.f32 %v1609_v30, %v1608_v8  ;;  %v8666_v18 = vmov 5   ;;  %v8667_v39 = vld [vmem:[#allocation126_spill] sm:$0xff]  ;;  %v8668_v8 = vld [vmem:[#allocation127_spill] sm:$0xff] }
 0x16c   : > { %3914 = vset.pattern.permute.xlu1 %v8666_v18  ;;  %v1463_v45 = vadd.f32 %v1379_v57, %v5854_v13  ;;  %v1589_v46 = vmax.f32 %v1461_v54, 0.0  ;;  %v3275_v6 = vadd.f32 %v3145_v32, %v3144_v43  ;;  %v1496_v1 = vadd.f32 %v6113_v60, %v5907_v49 }
 0x16d   : > { %2585 = vperm.xlu1 %3914, %v5903_v48   ;;  %v1715_v20 = vadd.f32 %v1714_v36, %v1588_v50  ;;  %v1611_v5 = vmax.f32 %v1483_v15, 0.0  ;;  %v1740_v63 = vadd.f32 %v1739_v24, %v1610_v47  ;;  %v1497_v29 = vadd.f32 %v6113_v60, %v5919_v62  ;;  %v1014_v54 = vpop.permute.xlu1 %1013  ;;  %v8669_v48 = vld [vmem:[#allocation128_spill] sm:$0xff] }
 0x16e   : > { %v1590_v37 = vmax.f32 %v1462_v12, 0.0  ;;  %v1485_v21 = vadd.f32 %v1394_v0, %v8667_v39  ;;  %v1486_v30 = vadd.f32 %v1394_v0, %v8668_v8  ;;  %v3276_v9 = vadd.f32 %v3275_v6, %v3146_v56 }
 0x16f   : > { %v1716_v13 = vadd.f32 %v1715_v20, %v1589_v46  ;;  %v1612_v57 = vmax.f32 %v1484_v31, 0.0  ;;  %v1741_v43 = vadd.f32 %v1740_v63, %v1611_v5  ;;  %v1498_v49 = vadd.f32 %v6113_v60, %v5922_v3 }
 0x170   : > { %v6132_v32 = vadd.f32 %v1394_v0, %v8669_v48  ;;  %v3277_v15 = vadd.f32 %v3276_v9, %v3147_v61  ;;  %v1624_v50 = vmax.f32 %v1496_v1, 0.0  ;;  %v1625_v36 = vmax.f32 %v1497_v29, 0.0  ;;  %v3940_v29 = vld [vmem:[%s7821_s3 + $0x58] sm:$0xff] }
 0x171   : > { %2589 = vperm.xlu1 %3914, %v6012_v2   ;;  %v1591_v62 = vmax.f32 %v1463_v45, 0.0  ;;  %v1717_v12 = vadd.f32 %v1716_v13, %v1590_v37  ;;  %v1742_v47 = vadd.f32 %v1741_v43, %v1612_v57  ;;  %v1499_v56 = vadd.f32 %v6113_v60, %v5929_v28  ;;  %v6145_v28 = vpop.permute.xlu1 %1398  ;;  %v8673_v13 = vld [vmem:[#allocation28_spill] sm:$0xff]  ;;  %v8674_v57 = vld [vmem:[#allocation29_spill] sm:$0xff] }
 0x172   : > { %v1613_v31 = vmax.f32 %v1485_v21, 0.0  ;;  %v1614_v24 = vmax.f32 %v1486_v30, 0.0  ;;  %v3149_v46 = vmax.f32 %v6095_v40, 0.0  ;;  %v1500_v3 = vadd.f32 %v6113_v60, %v5932_v44  ;;  %8670 = vst [vmem:[#allocation161_spill] sm:$0xff] %v6145_v28  ;;  %v8672_v21 = vld [vmem:[#allocation26_spill] sm:$0xff] }
 0x173   : > { %v1718_v0 = vadd.f32 %v1717_v12, %v1591_v62  ;;  %v1501_v61 = vadd.f32 %v6113_v60, %v5935_v16  ;;  %v1626_v6 = vmax.f32 %v1498_v49, 0.0  ;;  %v1757_v1 = vadd.f32 %v1625_v36, %v1624_v50  ;;  %v1414_v49 = vpop.permute.xlu0 %1413  ;;  %v8676_v36 = vld [vmem:[#allocation75_spill] sm:$0xff]  ;;  %v8677_v12 = vld [vmem:[#allocation66_spill] sm:$0xff] }
 0x174   : > { %v1615_v2 = vmax.f32 %v6132_v32, 0.0  ;;  %v1743_v45 = vadd.f32 %v1742_v47, %v1613_v31  ;;  %v3150_v20 = vmax.f32 %v6100_v41, 0.0  ;;  %v3278_v5 = vadd.f32 %v3277_v15, %v3148_v52  ;;  %v8671_v41 = vld [vmem:[#allocation25_spill] sm:$0xff]  ;;  %v8675_v15 = vld [vmem:[#allocation30_spill] sm:$0xff] }
 0x175   : > { %3915 = vset.pattern.permute.xlu1 %v8451_v53  ;;  %1719 = vadd.xlane.f32.xlu0 %v1718_v0  ;;  %v1502_v44 = vadd.f32 %v6113_v60, %v5942_v34  ;;  %v1627_v40 = vmax.f32 %v1499_v56, 0.0  ;;  %v1758_v63 = vadd.f32 %v1757_v1, %v1626_v6  ;;  %v1176_v16 = vmul.f32 %v8585_v10, %v1014_v54  ;;  %v8678_v56 = vld [vmem:[#allocation31_spill] sm:$0xff] }
 0x176   : > { %2973 = vperm.xlu1 %3915, %v3940_v29   ;;  %v1628_v37 = vmax.f32 %v1500_v3, 0.0  ;;  %v1177_v52 = vmul.f32 %v8586_v59, %v1014_v54  ;;  %v1178_v39 = vmul.f32 %v8671_v41, %v1014_v54  ;;  %v1179_v8 = vmul.f32 %v8672_v21, %v1014_v54  ;;  %v8679_v3 = vld [vmem:[#allocation95_spill] sm:$0xff] }
 0x177   : > { %v1629_v30 = vmax.f32 %v1501_v61, 0.0  ;;  %v1759_v9 = vadd.f32 %v1758_v63, %v1627_v40  ;;  %v1180_v34 = vmul.f32 %v8673_v13, %v1014_v54  ;;  %v1181_v43 = vmul.f32 %v8674_v57, %v1014_v54  ;;  %v8680_v61 = vld [vmem:[#allocation209_spill] sm:$0xff]  ;;  %v6165_v40 = vpop.permute.xlu1 %2561  ;;  %v8683_v63 = vld [vmem:[#allocation80_spill] sm:$0xff] }
 0x178   : > { %v1744_v48 = vadd.f32 %v1743_v45, %v1614_v24  ;;  %v3279_v32 = vadd.f32 %v3278_v5, %v3149_v46  ;;  %v1182_v50 = vmul.f32 %v8675_v15, %v1014_v54  ;;  %v1304_v62 = vadd.f32 %v1176_v16, %v8676_v36  ;;  %8682 = vst [vmem:[#allocation162_spill] sm:$0xff] %v6165_v40  ;;  %v8684_v46 = vld [vmem:[#allocation81_spill] sm:$0xff]  ;;  %v8685_v5 = vld [vmem:[#allocation82_spill] sm:$0xff] }
 0x179   : > { %3255 = vadd.xlane.f32.xlu0 %v8677_v12  ;;  %v1760_v47 = vadd.f32 %v1759_v9, %v1628_v37  ;;  %v1183_v31 = vmul.f32 %v8678_v56, %v1014_v54  ;;  %v1305_v0 = vadd.f32 %v1177_v52, %v8679_v3  ;;  %v1306_v6 = vadd.f32 %v1178_v39, %v8680_v61  ;;  %v8686_v16 = vld [vmem:[#allocation85_spill] sm:$0xff]  ;;  %v6174_v54 = vld [vmem:[%s7820_s2 + $0x70] sm:$0xff] }
 0x17a   : > { %v8681_v1 = vmov 3   ;;  %v1307_v24 = vadd.f32 %v1179_v8, %v8683_v63  ;;  %v1308_v45 = vadd.f32 %v1180_v34, %v8684_v46  ;;  %v1309_v29 = vadd.f32 %v1181_v43, %v8685_v5  ;;  %v8688_v34 = vld [vmem:[#allocation205_spill] sm:$0xff] }
 0x17b   : > { %3916 = vset.pattern.permute.xlu1 %v8681_v1  ;;  %v1310_v36 = vadd.f32 %v1182_v50, %v8686_v16  ;;  %v1761_v37 = vadd.f32 %v1760_v47, %v1629_v30  ;;  %v1512_v52 = vadd.f32 %v1414_v49, %v1304_v62  ;;  %v1513_v39 = vadd.f32 %v1414_v49, %v1305_v0  ;;  %v6186_v62 = vpop.permute.xlu1 %2565  ;;  %v8689_v47 = vld [vmem:[#allocation88_spill] sm:$0xff]  ;;  %v8726_v40 = vld [vmem:[#allocation33_spill] sm:$0xff] }
 0x17c   : > { %1933 = vperm.xlu1 %3916, %v6174_v54   ;;  %v1514_v9 = vadd.f32 %v1414_v49, %v1306_v6  ;;  %v6179_v8 = vmul.f32 %v8544_v42, %v6007_v25  ;;  %v3023_v43 = vadd.f32 %v6000_v23, %v8688_v34  ;;  %v1503_v50 = vadd.f32 %v6113_v60, %v5956_v27 }
 0x17d   : > { %v1630_v12 = vmax.f32 %v1502_v44, 0.0  ;;  %3264 = vadd.xlane.f32.xlu0 %v5916_v51  ;;  %v1745_v3 = vadd.f32 %v1744_v48, %v1615_v2  ;;  %v3280_v61 = vadd.f32 %v3279_v32, %v3150_v20  ;;  %v1640_v1 = vmax.f32 %v1512_v52, 0.0  ;;  %v8690_v51 = vld [vmem:[#allocation180_spill] sm:$0xff]  ;;  %v8692_v20 = vld [vmem:[#allocation181_spill] sm:$0xff] }
 0x17e   : > { %8687 = vst [vmem:[#allocation5_spill] sm:$0xff] %v6179_v8  ;;  %v1641_v30 = vmax.f32 %v1513_v39, 0.0  ;;  %v1311_v0 = vadd.f32 %v1183_v31, %v8689_v47  ;;  %v1515_v6 = vadd.f32 %v1414_v49, %v1307_v24  ;;  %v1516_v63 = vadd.f32 %v1414_v49, %v1308_v45  ;;  %v8694_v31 = vld [vmem:[#allocation182_spill] sm:$0xff]  ;;  %v8695_v24 = vld [vmem:[#allocation183_spill] sm:$0xff]  ;;  %v8700_v47 = vld [vmem:[#allocation52_spill] sm:$0xff] }
 0x17f   : > { %v1517_v46 = vadd.f32 %v1414_v49, %v1309_v29  ;;  %v1762_v23 = vadd.f32 %v1761_v37, %v1630_v12  ;;  %v6190_v5 = vadd.f32 %v1414_v49, %v1310_v36  ;;  %v1642_v27 = vmax.f32 %v1514_v9, 0.0  ;;  %v8696_v29 = vld [vmem:[#allocation141_spill] sm:$0xff]  ;;  %v8697_v37 = vld [vmem:[#allocation187_spill] sm:$0xff]  ;;  %v2950_v9 = vpop.permute.xlu1 %2949 }
 0x180   : > { %3918 = vset.pattern.permute.xlu1 %v8370_v55  ;;  %v1775_v60 = vadd.f32 %v1641_v30, %v1640_v1  ;;  %v6194_v2 = vadd.f32 %v8690_v51, %v6078_v26  ;;  %v6198_v44 = vadd.f32 %v8692_v20, %v6082_v58  ;;  %v3151_v48 = vmax.f32 %v3023_v43, 0.0  ;;  %v8699_v1 = vld [vmem:[#allocation51_spill] sm:$0xff]  ;;  %v8704_v20 = vld [vmem:[#allocation57_spill] sm:$0xff] }
 0x181   : > { %2201 = vperm.xlu1 %3918, %v6174_v54   ;;  %v1631_v32 = vmax.f32 %v1503_v50, 0.0  ;;  %1746 = vadd.xlane.f32.xlu0 %v1745_v3  ;;  %v2844_v55 = vadd.f32 %v6032_v33, %v8694_v31  ;;  %v2845_v45 = vadd.f32 %v6035_v38, %v8695_v24  ;;  %v2846_v16 = vadd.f32 %v6042_v35, %v8696_v29  ;;  %v6215_v38 = vld [vmem:[%s7820_s2 + $0x78] sm:$0xff]  ;;  %v8698_v3 = vld [vmem:[#allocation47_spill] sm:$0xff] }
 0x182   : > { %8691 = vst [vmem:[#allocation151_spill] sm:$0xff] %v6194_v2  ;;  %8693 = vst [vmem:[#allocation152_spill] sm:$0xff] %v6198_v44  ;;  %v1776_v26 = vadd.f32 %v1775_v60, %v1642_v27  ;;  %v3281_v36 = vadd.f32 %v3280_v61, %v3151_v48  ;;  %v2847_v58 = vadd.f32 %v6045_v17, %v8697_v37  ;;  %v1643_v39 = vmax.f32 %v1515_v6, 0.0  ;;  %v8701_v6 = vld [vmem:[#allocation53_spill] sm:$0xff]  ;;  %v8703_v60 = vld [vmem:[#allocation56_spill] sm:$0xff] }
 0x183   : > { %v6209_v52 = vadd.f32 %v1414_v49, %v1311_v0  ;;  %v1763_v34 = vadd.f32 %v1762_v23, %v1631_v32  ;;  %v1644_v43 = vmax.f32 %v1516_v63, 0.0  ;;  %v1645_v50 = vmax.f32 %v1517_v46, 0.0  ;;  %v6237_v32 = vpop.permute.xlu1 %1909  ;;  %v8707_v37 = vld [vmem:[#allocation27_spill] sm:$0xff] }
 0x184   : > { %v1646_v33 = vmax.f32 %v6190_v5, 0.0  ;;  %v3032_v35 = vadd.f32 %v2950_v9, %v6047_v11  ;;  %v3033_v17 = vadd.f32 %v2950_v9, %v6055_v4  ;;  %v3034_v49 = vadd.f32 %v2950_v9, %v6057_v14  ;;  %v8702_v14 = vld [vmem:[#allocation55_spill] sm:$0xff]  ;;  %8705 = vst [vmem:[#allocation153_spill] sm:$0xff] %v6237_v32 }
 0x185   : > { %2205 = vperm.xlu1 %3918, %v6215_v38   ;;  %v1777_v12 = vadd.f32 %v1776_v26, %v1643_v39  ;;  %3282 = vadd.xlane.f32.xlu0 %v3281_v36  ;;  %v2336_v61 = vmul.f32 %v8698_v3, %v6117_v22  ;;  %v2337_v30 = vmul.f32 %v8699_v1, %v6117_v22  ;;  %v8709_v2 = vld [vmem:[#allocation171_spill] sm:$0xff] }
 0x186   : > { %v2338_v0 = vmul.f32 %v8700_v47, %v6117_v22  ;;  %v2339_v63 = vmul.f32 %v8701_v6, %v6117_v22  ;;  %v3035_v11 = vadd.f32 %v2950_v9, %v6068_v7  ;;  %v3160_v46 = vmax.f32 %v3032_v35, 0.0 }
 0x187   : > { %v3161_v4 = vmax.f32 %v3033_v17, 0.0  ;;  %v2340_v23 = vmul.f32 %v8702_v14, %v6117_v22  ;;  %v3036_v5 = vadd.f32 %v2950_v9, %v2844_v55  ;;  %v3037_v27 = vadd.f32 %v2950_v9, %v2845_v45  ;;  %v8706_v45 = vld [vmem:[#allocation58_spill] sm:$0xff] }
 0x188   : > { %v2341_v51 = vmul.f32 %v8703_v60, %v6117_v22  ;;  %v2342_v48 = vmul.f32 %v8704_v20, %v6117_v22  ;;  %v3038_v31 = vadd.f32 %v2950_v9, %v2846_v16  ;;  %v3162_v24 = vmax.f32 %v3034_v49, 0.0 }
 0x189   : > { %3920 = vset.pattern.permute.xlu1 %v8521_v19  ;;  %v3293_v7 = vadd.f32 %v3161_v4, %v3160_v46  ;;  %v1778_v29 = vadd.f32 %v1777_v12, %v1644_v43  ;;  %1764 = vadd.xlane.f32.xlu0 %v1763_v34  ;;  %v3039_v26 = vadd.f32 %v2950_v9, %v2847_v58  ;;  %v1647_v55 = vmax.f32 %v6209_v52, 0.0  ;;  %v8708_v19 = vld [vmem:[#allocation170_spill] sm:$0xff]  ;;  %v8710_v46 = vld [vmem:[#allocation172_spill] sm:$0xff]  ;;  %v8711_v12 = vld [vmem:[#allocation173_spill] sm:$0xff] }
 0x18a   : > { %1045 = vperm.xlu1 %3920, %v6215_v38   ;;  %v2343_v36 = vmul.f32 %v8706_v45, %v6117_v22  ;;  %v2464_v39 = vadd.f32 %v2336_v61, %v8707_v37  ;;  %v3163_v35 = vmax.f32 %v3035_v11, 0.0  ;;  %v2465_v44 = vadd.f32 %v2337_v30, %v8708_v19  ;;  %v8712_v34 = vld [vmem:[#allocation174_spill] sm:$0xff]  ;;  %v6250_v61 = vpop.permute.xlu1 %2177  ;;  %v8722_v37 = vld [vmem:[#allocation32_spill] sm:$0xff] }
 0x18b   : > { %v3294_v17 = vadd.f32 %v3293_v7, %v3162_v24  ;;  %v2466_v16 = vadd.f32 %v2338_v0, %v8709_v2  ;;  %v1779_v49 = vadd.f32 %v1778_v29, %v1645_v50  ;;  %v2467_v43 = vadd.f32 %v2339_v63, %v8710_v46  ;;  %8714 = vst [vmem:[#allocation154_spill] sm:$0xff] %v6250_v61  ;;  %v8715_v24 = vld [vmem:[#allocation177_spill] sm:$0xff]  ;;  %v8716_v2 = vld [vmem:[#allocation42_spill] sm:$0xff]  ;;  %v8717_v0 = vld [vmem:[#allocation43_spill] sm:$0xff] }
 0x18c   : > { %v2468_v4 = vadd.f32 %v2340_v23, %v8711_v12  ;;  %v2469_v58 = vadd.f32 %v2341_v51, %v8712_v34  ;;  %v3164_v9 = vmax.f32 %v3036_v5, 0.0  ;;  %v3165_v52 = vmax.f32 %v3037_v27, 0.0  ;;  %v3943_v23 = vld [vmem:[%s7821_s3 + $0x60] sm:$0xff]  ;;  %v8719_v51 = vld [vmem:[#allocation44_spill] sm:$0xff]  ;;  %v8720_v7 = vld [vmem:[#allocation45_spill] sm:$0xff] }
 0x18d   : > { %v3166_v8 = vmax.f32 %v3038_v31, 0.0  ;;  %v3295_v25 = vadd.f32 %v3294_v17, %v3163_v35  ;;  %v8713_v22 = vmov 0   ;;  %v3167_v11 = vmax.f32 %v3039_v26, 0.0  ;;  %v8718_v5 = vld [vmem:[#allocation178_spill] sm:$0xff]  ;;  %v8723_v46 = vld [vmem:[#allocation49_spill] sm:$0xff] }
 0x18e   : > { %3921 = vset.pattern.permute.xlu1 %v8713_v22  ;;  %v2470_v30 = vadd.f32 %v2342_v48, %v8715_v24  ;;  %v2728_v50 = vmul.f32 %v8716_v2, %v6186_v62  ;;  %v2729_v63 = vmul.f32 %v8717_v0, %v6186_v62  ;;  %v2471_v27 = vadd.f32 %v2343_v36, %v8718_v5  ;;  %v8721_v48 = vld [vmem:[#allocation48_spill] sm:$0xff]  ;;  %v8724_v24 = vld [vmem:[#allocation50_spill] sm:$0xff] }
 0x18f   : > { %1438 = vperm.xlu1 %3921, %v3943_v23   ;;  %v2730_v31 = vmul.f32 %v8719_v51, %v6186_v62  ;;  %v2731_v29 = vmul.f32 %v8720_v7, %v6186_v62  ;;  %v2732_v26 = vmul.f32 %v8721_v48, %v6186_v62  ;;  %v2080_v35 = vmul.f32 %v8722_v37, %v6237_v32  ;;  %v8725_v5 = vld [vmem:[#allocation54_spill] sm:$0xff] }
 0x190   : > { %v3296_v17 = vadd.f32 %v3295_v25, %v3164_v9  ;;  %v1780_v19 = vadd.f32 %v1779_v49, %v1646_v33  ;;  %v2733_v12 = vmul.f32 %v8723_v46, %v6186_v62  ;;  %v2344_v36 = vmul.f32 %v8698_v3, %v6250_v61  ;;  %v6281_v25 = vpop.permute.xlu1 %2181 }
 0x191   : > { %v2345_v34 = vmul.f32 %v8699_v1, %v6250_v61  ;;  %v2734_v23 = vmul.f32 %v8724_v24, %v6186_v62  ;;  %v2735_v42 = vmul.f32 %v8725_v5, %v6186_v62  ;;  %v2081_v28 = vmul.f32 %v8726_v40, %v6237_v32  ;;  %8727 = vst [vmem:[#allocation155_spill] sm:$0xff] %v6281_v25 }
 0x192   : > { %v3297_v33 = vadd.f32 %v3296_v17, %v3165_v52  ;;  %v6283_v49 = vadd.f32 %v2728_v50, %v2464_v39  ;;  %v6285_v9 = vadd.f32 %v2729_v63, %v2465_v44  ;;  %v6289_v46 = vmul.f32 %v8700_v47, %v6250_v61  ;;  %v8735_v17 = vld [vmem:[#allocation87_spill] sm:$0xff] }
 0x193   : > { %3922 = vset.pattern.permute.xlu1 %v8666_v18  ;;  %v6292_v24 = vadd.f32 %v2730_v31, %v2466_v16  ;;  %v6294_v48 = vadd.f32 %v2731_v29, %v2467_v43  ;;  %v6296_v62 = vadd.f32 %v2732_v26, %v2468_v4  ;;  %v6300_v32 = vmul.f32 %v8701_v6, %v6250_v61  ;;  %v8732_v4 = vld [vmem:[#allocation120_spill] sm:$0xff]  ;;  %v8733_v31 = vld [vmem:[#allocation83_spill] sm:$0xff]  ;;  %v8734_v26 = vld [vmem:[#allocation121_spill] sm:$0xff] }
 0x194   : > { %8728 = vst [vmem:[#allocation156_spill] sm:$0xff] %v6289_v46  ;;  %2593 = vperm.xlu1 %3922, %v6174_v54   ;;  %v3298_v44 = vadd.f32 %v3297_v33, %v3166_v8  ;;  %v1781_v39 = vadd.f32 %v1780_v19, %v1647_v55  ;;  %v6303_v52 = vadd.f32 %v2733_v12, %v2469_v58  ;;  %v8736_v54 = vld [vmem:[#allocation134_spill] sm:$0xff]  ;;  %v8737_v8 = vld [vmem:[#allocation89_spill] sm:$0xff]  ;;  %v8747_v46 = vld [vmem:[#allocation115_spill] sm:$0xff] }
 0x195   : > { %8729 = vst [vmem:[#allocation158_spill] sm:$0xff] %v6300_v32  ;;  %v6305_v50 = vadd.f32 %v2344_v36, %v2080_v35  ;;  %v6307_v63 = vadd.f32 %v2345_v34, %v2081_v28  ;;  %v6309_v18 = vadd.f32 %v2734_v23, %v2470_v30  ;;  %v6311_v16 = vadd.f32 %v2735_v42, %v2471_v27  ;;  %v8739_v30 = vld [vmem:[#allocation135_spill] sm:$0xff]  ;;  %v8740_v27 = vld [vmem:[#allocation90_spill] sm:$0xff]  ;;  %v1424_v23 = vpop.permute.xlu0 %1423 }
 0x196   : > { %v3299_v43 = vadd.f32 %v3298_v44, %v3167_v11  ;;  %v932_v29 = vadd.f32 %v8733_v31, %v8732_v4  ;;  %v933_v32 = vadd.f32 %v8735_v17, %v8734_v26  ;;  %v934_v55 = vadd.f32 %v8737_v8, %v8736_v54  ;;  %v1022_v11 = vpop.permute.xlu1 %1021  ;;  %v8742_v31 = vld [vmem:[#allocation113_spill] sm:$0xff]  ;;  %v8743_v17 = vld [vmem:[#allocation114_spill] sm:$0xff] }
 0x197   : > { %8730 = vst [vmem:[#allocation164_spill] sm:$0xff] %v6305_v50  ;;  %8731 = vst [vmem:[#allocation118_spill] sm:$0xff] %v6307_v63  ;;  %v2352_v58 = vmul.f32 %v8698_v3, %v6281_v25  ;;  %v6323_v28 = vmul.f32 %v8699_v1, %v6281_v25  ;;  %v6327_v42 = vmul.f32 %v8700_v47, %v6281_v25  ;;  %v8744_v8 = vld [vmem:[#allocation190_spill] sm:$0xff] }
 0x198   : > { %v935_v35 = vadd.f32 %v8740_v27, %v8739_v30  ;;  %v1192_v19 = vmul.f32 %v8585_v10, %v1022_v11  ;;  %v1193_v12 = vmul.f32 %v8586_v59, %v1022_v11  ;;  %v1194_v36 = vmul.f32 %v8671_v41, %v1022_v11  ;;  %3300 = vadd.xlane.f32.xlu0 %v3299_v43  ;;  %v8745_v43 = vld [vmem:[#allocation92_spill] sm:$0xff]  ;;  %v8746_v27 = vld [vmem:[#allocation10_spill] sm:$0xff] }
 0x199   : > { %8738 = vst [vmem:[#allocation4_spill] sm:$0xff] %v6327_v42  ;;  %2597 = vperm.xlu1 %3922, %v6215_v38   ;;  %v6337_v34 = vmul.f32 %v8701_v6, %v6281_v25  ;;  %v1195_v33 = vmul.f32 %v8672_v21, %v1022_v11  ;;  %v1196_v44 = vmul.f32 %v8673_v13, %v1022_v11  ;;  %v8752_v25 = vld [vmem:[#allocation12_spill] sm:$0xff] }
 0x19a   : > { %v1197_v4 = vmul.f32 %v8674_v57, %v1022_v11  ;;  %v1320_v26 = vadd.f32 %v1192_v19, %v8742_v31  ;;  %v1321_v54 = vadd.f32 %v1193_v12, %v8743_v17  ;;  %v1322_v30 = vadd.f32 %v1194_v36, %v8744_v8  ;;  %v6353_v19 = vpop.permute.xlu1 %1408  ;;  %v8750_v17 = vld [vmem:[#allocation166_spill] sm:$0xff] }
 0x19b   : > { %8741 = vst [vmem:[#allocation119_spill] sm:$0xff] %v6337_v34  ;;  %v476_v38 = vmul.f32 %v8746_v27, %v8745_v43  ;;  %v1198_v63 = vmul.f32 %v8675_v15, %v1022_v11  ;;  %v1199_v50 = vmul.f32 %v8678_v56, %v1022_v11  ;;  %v1323_v61 = vadd.f32 %v1195_v33, %v8747_v46  ;;  %v8748_v34 = vld [vmem:[#allocation11_spill] sm:$0xff] }
 0x19c   : > { %v477_v42 = vmul.f32 %v8748_v34, %v8745_v43  ;;  %1782 = vadd.xlane.f32.xlu0 %v1781_v39  ;;  %8749 = vst [vmem:[#allocation60_spill] sm:$0xff] %v6353_v19  ;;  %v1324_v12 = vadd.f32 %v1196_v44, %v932_v29  ;;  %v1528_v31 = vadd.f32 %v1424_v23, %v1320_v26  ;;  %v3944_v11 = vld [vmem:[%s7821_s3 + $0x68] sm:$0xff]  ;;  %v8753_v29 = vld [vmem:[#allocation13_spill] sm:$0xff] }
 0x19d   : > { %3924 = vset.pattern.permute.xlu1 %v8451_v53  ;;  %v1529_v36 = vadd.f32 %v1424_v23, %v1321_v54  ;;  %v6356_v8 = vadd.f32 %v2352_v58, %v8750_v17  ;;  %v1325_v46 = vadd.f32 %v1197_v4, %v933_v32  ;;  %v1530_v33 = vadd.f32 %v1424_v23, %v1322_v30  ;;  %v306_v58 = vld [vmem:[%s7821_s3 + $0x70] sm:$0xff]  ;;  %v8754_v17 = vld [vmem:[#allocation93_spill] sm:$0xff] }
 0x19e   : > { %2981 = vperm.xlu1 %3924, %v3944_v11   ;;  %v478_v39 = vmul.f32 %v8752_v25, %v8745_v43  ;;  %v1531_v34 = vadd.f32 %v1424_v23, %v1323_v61  ;;  %v1656_v27 = vmax.f32 %v1528_v31, 0.0  ;;  %v479_v44 = vmul.f32 %v8753_v29, %v8745_v43  ;;  %v8755_v31 = vld [vmem:[#allocation98_spill] sm:$0xff]  ;;  %v6375_v43 = vpop.permute.xlu1 %2569  ;;  %v8758_v29 = vld [vmem:[#allocation99_spill] sm:$0xff] }
 0x19f   : > { %8751 = vst [vmem:[#allocation165_spill] sm:$0xff] %v6356_v8  ;;  %v1657_v5 = vmax.f32 %v1529_v36, 0.0  ;;  %v1326_v26 = vadd.f32 %v1198_v63, %v934_v55  ;;  %v1327_v54 = vadd.f32 %v1199_v50, %v935_v35  ;;  %v1128_v11 = vmul.f32 %v8585_v10, %v8754_v17  ;;  %v8756_v36 = vld [vmem:[#allocation143_spill] sm:$0xff]  ;;  %8757 = vst [vmem:[#allocation175_spill] sm:$0xff] %v6375_v43  ;;  %v8759_v63 = vld [vmem:[#allocation144_spill] sm:$0xff] }
 0x1a0   : > { %v1129_v32 = vmul.f32 %v8586_v59, %v8754_v17  ;;  %v1532_v4 = vadd.f32 %v1424_v23, %v1324_v12  ;;  %v1658_v30 = vmax.f32 %v1530_v33, 0.0  ;;  %v866_v8 = vadd.f32 %v8756_v36, %v8755_v31  ;;  %v8760_v55 = vld [vmem:[#allocation145_spill] sm:$0xff]  ;;  %v8761_v25 = vld [vmem:[#allocation146_spill] sm:$0xff] }
 0x1a1   : > { %v1793_v61 = vadd.f32 %v1657_v5, %v1656_v27  ;;  %v1533_v19 = vadd.f32 %v1424_v23, %v1325_v46  ;;  %v867_v50 = vadd.f32 %v8759_v63, %v8758_v29  ;;  %v868_v35 = vadd.f32 %v8760_v55, %v476_v38  ;;  %v8762_v46 = vld [vmem:[#allocation100_spill] sm:$0xff]  ;;  %v8763_v36 = vld [vmem:[#allocation101_spill] sm:$0xff] }
 0x1a2   : > { %3925 = vset.pattern.permute.xlu1 %v8713_v22  ;;  %v869_v10 = vadd.f32 %v8761_v25, %v477_v42  ;;  %v1659_v59 = vmax.f32 %v1531_v34, 0.0  ;;  %v1130_v5 = vmul.f32 %v8671_v41, %v8754_v17  ;;  %v1131_v27 = vmul.f32 %v8672_v21, %v8754_v17  ;;  %v6393_v34 = vpop.permute.xlu1 %2573  ;;  %v8766_v55 = vld [vmem:[#allocation148_spill] sm:$0xff] }
 0x1a3   : > { %1448 = vperm.xlu1 %3925, %v306_v58   ;;  %v1794_v12 = vadd.f32 %v1793_v61, %v1658_v30  ;;  %v1534_v22 = vadd.f32 %v1424_v23, %v1326_v26  ;;  %v6385_v33 = vadd.f32 %v1424_v23, %v1327_v54  ;;  %v1256_v31 = vadd.f32 %v1128_v11, %v8762_v46  ;;  %v8765_v30 = vld [vmem:[#allocation147_spill] sm:$0xff] }
 0x1a4   : > { %v1257_v29 = vadd.f32 %v1129_v32, %v8763_v36  ;;  %v1660_v63 = vmax.f32 %v1532_v4, 0.0  ;;  %v1132_v25 = vmul.f32 %v8673_v13, %v8754_v17  ;;  %v1133_v42 = vmul.f32 %v8674_v57, %v8754_v17  ;;  %8764 = vst [vmem:[#allocation176_spill] sm:$0xff] %v6393_v34  ;;  %v8767_v4 = vld [vmem:[#allocation138_spill] sm:$0xff]  ;;  %v8768_v46 = vld [vmem:[#allocation167_spill] sm:$0xff] }
 0x1a5   : > { %v1795_v38 = vadd.f32 %v1794_v12, %v1659_v59  ;;  %v870_v61 = vadd.f32 %v8765_v30, %v478_v39  ;;  %v871_v26 = vadd.f32 %v8766_v55, %v479_v44  ;;  %v1134_v23 = vmul.f32 %v8675_v15, %v8754_v17 }
 0x1a6   : > { %v1135_v54 = vmul.f32 %v8678_v56, %v8754_v17  ;;  %v1258_v11 = vadd.f32 %v1130_v5, %v866_v8  ;;  %v1259_v32 = vadd.f32 %v1131_v27, %v867_v50  ;;  %v1464_v12 = vadd.f32 %v8767_v4, %v1256_v31  ;;  %v2958_v5 = vpop.permute.xlu1 %2957 }
 0x1a7   : > { %3926 = vset.pattern.permute.xlu1 %v8451_v53  ;;  %v1796_v59 = vadd.f32 %v1795_v38, %v1660_v63  ;;  %v6405_v36 = vadd.f32 %v6323_v28, %v8768_v46  ;;  %v1661_v39 = vmax.f32 %v1533_v19, 0.0  ;;  %v1662_v44 = vmax.f32 %v1534_v22, 0.0 }
 0x1a8   : > { %2985 = vperm.xlu1 %3926, %v306_v58   ;;  %v1465_v30 = vadd.f32 %v8767_v4, %v1257_v29  ;;  %v6410_v55 = vmul.f32 %v8716_v2, %v6375_v43  ;;  %v1663_v53 = vmax.f32 %v6385_v33, 0.0  ;;  %v1260_v17 = vadd.f32 %v1132_v25, %v868_v35 }
 0x1a9   : > { %8769 = vst [vmem:[#allocation204_spill] sm:$0xff] %v6405_v36  ;;  %v1261_v8 = vadd.f32 %v1133_v42, %v869_v10  ;;  %v6415_v50 = vmul.f32 %v8717_v0, %v6375_v43  ;;  %v6419_v28 = vmul.f32 %v8719_v51, %v6375_v43  ;;  %v1262_v19 = vadd.f32 %v1134_v23, %v870_v61  ;;  %v3945_v10 = vld [vmem:[%s7821_s3 + $0x78] sm:$0xff]  ;;  %v8803_v43 = vld [vmem:[#allocation123_spill] sm:$0xff]  ;;  %v8804_v36 = vld [vmem:[#allocation48_spill] sm:$0xff] }
 0x1aa   : > { %8770 = vst [vmem:[#allocation76_spill] sm:$0xff] %v6410_v55  ;;  %v1263_v58 = vadd.f32 %v1135_v54, %v871_v26  ;;  %v1797_v27 = vadd.f32 %v1796_v59, %v1661_v39  ;;  %v1466_v22 = vadd.f32 %v8767_v4, %v1258_v11  ;;  %v1467_v31 = vadd.f32 %v8767_v4, %v1259_v32 }
 0x1ab   : > { %8771 = vst [vmem:[#allocation78_spill] sm:$0xff] %v6415_v50  ;;  %8772 = vst [vmem:[#allocation79_spill] sm:$0xff] %v6419_v28  ;;  %v1592_v29 = vmax.f32 %v1464_v12, 0.0  ;;  %v3048_v35 = vadd.f32 %v2958_v5, %v6283_v49  ;;  %v3049_v33 = vadd.f32 %v2958_v5, %v6285_v9  ;;  %v3050_v63 = vadd.f32 %v2958_v5, %v6292_v24  ;;  %v6446_v12 = vpop.permute.xlu1 %1917 }
 0x1ac   : > { %2989 = vperm.xlu1 %3926, %v3945_v10   ;;  %v1593_v38 = vmax.f32 %v1465_v30, 0.0  ;;  %v6431_v25 = vmul.f32 %v8716_v2, %v6393_v34  ;;  %v6435_v42 = vmul.f32 %v8717_v0, %v6393_v34  ;;  %v1468_v61 = vadd.f32 %v8767_v4, %v1260_v17  ;;  %8775 = vst [vmem:[#allocation126_spill] sm:$0xff] %v6446_v12  ;;  %v8776_v17 = vld [vmem:[#allocation199_spill] sm:$0xff] }
 0x1ad   : > { %v1469_v26 = vadd.f32 %v8767_v4, %v1261_v8  ;;  %v3051_v23 = vadd.f32 %v2958_v5, %v6294_v48  ;;  %v3176_v49 = vmax.f32 %v3048_v35, 0.0  ;;  %v3177_v54 = vmax.f32 %v3049_v33, 0.0  ;;  %v8777_v8 = vld [vmem:[#allocation102_spill] sm:$0xff] }
 0x1ae   : > { %8773 = vst [vmem:[#allocation124_spill] sm:$0xff] %v6431_v25  ;;  %8774 = vst [vmem:[#allocation125_spill] sm:$0xff] %v6435_v42  ;;  %v6441_v9 = vadd.f32 %v8767_v4, %v1262_v19  ;;  %v1798_v24 = vadd.f32 %v1797_v27, %v1662_v44  ;;  %v6444_v59 = vadd.f32 %v8767_v4, %v1263_v58  ;;  %v1594_v11 = vmax.f32 %v1466_v22, 0.0  ;;  %v8778_v22 = vld [vmem:[#allocation200_spill] sm:$0xff] }
 0x1af   : > { %v1595_v32 = vmax.f32 %v1467_v31, 0.0  ;;  %v3178_v46 = vmax.f32 %v3050_v63, 0.0  ;;  %v3311_v39 = vadd.f32 %v3177_v54, %v3176_v49  ;;  %v1721_v30 = vadd.f32 %v1593_v38, %v1592_v29  ;;  %v8781_v54 = vld [vmem:[#allocation201_spill] sm:$0xff]  ;;  %v8806_v25 = vld [vmem:[#allocation40_spill] sm:$0xff] }
 0x1b0   : > { %v1472_v10 = vadd.f32 %v8777_v8, %v8776_v17  ;;  %v3052_v48 = vadd.f32 %v2958_v5, %v6296_v62  ;;  %v3053_v35 = vadd.f32 %v2958_v5, %v6303_v52  ;;  %v3054_v19 = vadd.f32 %v2958_v5, %v6309_v18 }
 0x1b1   : > { %v3055_v44 = vadd.f32 %v2958_v5, %v6311_v16  ;;  %v3179_v4 = vmax.f32 %v3051_v23, 0.0  ;;  %v3312_v58 = vadd.f32 %v3311_v39, %v3178_v46  ;;  %v1722_v27 = vadd.f32 %v1721_v30, %v1594_v11  ;;  %v6462_v16 = vpop.permute.xlu1 %2185 }
 0x1b2   : > { %v1473_v31 = vadd.f32 %v8777_v8, %v8778_v22  ;;  %v6458_v29 = vmul.f32 %v8719_v51, %v6393_v34  ;;  %v1596_v33 = vmax.f32 %v1468_v61, 0.0  ;;  %v1597_v63 = vmax.f32 %v1469_v26, 0.0  ;;  %8780 = vst [vmem:[#allocation128_spill] sm:$0xff] %v6462_v16  ;;  %v8782_v61 = vld [vmem:[#allocation202_spill] sm:$0xff] }
 0x1b3   : > { %v1598_v62 = vmax.f32 %v6441_v9, 0.0  ;;  %v3313_v38 = vadd.f32 %v3312_v58, %v3179_v4  ;;  %v1723_v18 = vadd.f32 %v1722_v27, %v1595_v32  ;;  %v1600_v49 = vmax.f32 %v1472_v10, 0.0  ;;  %v8783_v4 = vld [vmem:[#allocation203_spill] sm:$0xff] }
 0x1b4   : > { %8779 = vst [vmem:[#allocation127_spill] sm:$0xff] %v6458_v29  ;;  %v3180_v5 = vmax.f32 %v3052_v48, 0.0  ;;  %v3181_v23 = vmax.f32 %v3053_v35, 0.0  ;;  %v1474_v11 = vadd.f32 %v8777_v8, %v8781_v54  ;;  %v1601_v46 = vmax.f32 %v1473_v31, 0.0  ;;  %v8784_v58 = vld [vmem:[#allocation215_spill] sm:$0xff] }
 0x1b5   : > { %v3182_v39 = vmax.f32 %v3054_v19, 0.0  ;;  %v3183_v30 = vmax.f32 %v3055_v44, 0.0  ;;  %v1799_v17 = vadd.f32 %v1798_v24, %v1663_v53  ;;  %v1475_v26 = vadd.f32 %v8777_v8, %v8782_v61  ;;  %v8785_v19 = vld [vmem:[#allocation216_spill] sm:$0xff]  ;;  %v6484_v31 = vpop.permute.xlu1 %2189  ;;  %v8789_v54 = vld [vmem:[#allocation35_spill] sm:$0xff] }
 0x1b6   : > { %v2096_v9 = vmul.f32 %v8722_v37, %v6446_v12  ;;  %v2097_v32 = vmul.f32 %v8726_v40, %v6446_v12  ;;  %v3314_v10 = vadd.f32 %v3313_v38, %v3180_v5  ;;  %v1476_v48 = vadd.f32 %v8777_v8, %v8783_v4  ;;  %8786 = vst [vmem:[#allocation75_spill] sm:$0xff] %v6484_v31  ;;  %v8791_v4 = vld [vmem:[#allocation217_spill] sm:$0xff] }
 0x1b7   : > { %v1724_v35 = vadd.f32 %v1723_v18, %v1596_v33  ;;  %v1477_v27 = vadd.f32 %v8777_v8, %v8784_v58  ;;  %v6478_v53 = vadd.f32 %v8777_v8, %v8785_v19  ;;  %v1730_v24 = vadd.f32 %v1601_v46, %v1600_v49  ;;  %v8787_v33 = vld [vmem:[#allocation34_spill] sm:$0xff] }
 0x1b8   : > { %v2360_v44 = vmul.f32 %v8698_v3, %v6462_v16  ;;  %v2361_v22 = vmul.f32 %v8699_v1, %v6462_v16  ;;  %v3315_v38 = vadd.f32 %v3314_v10, %v3181_v23  ;;  %v1602_v5 = vmax.f32 %v1474_v11, 0.0 }
 0x1b9   : > { %v6488_v18 = vmul.f32 %v8787_v33, %v6446_v12  ;;  %v6492_v61 = vmul.f32 %v8789_v54, %v6446_v12  ;;  %v6496_v49 = vadd.f32 %v8777_v8, %v8791_v4  ;;  %v1603_v46 = vmax.f32 %v1475_v26, 0.0 }
 0x1ba   : > { %v6500_v58 = vmul.f32 %v8700_v47, %v6462_v16  ;;  %v3316_v19 = vadd.f32 %v3315_v38, %v3182_v39  ;;  %v1604_v23 = vmax.f32 %v1476_v48, 0.0  ;;  %v1731_v11 = vadd.f32 %v1730_v24, %v1602_v5  ;;  %v6513_v39 = vpop.permute.xlu1 %1029  ;;  %v8797_v24 = vld [vmem:[#allocation61_spill] sm:$0xff] }
 0x1bb   : > { %8788 = vst [vmem:[#allocation66_spill] sm:$0xff] %v6488_v18  ;;  %8790 = vst [vmem:[#allocation95_spill] sm:$0xff] %v6492_v61  ;;  %v6504_v10 = vmul.f32 %v8701_v6, %v6462_v16  ;;  %v1725_v52 = vadd.f32 %v1724_v35, %v1597_v63  ;;  %v1605_v18 = vmax.f32 %v1477_v27, 0.0  ;;  %v1606_v61 = vmax.f32 %v6478_v53, 0.0 }
 0x1bc   : > { %8792 = vst [vmem:[#allocation209_spill] sm:$0xff] %v6500_v58  ;;  %v6507_v12 = vadd.f32 %v2360_v44, %v2096_v9  ;;  %v6509_v8 = vadd.f32 %v2361_v22, %v2097_v32  ;;  %v3317_v26 = vadd.f32 %v3316_v19, %v3183_v30  ;;  %v1732_v4 = vadd.f32 %v1731_v11, %v1603_v46  ;;  %v8798_v30 = vld [vmem:[#allocation133_spill] sm:$0xff] }
 0x1bd   : > { %8793 = vst [vmem:[#allocation80_spill] sm:$0xff] %v6504_v10  ;;  %v2368_v58 = vmul.f32 %v8698_v3, %v6484_v31  ;;  %8796 = vst [vmem:[#allocation85_spill] sm:$0xff] %v6513_v39  ;;  %v2032_v38 = vmul.f32 %v8722_v37, %v8797_v24  ;;  %v2033_v63 = vmul.f32 %v8726_v40, %v8797_v24  ;;  %v8799_v46 = vld [vmem:[#allocation37_spill] sm:$0xff] }
 0x1be   : > { %8794 = vst [vmem:[#allocation81_spill] sm:$0xff] %v6507_v12  ;;  %8795 = vst [vmem:[#allocation82_spill] sm:$0xff] %v6509_v8  ;;  %v2369_v9 = vmul.f32 %v8699_v1, %v6484_v31  ;;  %3318 = vadd.xlane.f32.xlu0 %v3317_v26  ;;  %v1733_v32 = vadd.f32 %v1732_v4, %v1604_v23  ;;  %v2296_v35 = vmul.f32 %v8698_v3, %v8798_v30  ;;  %v8800_v23 = vld [vmem:[#allocation38_spill] sm:$0xff]  ;;  %v8801_v4 = vld [vmem:[#allocation39_spill] sm:$0xff]  ;;  %v6546_v10 = vpop.permute.xlu1 %1418 }
 0x1bf   : > { %v2297_v27 = vmul.f32 %v8699_v1, %v8798_v30  ;;  %v1726_v53 = vadd.f32 %v1725_v52, %v1598_v62  ;;  %v2034_v44 = vmul.f32 %v8787_v33, %v8797_v24  ;;  %v2035_v22 = vmul.f32 %v8789_v54, %v8797_v24  ;;  %8802 = vst [vmem:[#allocation205_spill] sm:$0xff] %v6546_v10 }
 0x1c0   : > { %v2298_v5 = vmul.f32 %v8700_v47, %v8798_v30  ;;  %v2036_v19 = vmul.f32 %v8799_v46, %v8797_v24  ;;  %v2037_v11 = vmul.f32 %v8800_v23, %v8797_v24  ;;  %v2299_v26 = vmul.f32 %v8701_v6, %v8798_v30 }
 0x1c1   : > { %v2300_v62 = vmul.f32 %v8702_v14, %v8798_v30  ;;  %v1734_v52 = vadd.f32 %v1733_v32, %v1605_v18  ;;  %v2038_v48 = vmul.f32 %v8801_v4, %v8797_v24  ;;  %v2301_v8 = vmul.f32 %v8703_v60, %v8798_v30  ;;  %v8810_v60 = vld [vmem:[#allocation111_spill] sm:$0xff] }
 0x1c2   : > { %v2302_v12 = vmul.f32 %v8704_v20, %v8798_v30  ;;  %1800 = vadd.xlane.f32.xlu0 %v1799_v17  ;;  %v2303_v16 = vmul.f32 %v8706_v45, %v8798_v30  ;;  %v2424_v28 = vadd.f32 %v2296_v35, %v2032_v38  ;;  %v2425_v50 = vadd.f32 %v2297_v27, %v2033_v63  ;;  %v8805_v38 = vld [vmem:[#allocation49_spill] sm:$0xff]  ;;  %v8807_v45 = vld [vmem:[#allocation50_spill] sm:$0xff] }
 0x1c3   : > { %v2426_v55 = vadd.f32 %v2298_v5, %v2034_v44  ;;  %v2688_v18 = vmul.f32 %v8716_v2, %v8803_v43  ;;  %v2689_v32 = vmul.f32 %v8717_v0, %v8803_v43  ;;  %v2690_v29 = vmul.f32 %v8719_v51, %v8803_v43 }
 0x1c4   : > { %v2691_v17 = vmul.f32 %v8720_v7, %v8803_v43  ;;  %v2427_v42 = vadd.f32 %v2299_v26, %v2035_v22  ;;  %v2428_v10 = vadd.f32 %v2300_v62, %v2036_v19  ;;  %v2692_v30 = vmul.f32 %v8804_v36, %v8803_v43  ;;  %v8808_v7 = vld [vmem:[#allocation54_spill] sm:$0xff]  ;;  %v6568_v26 = vpop.permute.xlu1 %2577 }
 0x1c5   : > { %v2693_v63 = vmul.f32 %v8805_v38, %v8803_v43  ;;  %v2429_v35 = vadd.f32 %v2301_v8, %v2037_v11  ;;  %v2816_v27 = vadd.f32 %v2688_v18, %v2424_v28  ;;  %v2817_v44 = vadd.f32 %v2689_v32, %v2425_v50  ;;  %8809 = vst [vmem:[#allocation88_spill] sm:$0xff] %v6568_v26 }
 0x1c6   : > { %v2818_v5 = vadd.f32 %v2690_v29, %v2426_v55  ;;  %v2039_v34 = vmul.f32 %v8806_v25, %v8797_v24  ;;  %v2694_v20 = vmul.f32 %v8807_v45, %v8803_v43  ;;  %v2695_v22 = vmul.f32 %v8808_v7, %v8803_v43 }
 0x1c7   : > { %v2819_v19 = vadd.f32 %v2691_v17, %v2427_v42  ;;  %v2820_v62 = vadd.f32 %v2692_v30, %v2428_v10  ;;  %v2821_v36 = vadd.f32 %v2693_v63, %v2429_v35  ;;  %v3008_v38 = vadd.f32 %v8810_v60, %v2816_v27  ;;  %v8813_v42 = vld [vmem:[#allocation168_spill] sm:$0xff]  ;;  %v8815_v10 = vld [vmem:[#allocation169_spill] sm:$0xff] }
 0x1c8   : > { %v3009_v28 = vadd.f32 %v8810_v60, %v2817_v44  ;;  %v6574_v55 = vmul.f32 %v8700_v47, %v6484_v31  ;;  %v6578_v50 = vmul.f32 %v8701_v6, %v6484_v31  ;;  %v2430_v29 = vadd.f32 %v2302_v12, %v2038_v48 }
 0x1c9   : > { %v3010_v43 = vadd.f32 %v8810_v60, %v2818_v5  ;;  %v6582_v8 = vadd.f32 %v2368_v58, %v8813_v42  ;;  %v6585_v24 = vadd.f32 %v2369_v9, %v8815_v10  ;;  %v1735_v11 = vadd.f32 %v1734_v52, %v1606_v61  ;;  %v8818_v58 = vld [vmem:[#allocation23_spill] sm:$0xff]  ;;  %v8820_v61 = vld [vmem:[#allocation24_spill] sm:$0xff] }
 0x1ca   : > { %8811 = vst [vmem:[#allocation180_spill] sm:$0xff] %v6574_v55  ;;  %8812 = vst [vmem:[#allocation181_spill] sm:$0xff] %v6578_v50  ;;  %v2431_v18 = vadd.f32 %v2303_v16, %v2039_v34  ;;  %v2822_v32 = vadd.f32 %v2694_v20, %v2430_v29  ;;  %v3011_v17 = vadd.f32 %v8810_v60, %v2819_v19  ;;  %v3136_v30 = vmax.f32 %v3008_v38, 0.0  ;;  %v6600_v20 = vpop.permute.xlu1 %2581  ;;  %v8826_v38 = vld [vmem:[#allocation10_spill] sm:$0xff]  ;;  %v8827_v19 = vld [vmem:[#allocation11_spill] sm:$0xff] }
 0x1cb   : > { %8814 = vst [vmem:[#allocation182_spill] sm:$0xff] %v6582_v8  ;;  %8816 = vst [vmem:[#allocation183_spill] sm:$0xff] %v6585_v24  ;;  %v3137_v63 = vmax.f32 %v3009_v28, 0.0  ;;  %v8817_v35 = vmax.f32 %v6444_v59, 0.0  ;;  %v3012_v12 = vadd.f32 %v8810_v60, %v2820_v62  ;;  %v3013_v48 = vadd.f32 %v8810_v60, %v2821_v36  ;;  %v8825_v36 = vld [vmem:[#allocation97_spill] sm:$0xff] }
 0x1cc   : > { %v2823_v44 = vadd.f32 %v2695_v22, %v2431_v18  ;;  %v6594_v5 = vmul.f32 %v8818_v58, %v6513_v39  ;;  %v6598_v34 = vmul.f32 %v8820_v61, %v6513_v39  ;;  %8822 = vst [vmem:[#allocation27_spill] sm:$0xff] %v6600_v20  ;;  %v3138_v16 = vmax.f32 %v3010_v43, 0.0  ;;  %v8828_v43 = vld [vmem:[#allocation12_spill] sm:$0xff]  ;;  %v8831_v24 = vld [vmem:[#allocation193_spill] sm:$0xff] }
 0x1cd   : > { %v1727_v27 = vadd.f32 %v1726_v53, %v8817_v35  ;;  %v3266_v9 = vadd.f32 %v3137_v63, %v3136_v30  ;;  %v6604_v59 = vmul.f32 %v8671_v41, %v6513_v39  ;;  %v8824_v53 = vmax.f32 %v6496_v49, 0.0  ;;  %v8829_v49 = vld [vmem:[#allocation112_spill] sm:$0xff]  ;;  %v8836_v50 = vld [vmem:[#allocation197_spill] sm:$0xff] }
 0x1ce   : > { %8819 = vst [vmem:[#allocation141_spill] sm:$0xff] %v6594_v5  ;;  %8821 = vst [vmem:[#allocation187_spill] sm:$0xff] %v6598_v34  ;;  %v500_v22 = vmul.f32 %v8826_v38, %v8825_v36  ;;  %v501_v62 = vmul.f32 %v8827_v19, %v8825_v36  ;;  %v3014_v28 = vadd.f32 %v8810_v60, %v2822_v32  ;;  %v3139_v29 = vmax.f32 %v3011_v17, 0.0 }
 0x1cf   : > { %8823 = vst [vmem:[#allocation170_spill] sm:$0xff] %v6604_v59  ;;  %v1736_v52 = vadd.f32 %v1735_v11, %v8824_v53  ;;  %v3267_v42 = vadd.f32 %v3266_v9, %v3138_v16  ;;  %v502_v10 = vmul.f32 %v8828_v43, %v8825_v36  ;;  %v3015_v18 = vadd.f32 %v8810_v60, %v2823_v44  ;;  %v8830_v53 = vld [vmem:[#allocation2_spill] sm:$0xff]  ;;  %v8832_v16 = vld [vmem:[#allocation13_spill] sm:$0xff]  ;;  %v8833_v9 = vld [vmem:[#allocation59_spill] sm:$0xff] }
 0x1d0   : > { %1728 = vadd.xlane.f32.xlu1 %v1727_v27  ;;  %v3140_v30 = vmax.f32 %v3012_v12, 0.0  ;;  %v3141_v63 = vmax.f32 %v3013_v48, 0.0  ;;  %v1152_v11 = vmul.f32 %v8818_v58, %v8829_v49  ;;  %v890_v8 = vadd.f32 %v8831_v24, %v8830_v53  ;;  %v8834_v60 = vld [vmem:[#allocation194_spill] sm:$0xff]  ;;  %v8835_v12 = vld [vmem:[#allocation3_spill] sm:$0xff] }
 0x1d1   : > { %v3268_v35 = vadd.f32 %v3267_v42, %v3139_v29  ;;  %v1153_v32 = vmul.f32 %v8820_v61, %v8829_v49  ;;  %v1154_v17 = vmul.f32 %v8671_v41, %v8829_v49  ;;  %v503_v27 = vmul.f32 %v8832_v16, %v8825_v36  ;;  %v6630_v29 = vpop.permute.xlu1 %2965  ;;  %v8838_v24 = vld [vmem:[#allocation218_spill] sm:$0xff]  ;;  %v8839_v59 = vld [vmem:[#allocation107_spill] sm:$0xff] }
 0x1d2   : > { %v891_v44 = vadd.f32 %v8834_v60, %v8833_v9  ;;  %v892_v48 = vadd.f32 %v8835_v12, %v500_v22  ;;  %v893_v55 = vadd.f32 %v8836_v50, %v501_v62  ;;  %8837 = vst [vmem:[#allocation171_spill] sm:$0xff] %v6630_v29  ;;  %v894_v53 = vadd.f32 %v8838_v24, %v502_v10  ;;  %v8840_v22 = vld [vmem:[#allocation62_spill] sm:$0xff]  ;;  %v8842_v10 = vld [vmem:[#allocation20_spill] sm:$0xff]  ;;  %v8843_v24 = vld [vmem:[#allocation161_spill] sm:$0xff] }
 0x1d3   : > { %v3269_v42 = vadd.f32 %v3268_v35, %v3140_v30  ;;  %v1155_v31 = vmul.f32 %v8672_v21, %v8829_v49  ;;  %v1280_v34 = vadd.f32 %v1152_v11, %v8839_v59  ;;  %v1156_v36 = vmul.f32 %v8673_v13, %v8829_v49  ;;  %v8841_v35 = vld [vmem:[#allocation70_spill] sm:$0xff] }
 0x1d4   : > { %1737 = vadd.xlane.f32.xlu1 %v1736_v52  ;;  %v1157_v9 = vmul.f32 %v8674_v57, %v8829_v49  ;;  %v1158_v50 = vmul.f32 %v8675_v15, %v8829_v49  ;;  %v1281_v62 = vadd.f32 %v1153_v32, %v8840_v22  ;;  %v767_v60 = vmul.f32 %v8842_v10, %v8841_v35 }
 0x1d5   : > { %v3270_v30 = vadd.f32 %v3269_v42, %v3141_v63  ;;  %v1282_v12 = vadd.f32 %v1154_v17, %v890_v8  ;;  %v1488_v5 = vadd.f32 %v8843_v24, %v1280_v34  ;;  %v6648_v59 = vmul.f32 %v8716_v2, %v6568_v26  ;;  %v6658_v35 = vpop.permute.xlu1 %1925 }
 0x1d6   : > { %v3142_v52 = vmax.f32 %v3014_v28, 0.0  ;;  %v3143_v11 = vmax.f32 %v3015_v18, 0.0  ;;  %v1489_v39 = vadd.f32 %v8843_v24, %v1281_v62  ;;  %v895_v29 = vadd.f32 %v767_v60, %v503_v27  ;;  %8846 = vst [vmem:[#allocation174_spill] sm:$0xff] %v6658_v35 }
 0x1d7   : > { %8844 = vst [vmem:[#allocation172_spill] sm:$0xff] %v6648_v59  ;;  %v1159_v15 = vmul.f32 %v8678_v56, %v8829_v49  ;;  %v1283_v32 = vadd.f32 %v1155_v31, %v891_v44  ;;  %v1490_v63 = vadd.f32 %v8843_v24, %v1282_v12  ;;  %v1284_v22 = vadd.f32 %v1156_v36, %v892_v48 }
 0x1d8   : > { %v3271_v42 = vadd.f32 %v3270_v30, %v3142_v52  ;;  %v1285_v8 = vadd.f32 %v1157_v9, %v893_v55  ;;  %v1286_v17 = vadd.f32 %v1158_v50, %v894_v53  ;;  %v6656_v34 = vmul.f32 %v8717_v0, %v6568_v26 }
 0x1d9   : > { %v1491_v28 = vadd.f32 %v8843_v24, %v1283_v32  ;;  %v1616_v18 = vmax.f32 %v1488_v5, 0.0  ;;  %v1617_v27 = vmax.f32 %v1489_v39, 0.0  ;;  %v1492_v49 = vadd.f32 %v8843_v24, %v1284_v22 }
 0x1da   : > { %8845 = vst [vmem:[#allocation173_spill] sm:$0xff] %v6656_v34  ;;  %v3272_v62 = vadd.f32 %v3271_v42, %v3143_v11  ;;  %v1493_v31 = vadd.f32 %v8843_v24, %v1285_v8  ;;  %v1494_v44 = vadd.f32 %v8843_v24, %v1286_v17  ;;  %v6666_v55 = vmul.f32 %v8719_v51, %v6568_v26  ;;  %v8854_v8 = vld [vmem:[#allocation21_spill] sm:$0xff] }
 0x1db   : > { %v6670_v48 = vmul.f32 %v8716_v2, %v6600_v20  ;;  %v1618_v53 = vmax.f32 %v1490_v63, 0.0  ;;  %v1748_v36 = vadd.f32 %v1617_v27, %v1616_v18  ;;  %v6674_v39 = vmul.f32 %v8717_v0, %v6600_v20 }
 0x1dc   : > { %8847 = vst [vmem:[#allocation177_spill] sm:$0xff] %v6666_v55  ;;  %v6678_v5 = vmul.f32 %v8719_v51, %v6600_v20  ;;  %v6682_v9 = vmul.f32 %v8722_v37, %v6658_v35  ;;  %3273 = vadd.xlane.f32.xlu1 %v3272_v62  ;;  %v1287_v50 = vadd.f32 %v1159_v15, %v895_v29  ;;  %v1619_v12 = vmax.f32 %v1491_v28, 0.0 }
 0x1dd   : > { %8848 = vst [vmem:[#allocation178_spill] sm:$0xff] %v6670_v48  ;;  %8849 = vst [vmem:[#allocation120_spill] sm:$0xff] %v6674_v39  ;;  %v6686_v30 = vmul.f32 %v8726_v40, %v6658_v35  ;;  %v6690_v60 = vmul.f32 %v8787_v33, %v6658_v35  ;;  %v1749_v52 = vadd.f32 %v1748_v36, %v1618_v53  ;;  %v1620_v32 = vmax.f32 %v1492_v49, 0.0  ;;  %v8855_v49 = vld [vmem:[#allocation91_spill] sm:$0xff]  ;;  %v8858_v48 = vld [vmem:[#allocation58_spill] sm:$0xff] }
 0x1de   : > { %8850 = vst [vmem:[#allocation83_spill] sm:$0xff] %v6678_v5  ;;  %8851 = vst [vmem:[#allocation121_spill] sm:$0xff] %v6682_v9  ;;  %v1495_v11 = vadd.f32 %v8843_v24, %v1287_v50  ;;  %v1621_v63 = vmax.f32 %v1493_v31, 0.0  ;;  %v1622_v42 = vmax.f32 %v1494_v44, 0.0  ;;  %v2048_v17 = vmul.f32 %v8722_v37, %v8854_v8  ;;  %v8857_v5 = vld [vmem:[#allocation57_spill] sm:$0xff] }
 0x1df   : > { %8852 = vst [vmem:[#allocation87_spill] sm:$0xff] %v6686_v30  ;;  %8853 = vst [vmem:[#allocation134_spill] sm:$0xff] %v6690_v60  ;;  %v1750_v22 = vadd.f32 %v1749_v52, %v1619_v12  ;;  %v2049_v15 = vmul.f32 %v8726_v40, %v8854_v8  ;;  %v2050_v29 = vmul.f32 %v8787_v33, %v8854_v8 }
 0x1e0   : > { %v2051_v18 = vmul.f32 %v8789_v54, %v8854_v8  ;;  %v2052_v28 = vmul.f32 %v8799_v46, %v8854_v8  ;;  %v2053_v24 = vmul.f32 %v8800_v23, %v8854_v8  ;;  %v2054_v27 = vmul.f32 %v8801_v4, %v8854_v8 }
 0x1e1   : > { %v1751_v62 = vadd.f32 %v1750_v22, %v1620_v32  ;;  %v2312_v31 = vmul.f32 %v8698_v3, %v8855_v49  ;;  %v2313_v44 = vmul.f32 %v8699_v1, %v8855_v49  ;;  %v2314_v53 = vmul.f32 %v8700_v47, %v8855_v49  ;;  %v8856_v22 = vld [vmem:[#allocation56_spill] sm:$0xff]  ;;  %v8859_v47 = vld [vmem:[#allocation6_spill] sm:$0xff] }
 0x1e2   : > { %v1623_v36 = vmax.f32 %v1495_v11, 0.0  ;;  %v2055_v50 = vmul.f32 %v8806_v25, %v8854_v8  ;;  %v2315_v12 = vmul.f32 %v8701_v6, %v8855_v49  ;;  %v2316_v52 = vmul.f32 %v8702_v14, %v8855_v49 }
 0x1e3   : > { %v1752_v32 = vadd.f32 %v1751_v62, %v1621_v63  ;;  %v2317_v60 = vmul.f32 %v8856_v22, %v8855_v49  ;;  %v2318_v39 = vmul.f32 %v8857_v5, %v8855_v49  ;;  %v2319_v20 = vmul.f32 %v8858_v48, %v8855_v49 }
 0x1e4   : > { %v2440_v11 = vadd.f32 %v2312_v31, %v2048_v17  ;;  %v2441_v55 = vadd.f32 %v2313_v44, %v2049_v15  ;;  %v2442_v34 = vadd.f32 %v2314_v53, %v2050_v29  ;;  %v2443_v8 = vadd.f32 %v2315_v12, %v2051_v18  ;;  %v8860_v17 = vld [vmem:[#allocation45_spill] sm:$0xff]  ;;  %v8861_v29 = vld [vmem:[#allocation48_spill] sm:$0xff] }
 0x1e5   : > { %v1753_v59 = vadd.f32 %v1752_v32, %v1622_v42  ;;  %v2444_v26 = vadd.f32 %v2316_v52, %v2052_v28  ;;  %v2445_v30 = vadd.f32 %v2317_v60, %v2053_v24  ;;  %v2446_v9 = vadd.f32 %v2318_v39, %v2054_v27  ;;  %v8862_v60 = vld [vmem:[#allocation49_spill] sm:$0xff] }
 0x1e6   : > { %v2447_v6 = vadd.f32 %v2319_v20, %v2055_v50  ;;  %v2704_v63 = vmul.f32 %v8716_v2, %v8859_v47  ;;  %v2705_v62 = vmul.f32 %v8717_v0, %v8859_v47  ;;  %v2706_v1 = vmul.f32 %v8719_v51, %v8859_v47 }
 0x1e7   : > { %v1754_v3 = vadd.f32 %v1753_v59, %v1623_v36  ;;  %v2707_v15 = vmul.f32 %v8860_v17, %v8859_v47  ;;  %v2708_v42 = vmul.f32 %v8861_v29, %v8859_v47  ;;  %v2709_v39 = vmul.f32 %v8862_v60, %v8859_v47  ;;  %v8863_v36 = vld [vmem:[#allocation139_spill] sm:$0xff] }
 0x1e8   : > { %v2710_v20 = vmul.f32 %v8807_v45, %v8859_v47  ;;  %v2711_v18 = vmul.f32 %v8808_v7, %v8859_v47  ;;  %v2832_v28 = vadd.f32 %v2704_v63, %v2440_v11  ;;  %v2833_v24 = vadd.f32 %v2705_v62, %v2441_v55  ;;  %v8865_v55 = vld [vmem:[#allocation63_spill] sm:$0xff] }
 0x1e9   : > { %1755 = vadd.xlane.f32.xlu1 %v1754_v3  ;;  %v2834_v27 = vadd.f32 %v2706_v1, %v2442_v34  ;;  %v2835_v59 = vadd.f32 %v2707_v15, %v2443_v8  ;;  %v2836_v49 = vadd.f32 %v2708_v42, %v2444_v26  ;;  %v2837_v31 = vadd.f32 %v2709_v39, %v2445_v30 }
 0x1ea   : > { %v2838_v44 = vadd.f32 %v2710_v20, %v2446_v9  ;;  %v2839_v53 = vadd.f32 %v2711_v18, %v2447_v6  ;;  %v3024_v50 = vadd.f32 %v8863_v36, %v2832_v28  ;;  %v3025_v12 = vadd.f32 %v8863_v36, %v2833_v24  ;;  %v8868_v20 = vld [vmem:[#allocation73_spill] sm:$0xff] }
 0x1eb   : > { %v3026_v52 = vadd.f32 %v8863_v36, %v2834_v27  ;;  %v3027_v32 = vadd.f32 %v8863_v36, %v2835_v59  ;;  %v3028_v51 = vadd.f32 %v8863_v36, %v2836_v49  ;;  %v3029_v47 = vadd.f32 %v8863_v36, %v2837_v31  ;;  %v8869_v49 = vld [vmem:[#allocation86_spill] sm:$0xff] }
 0x1ec   : > { %v3030_v3 = vadd.f32 %v8863_v36, %v2838_v44  ;;  %v3031_v1 = vadd.f32 %v8863_v36, %v2839_v53  ;;  %v3152_v26 = vmax.f32 %v3024_v50, 0.0  ;;  %v3153_v34 = vmax.f32 %v3025_v12, 0.0  ;;  %v8870_v31 = vld [vmem:[#allocation14_spill] sm:$0xff]  ;;  %v8871_v44 = vld [vmem:[#allocation15_spill] sm:$0xff]  ;;  %v8872_v36 = vld [vmem:[#allocation17_spill] sm:$0xff] }
 0x1ed   : > { %v6751_v6 = vmul.f32 %v8789_v54, %v6658_v35  ;;  %v6755_v9 = vmul.f32 %v8722_v37, %v8865_v55  ;;  %v6759_v30 = vmul.f32 %v8726_v40, %v8865_v55  ;;  %v3154_v11 = vmax.f32 %v3026_v52, 0.0  ;;  %v8873_v12 = vld [vmem:[#allocation18_spill] sm:$0xff] }
 0x1ee   : > { %v3155_v8 = vmax.f32 %v3027_v32, 0.0  ;;  %v3156_v63 = vmax.f32 %v3028_v51, 0.0  ;;  %v3157_v62 = vmax.f32 %v3029_v47, 0.0  ;;  %v3284_v15 = vadd.f32 %v3153_v34, %v3152_v26  ;;  %v8874_v32 = vld [vmem:[#allocation19_spill] sm:$0xff] }
 0x1ef   : > { %8864 = vst [vmem:[#allocation89_spill] sm:$0xff] %v6751_v6  ;;  %8866 = vst [vmem:[#allocation135_spill] sm:$0xff] %v6755_v9  ;;  %v3158_v42 = vmax.f32 %v3030_v3, 0.0  ;;  %v3159_v39 = vmax.f32 %v3031_v1, 0.0  ;;  %v516_v18 = vmul.f32 %v8826_v38, %v8868_v20  ;;  %v517_v28 = vmul.f32 %v8827_v19, %v8868_v20  ;;  %v8875_v26 = vld [vmem:[#allocation67_spill] sm:$0xff] }
 0x1f0   : > { %8867 = vst [vmem:[#allocation90_spill] sm:$0xff] %v6759_v30  ;;  %v3285_v24 = vadd.f32 %v3284_v15, %v3154_v11  ;;  %v518_v27 = vmul.f32 %v8828_v43, %v8868_v20  ;;  %v519_v59 = vmul.f32 %v8832_v16, %v8868_v20  ;;  %v778_v51 = vmul.f32 %v8870_v31, %v8869_v49  ;;  %v8876_v11 = vld [vmem:[#allocation131_spill] sm:$0xff]  ;;  %v8877_v20 = vld [vmem:[#allocation117_spill] sm:$0xff] }
 0x1f1   : > { %v779_v53 = vmul.f32 %v8871_v44, %v8869_v49  ;;  %v780_v50 = vmul.f32 %v8872_v36, %v8869_v49  ;;  %v781_v52 = vmul.f32 %v8873_v12, %v8869_v49  ;;  %v782_v47 = vmul.f32 %v8874_v32, %v8869_v49 }
 0x1f2   : > { %v3286_v3 = vadd.f32 %v3285_v24, %v3155_v8  ;;  %v783_v1 = vmul.f32 %v8842_v10, %v8869_v49  ;;  %v906_v34 = vadd.f32 %v778_v51, %v8875_v26  ;;  %v1168_v15 = vmul.f32 %v8818_v58, %v8876_v11  ;;  %v8881_v58 = vld [vmem:[#allocation60_spill] sm:$0xff] }
 0x1f3   : > { %v907_v55 = vadd.f32 %v779_v53, %v8877_v20  ;;  %v908_v6 = vadd.f32 %v780_v50, %v516_v18  ;;  %v909_v35 = vadd.f32 %v781_v52, %v517_v28  ;;  %v910_v30 = vadd.f32 %v782_v47, %v518_v27  ;;  %v8878_v18 = vld [vmem:[#allocation30_spill] sm:$0xff] }
 0x1f4   : > { %v3287_v9 = vadd.f32 %v3286_v3, %v3156_v63  ;;  %v911_v44 = vadd.f32 %v783_v1, %v519_v59  ;;  %v1169_v31 = vmul.f32 %v8820_v61, %v8876_v11  ;;  %v1170_v8 = vmul.f32 %v8671_v41, %v8876_v11  ;;  %v8879_v59 = vld [vmem:[#allocation7_spill] sm:$0xff]  ;;  %v8880_v50 = vld [vmem:[#allocation206_spill] sm:$0xff] }
 0x1f5   : > { %v1171_v24 = vmul.f32 %v8672_v21, %v8876_v11  ;;  %v1172_v49 = vmul.f32 %v8673_v13, %v8876_v11  ;;  %v1173_v51 = vmul.f32 %v8674_v57, %v8876_v11  ;;  %v1174_v28 = vmul.f32 %v8878_v18, %v8876_v11 }
 0x1f6   : > { %v3288_v63 = vadd.f32 %v3287_v9, %v3157_v62  ;;  %v1175_v27 = vmul.f32 %v8678_v56, %v8876_v11  ;;  %v1296_v53 = vadd.f32 %v1168_v15, %v8879_v59  ;;  %v1297_v52 = vadd.f32 %v1169_v31, %v8880_v50 }
 0x1f7   : > { %v1298_v47 = vadd.f32 %v1170_v8, %v906_v34  ;;  %v1299_v3 = vadd.f32 %v1171_v24, %v907_v55  ;;  %v1300_v1 = vadd.f32 %v1172_v49, %v908_v6  ;;  %v1301_v26 = vadd.f32 %v1173_v51, %v909_v35 }
 0x1f8   : > { %v3289_v20 = vadd.f32 %v3288_v63, %v3158_v42  ;;  %v1302_v41 = vadd.f32 %v1174_v28, %v910_v30  ;;  %v1303_v61 = vadd.f32 %v1175_v27, %v911_v44  ;;  %v1504_v57 = vadd.f32 %v8881_v58, %v1296_v53  ;;  %v8882_v28 = vld [vmem:[#allocation41_spill] sm:$0xff] }
 0x1f9   : > { %v1505_v13 = vadd.f32 %v8881_v58, %v1297_v52  ;;  %v1506_v9 = vadd.f32 %v8881_v58, %v1298_v47  ;;  %v1507_v62 = vadd.f32 %v8881_v58, %v1299_v3  ;;  %v1508_v11 = vadd.f32 %v8881_v58, %v1300_v1  ;;  %v8884_v47 = vld [vmem:[#allocation4_spill] sm:$0xff]  ;;  %v8885_v1 = vld [vmem:[#allocation119_spill] sm:$0xff] }
 0x1fa   : > { %v3290_v15 = vadd.f32 %v3289_v20, %v3159_v39  ;;  %v1509_v31 = vadd.f32 %v8881_v58, %v1301_v26  ;;  %v1510_v55 = vadd.f32 %v8881_v58, %v1302_v41  ;;  %v1511_v35 = vadd.f32 %v8881_v58, %v1303_v61  ;;  %v8883_v61 = vld [vmem:[#allocation155_spill] sm:$0xff] }
 0x1fb   : > { %v1632_v6 = vmax.f32 %v1504_v57, 0.0  ;;  %v1633_v30 = vmax.f32 %v1505_v13, 0.0  ;;  %v1634_v42 = vmax.f32 %v1506_v9, 0.0  ;;  %v1635_v44 = vmax.f32 %v1507_v62, 0.0  ;;  %v8886_v9 = vld [vmem:[#allocation176_spill] sm:$0xff] }
 0x1fc   : > { %3291 = vadd.xlane.f32.xlu1 %v3290_v15  ;;  %v1636_v34 = vmax.f32 %v1508_v11, 0.0  ;;  %v1637_v8 = vmax.f32 %v1509_v31, 0.0  ;;  %v1638_v24 = vmax.f32 %v1510_v55, 0.0  ;;  %v1639_v49 = vmax.f32 %v1511_v35, 0.0 }
 0x1fd   : > { %v1766_v51 = vadd.f32 %v1633_v30, %v1632_v6  ;;  %v2090_v63 = vmul.f32 %v8787_v33, %v8882_v28  ;;  %v2091_v39 = vmul.f32 %v8789_v54, %v8882_v28  ;;  %v2092_v41 = vmul.f32 %v8799_v46, %v8882_v28 }
 0x1fe   : > { %v2093_v13 = vmul.f32 %v8800_v23, %v8882_v28  ;;  %v2094_v57 = vmul.f32 %v8801_v4, %v8882_v28  ;;  %v2095_v58 = vmul.f32 %v8806_v25, %v8882_v28  ;;  %v2356_v27 = vmul.f32 %v8702_v14, %v8883_v61  ;;  %v8887_v28 = vld [vmem:[#allocation165_spill] sm:$0xff] }
 0x1ff   : > { %v1767_v59 = vadd.f32 %v1766_v51, %v1634_v42  ;;  %v2357_v53 = vmul.f32 %v8856_v22, %v8883_v61  ;;  %v2358_v50 = vmul.f32 %v8857_v5, %v8883_v61  ;;  %v2359_v52 = vmul.f32 %v8858_v48, %v8883_v61 }
 0x200   : > { %v2482_v3 = vadd.f32 %v8884_v47, %v2090_v63  ;;  %v2483_v26 = vadd.f32 %v8885_v1, %v2091_v39  ;;  %v2484_v20 = vadd.f32 %v2356_v27, %v2092_v41  ;;  %v2747_v62 = vmul.f32 %v8860_v17, %v8886_v9  ;;  %v8888_v63 = vld [vmem:[#allocation124_spill] sm:$0xff]  ;;  %v8890_v41 = vld [vmem:[#allocation125_spill] sm:$0xff]  ;;  %v8892_v47 = vld [vmem:[#allocation171_spill] sm:$0xff] }
 0x201   : > { %v1768_v11 = vadd.f32 %v1767_v59, %v1635_v44  ;;  %v2485_v15 = vadd.f32 %v2357_v53, %v2093_v13  ;;  %v2486_v31 = vadd.f32 %v2358_v50, %v2094_v57  ;;  %v2487_v55 = vadd.f32 %v2359_v52, %v2095_v58  ;;  %v8889_v44 = vld [vmem:[#allocation204_spill] sm:$0xff]  ;;  %v8891_v57 = vld [vmem:[#allocation127_spill] sm:$0xff] }
 0x202   : > { %v2748_v35 = vmul.f32 %v8861_v29, %v8886_v9  ;;  %v2749_v6 = vmul.f32 %v8862_v60, %v8886_v9  ;;  %v2750_v30 = vmul.f32 %v8807_v45, %v8886_v9  ;;  %v2751_v42 = vmul.f32 %v8808_v7, %v8886_v9 }
 0x203   : > { %v1769_v51 = vadd.f32 %v1768_v11, %v1636_v34  ;;  %v2872_v39 = vadd.f32 %v8888_v63, %v8887_v28  ;;  %v2873_v13 = vadd.f32 %v8890_v41, %v8889_v44  ;;  %v2874_v58 = vadd.f32 %v8891_v57, %v2482_v3 }
 0x204   : > { %v2875_v61 = vadd.f32 %v2747_v62, %v2483_v26  ;;  %v2876_v27 = vadd.f32 %v2748_v35, %v2484_v20  ;;  %v2877_v59 = vadd.f32 %v2749_v6, %v2485_v15  ;;  %v2878_v53 = vadd.f32 %v2750_v30, %v2486_v31 }
 0x205   : > { %v1770_v50 = vadd.f32 %v1769_v51, %v1637_v8  ;;  %v2879_v52 = vadd.f32 %v2751_v42, %v2487_v55  ;;  %v3064_v1 = vadd.f32 %v8892_v47, %v2872_v39  ;;  %v3065_v56 = vadd.f32 %v8892_v47, %v2873_v13  ;;  %v8893_v51 = vld [vmem:[#allocation71_spill] sm:$0xff] }
 0x206   : > { %v3066_v34 = vadd.f32 %v8892_v47, %v2874_v58  ;;  %v3067_v9 = vadd.f32 %v8892_v47, %v2875_v61  ;;  %v3068_v11 = vadd.f32 %v8892_v47, %v2876_v27  ;;  %v3069_v28 = vadd.f32 %v8892_v47, %v2877_v59  ;;  %v8894_v61 = vld [vmem:[#allocation72_spill] sm:$0xff]  ;;  %v8895_v27 = vld [vmem:[#allocation47_spill] sm:$0xff] }
 0x207   : > { %v1771_v63 = vadd.f32 %v1770_v50, %v1638_v24  ;;  %v3070_v3 = vadd.f32 %v8892_v47, %v2878_v53  ;;  %v3071_v26 = vadd.f32 %v8892_v47, %v2879_v52  ;;  %v3192_v20 = vmax.f32 %v3064_v1, 0.0  ;;  %v8896_v53 = vld [vmem:[#allocation51_spill] sm:$0xff]  ;;  %v8897_v52 = vld [vmem:[#allocation52_spill] sm:$0xff]  ;;  %v8898_v1 = vld [vmem:[#allocation53_spill] sm:$0xff] }
 0x208   : > { %v3193_v8 = vmax.f32 %v3065_v56, 0.0  ;;  %v3194_v62 = vmax.f32 %v3066_v34, 0.0  ;;  %v3195_v15 = vmax.f32 %v3067_v9, 0.0  ;;  %v3196_v31 = vmax.f32 %v3068_v11, 0.0 }
 0x209   : > { %v1772_v55 = vadd.f32 %v1771_v63, %v1639_v49  ;;  %v3197_v35 = vmax.f32 %v3069_v28, 0.0  ;;  %v3198_v6 = vmax.f32 %v3070_v3, 0.0  ;;  %v3199_v30 = vmax.f32 %v3071_v26, 0.0 }
 0x20a   : > { %v3329_v42 = vadd.f32 %v3193_v8, %v3192_v20  ;;  %v2064_v39 = vmul.f32 %v8722_v37, %v8893_v51  ;;  %v2065_v24 = vmul.f32 %v8726_v40, %v8893_v51  ;;  %v2066_v44 = vmul.f32 %v8787_v33, %v8893_v51 }
 0x20b   : > { %1773 = vadd.xlane.f32.xlu1 %v1772_v55  ;;  %v2067_v56 = vmul.f32 %v8789_v54, %v8893_v51  ;;  %v2068_v49 = vmul.f32 %v8799_v46, %v8893_v51  ;;  %v2069_v41 = vmul.f32 %v8800_v23, %v8893_v51  ;;  %v2070_v13 = vmul.f32 %v8801_v4, %v8893_v51 }
 0x20c   : > { %v3330_v57 = vadd.f32 %v3329_v42, %v3194_v62  ;;  %v2071_v58 = vmul.f32 %v8806_v25, %v8893_v51  ;;  %v2328_v59 = vmul.f32 %v8895_v27, %v8894_v61  ;;  %v2329_v50 = vmul.f32 %v8896_v53, %v8894_v61 }
 0x20d   : > { %v2330_v47 = vmul.f32 %v8897_v52, %v8894_v61  ;;  %v2331_v34 = vmul.f32 %v8898_v1, %v8894_v61  ;;  %v2332_v9 = vmul.f32 %v8702_v14, %v8894_v61  ;;  %v2333_v11 = vmul.f32 %v8856_v22, %v8894_v61  ;;  %v8899_v14 = vld [vmem:[#allocation162_spill] sm:$0xff] }
 0x20e   : > { %v3331_v28 = vadd.f32 %v3330_v57, %v3195_v15  ;;  %v2334_v63 = vmul.f32 %v8857_v5, %v8894_v61  ;;  %v2335_v3 = vmul.f32 %v8858_v48, %v8894_v61  ;;  %v2456_v26 = vadd.f32 %v2328_v59, %v2064_v39  ;;  %v8900_v57 = vld [vmem:[#allocation44_spill] sm:$0xff] }
 0x20f   : > { %v2457_v20 = vadd.f32 %v2329_v50, %v2065_v24  ;;  %v2458_v8 = vadd.f32 %v2330_v47, %v2066_v44  ;;  %v2459_v62 = vadd.f32 %v2331_v34, %v2067_v56  ;;  %v2460_v55 = vadd.f32 %v2332_v9, %v2068_v49  ;;  %v8901_v9 = vld [vmem:[#allocation77_spill] sm:$0xff] }
 0x210   : > { %v3332_v42 = vadd.f32 %v3331_v28, %v3196_v31  ;;  %v2461_v51 = vadd.f32 %v2333_v11, %v2069_v41  ;;  %v2462_v40 = vadd.f32 %v2334_v63, %v2070_v13  ;;  %v2463_v37 = vadd.f32 %v2335_v3, %v2071_v58 }
 0x211   : > { %v2720_v25 = vmul.f32 %v8716_v2, %v8899_v14  ;;  %v2721_v15 = vmul.f32 %v8717_v0, %v8899_v14  ;;  %v2722_v5 = vmul.f32 %v8900_v57, %v8899_v14  ;;  %v2723_v39 = vmul.f32 %v8860_v17, %v8899_v14 }
 0x212   : > { %v3333_v24 = vadd.f32 %v3332_v42, %v3197_v35  ;;  %v2724_v44 = vmul.f32 %v8861_v29, %v8899_v14  ;;  %v2725_v31 = vmul.f32 %v8862_v60, %v8899_v14  ;;  %v2726_v56 = vmul.f32 %v8807_v45, %v8899_v14 }
 0x213   : > { %v2727_v49 = vmul.f32 %v8808_v7, %v8899_v14  ;;  %v2848_v41 = vadd.f32 %v2720_v25, %v2456_v26  ;;  %v2849_v13 = vadd.f32 %v2721_v15, %v2457_v20  ;;  %v2850_v58 = vadd.f32 %v2722_v5, %v2458_v8  ;;  %v8903_v15 = vld [vmem:[#allocation8_spill] sm:$0xff] }
 0x214   : > { %v3334_v61 = vadd.f32 %v3333_v24, %v3198_v6  ;;  %v2851_v59 = vadd.f32 %v2723_v39, %v2459_v62  ;;  %v2852_v50 = vadd.f32 %v2724_v44, %v2460_v55  ;;  %v2853_v47 = vadd.f32 %v2725_v31, %v2461_v51  ;;  %v8902_v51 = vld [vmem:[#allocation16_spill] sm:$0xff]  ;;  %v8904_v44 = vld [vmem:[#allocation9_spill] sm:$0xff] }
 0x215   : > { %v2854_v35 = vadd.f32 %v2726_v56, %v2462_v40  ;;  %v2855_v34 = vadd.f32 %v2727_v49, %v2463_v37  ;;  %v3040_v11 = vadd.f32 %v8901_v9, %v2848_v41  ;;  %v3041_v28 = vadd.f32 %v8901_v9, %v2849_v13 }
 0x216   : > { %v3335_v63 = vadd.f32 %v3334_v61, %v3199_v30  ;;  %v3042_v3 = vadd.f32 %v8901_v9, %v2850_v58  ;;  %v3043_v42 = vadd.f32 %v8901_v9, %v2851_v59  ;;  %v3044_v14 = vadd.f32 %v8901_v9, %v2852_v50  ;;  %v8905_v58 = vld [vmem:[#allocation96_spill] sm:$0xff] }
 0x217   : > { %v3045_v25 = vadd.f32 %v8901_v9, %v2853_v47  ;;  %v3046_v5 = vadd.f32 %v8901_v9, %v2854_v35  ;;  %v3047_v6 = vadd.f32 %v8901_v9, %v2855_v34  ;;  %v3168_v26 = vmax.f32 %v3040_v11, 0.0  ;;  %v8906_v34 = vld [vmem:[#allocation219_spill] sm:$0xff]  ;;  %v8907_v11 = vld [vmem:[#allocation220_spill] sm:$0xff] }
 0x218   : > { %3336 = vadd.xlane.f32.xlu0 %v3335_v63  ;;  %v3169_v40 = vmax.f32 %v3041_v28, 0.0  ;;  %v3170_v37 = vmax.f32 %v3042_v3, 0.0  ;;  %v3171_v20 = vmax.f32 %v3043_v42, 0.0  ;;  %v3172_v8 = vmax.f32 %v3044_v14, 0.0  ;;  %v8908_v42 = vld [vmem:[#allocation85_spill] sm:$0xff] }
 0x219   : > { %v3173_v62 = vmax.f32 %v3045_v25, 0.0  ;;  %v3174_v30 = vmax.f32 %v3046_v5, 0.0  ;;  %v3175_v55 = vmax.f32 %v3047_v6, 0.0  ;;  %v554_v39 = vmul.f32 %v8903_v15, %v8902_v51 }
 0x21a   : > { %v3302_v24 = vadd.f32 %v3169_v40, %v3168_v26  ;;  %v555_v31 = vmul.f32 %v8904_v44, %v8902_v51  ;;  %v556_v56 = vmul.f32 %v8826_v38, %v8902_v51  ;;  %v557_v49 = vmul.f32 %v8827_v19, %v8902_v51  ;;  %v8909_v26 = vld [vmem:[#allocation28_spill] sm:$0xff] }
 0x21b   : > { %v558_v41 = vmul.f32 %v8828_v43, %v8902_v51  ;;  %v559_v13 = vmul.f32 %v8832_v16, %v8902_v51  ;;  %v820_v61 = vmul.f32 %v8872_v36, %v8905_v58  ;;  %v821_v59 = vmul.f32 %v8873_v12, %v8905_v58  ;;  %v8910_v51 = vld [vmem:[#allocation29_spill] sm:$0xff] }
 0x21c   : > { %v3303_v50 = vadd.f32 %v3302_v24, %v3170_v37  ;;  %v822_v47 = vmul.f32 %v8874_v32, %v8905_v58  ;;  %v823_v35 = vmul.f32 %v8842_v10, %v8905_v58  ;;  %v946_v9 = vadd.f32 %v8906_v34, %v554_v39  ;;  %v1434_v37 = vpop.permute.xlu0 %1433  ;;  %v8913_v58 = vld [vmem:[#allocation141_spill] sm:$0xff] }
 0x21d   : > { %v947_v28 = vadd.f32 %v8907_v11, %v555_v31  ;;  %v948_v63 = vadd.f32 %v820_v61, %v556_v56  ;;  %v949_v3 = vadd.f32 %v821_v59, %v557_v49  ;;  %v1211_v14 = vmul.f32 %v8672_v21, %v8908_v42  ;;  %v8911_v31 = vld [vmem:[#allocation31_spill] sm:$0xff]  ;;  %v8912_v49 = vld [vmem:[#allocation104_spill] sm:$0xff] }
 0x21e   : > { %v3304_v25 = vadd.f32 %v3303_v50, %v3171_v20  ;;  %v950_v5 = vadd.f32 %v822_v47, %v558_v41  ;;  %v951_v6 = vadd.f32 %v823_v35, %v559_v13  ;;  %v1212_v40 = vmul.f32 %v8909_v26, %v8908_v42  ;;  %v8914_v20 = vld [vmem:[#allocation132_spill] sm:$0xff]  ;;  %v8915_v41 = vld [vmem:[#allocation187_spill] sm:$0xff]  ;;  %v8916_v50 = vld [vmem:[#allocation170_spill] sm:$0xff] }
 0x21f   : > { %v1213_v24 = vmul.f32 %v8910_v51, %v8908_v42  ;;  %v1214_v39 = vmul.f32 %v8878_v18, %v8908_v42  ;;  %v1215_v56 = vmul.f32 %v8911_v31, %v8908_v42  ;;  %v1336_v61 = vadd.f32 %v8913_v58, %v8912_v49 }
 0x220   : > { %v3305_v59 = vadd.f32 %v3304_v25, %v3172_v8  ;;  %v1337_v13 = vadd.f32 %v8915_v41, %v8914_v20  ;;  %v1338_v47 = vadd.f32 %v8916_v50, %v946_v9  ;;  %v1339_v35 = vadd.f32 %v1211_v14, %v947_v28  ;;  %v8924_v50 = vld [vmem:[#allocation210_spill] sm:$0xff] }
 0x221   : > { %v1340_v34 = vadd.f32 %v1212_v40, %v948_v63  ;;  %v1341_v11 = vadd.f32 %v1213_v24, %v949_v3  ;;  %v1342_v44 = vadd.f32 %v1214_v39, %v950_v5  ;;  %v1343_v15 = vadd.f32 %v1215_v56, %v951_v6  ;;  %v8921_v24 = vld [vmem:[#allocation149_spill] sm:$0xff]  ;;  %v8922_v39 = vld [vmem:[#allocation23_spill] sm:$0xff] }
 0x222   : > { %v3306_v57 = vadd.f32 %v3305_v59, %v3173_v62  ;;  %v1544_v0 = vadd.f32 %v1434_v37, %v1336_v61  ;;  %v1545_v2 = vadd.f32 %v1434_v37, %v1337_v13  ;;  %v1546_v7 = vadd.f32 %v1434_v37, %v1338_v47  ;;  %v8917_v62 = vld [vmem:[#allocation64_spill] sm:$0xff] }
 0x223   : > { %v1547_v45 = vadd.f32 %v1434_v37, %v1339_v35  ;;  %v1548_v42 = vadd.f32 %v1434_v37, %v1340_v34  ;;  %v1549_v60 = vadd.f32 %v1434_v37, %v1341_v11  ;;  %v1550_v29 = vadd.f32 %v1434_v37, %v1342_v44  ;;  %v8923_v59 = vld [vmem:[#allocation208_spill] sm:$0xff] }
 0x224   : > { %v3307_v49 = vadd.f32 %v3306_v57, %v3174_v30  ;;  %v1551_v8 = vadd.f32 %v1434_v37, %v1343_v15  ;;  %v1672_v25 = vmax.f32 %v1544_v0, 0.0  ;;  %v1673_v58 = vmax.f32 %v1545_v2, 0.0  ;;  %v8918_v0 = vld [vmem:[#allocation103_spill] sm:$0xff] }
 0x225   : > { %v1674_v20 = vmax.f32 %v1546_v7, 0.0  ;;  %v1675_v41 = vmax.f32 %v1547_v45, 0.0  ;;  %v1676_v9 = vmax.f32 %v1548_v42, 0.0  ;;  %v1677_v28 = vmax.f32 %v1549_v60, 0.0  ;;  %v8919_v7 = vld [vmem:[#allocation14_spill] sm:$0xff] }
 0x226   : > { %v3308_v63 = vadd.f32 %v3307_v49, %v3175_v55  ;;  %v1678_v3 = vmax.f32 %v1550_v29, 0.0  ;;  %v1679_v14 = vmax.f32 %v1551_v8, 0.0  ;;  %v1811_v5 = vadd.f32 %v1673_v58, %v1672_v25  ;;  %v8920_v29 = vld [vmem:[#allocation15_spill] sm:$0xff]  ;;  %v8925_v49 = vld [vmem:[#allocation24_spill] sm:$0xff]  ;;  %v8926_v58 = vld [vmem:[#allocation25_spill] sm:$0xff] }
 0x227   : > { %v532_v6 = vmul.f32 %v8826_v38, %v8917_v62  ;;  %v533_v40 = vmul.f32 %v8827_v19, %v8917_v62  ;;  %v534_v57 = vmul.f32 %v8828_v43, %v8917_v62  ;;  %v535_v2 = vmul.f32 %v8832_v16, %v8917_v62 }
 0x228   : > { %3309 = vadd.xlane.f32.xlu1 %v3308_v63  ;;  %v1812_v45 = vadd.f32 %v1811_v5, %v1674_v20  ;;  %v794_v60 = vmul.f32 %v8919_v7, %v8918_v0  ;;  %v795_v30 = vmul.f32 %v8920_v29, %v8918_v0  ;;  %v796_v55 = vmul.f32 %v8872_v36, %v8918_v0 }
 0x229   : > { %v797_v15 = vmul.f32 %v8873_v12, %v8918_v0  ;;  %v798_v44 = vmul.f32 %v8874_v32, %v8918_v0  ;;  %v799_v37 = vmul.f32 %v8842_v10, %v8918_v0  ;;  %v1184_v56 = vmul.f32 %v8922_v39, %v8921_v24 }
 0x22a   : > { %v1813_v61 = vadd.f32 %v1812_v45, %v1675_v41  ;;  %v922_v13 = vadd.f32 %v794_v60, %v8923_v59  ;;  %v923_v47 = vadd.f32 %v795_v30, %v8924_v50  ;;  %v924_v35 = vadd.f32 %v796_v55, %v532_v6  ;;  %v6987_v30 = vpop.permute.xlu1 %2193  ;;  %v8930_v59 = vld [vmem:[#allocation205_spill] sm:$0xff] }
 0x22b   : > { %v925_v34 = vadd.f32 %v797_v15, %v533_v40  ;;  %v926_v11 = vadd.f32 %v798_v44, %v534_v57  ;;  %v927_v42 = vadd.f32 %v799_v37, %v535_v2  ;;  %v1185_v8 = vmul.f32 %v8925_v49, %v8921_v24  ;;  %v8927_v40 = vld [vmem:[#allocation211_spill] sm:$0xff]  ;;  %v8928_v2 = vld [vmem:[#allocation212_spill] sm:$0xff]  ;;  %8929 = vst [vmem:[#allocation113_spill] sm:$0xff] %v6987_v30 }
 0x22c   : > { %v1814_v25 = vadd.f32 %v1813_v61, %v1676_v9  ;;  %v1186_v20 = vmul.f32 %v8926_v58, %v8921_v24  ;;  %v1187_v63 = vmul.f32 %v8672_v21, %v8921_v24  ;;  %v1188_v41 = vmul.f32 %v8909_v26, %v8921_v24 }
 0x22d   : > { %v1189_v5 = vmul.f32 %v8910_v51, %v8921_v24  ;;  %v1190_v62 = vmul.f32 %v8878_v18, %v8921_v24  ;;  %v1191_v6 = vmul.f32 %v8911_v31, %v8921_v24  ;;  %v1312_v9 = vadd.f32 %v1184_v56, %v8927_v40  ;;  %v8934_v40 = vld [vmem:[#allocation153_spill] sm:$0xff] }
 0x22e   : > { %v1815_v57 = vadd.f32 %v1814_v25, %v1677_v28  ;;  %v1313_v45 = vadd.f32 %v1185_v8, %v8928_v2  ;;  %v1314_v0 = vadd.f32 %v1186_v20, %v922_v13  ;;  %v1315_v60 = vadd.f32 %v1187_v63, %v923_v47 }
 0x22f   : > { %v1316_v55 = vadd.f32 %v1188_v41, %v924_v35  ;;  %v1317_v15 = vadd.f32 %v1189_v5, %v925_v34  ;;  %v1318_v44 = vadd.f32 %v1190_v62, %v926_v11  ;;  %v1319_v37 = vadd.f32 %v1191_v6, %v927_v42  ;;  %v7011_v62 = vpop.permute.xlu1 %2197 }
 0x230   : > { %v1816_v61 = vadd.f32 %v1815_v57, %v1678_v3  ;;  %v1520_v50 = vadd.f32 %v8930_v59, %v1312_v9  ;;  %v1521_v18 = vadd.f32 %v8930_v59, %v1313_v45  ;;  %v1522_v24 = vadd.f32 %v8930_v59, %v1314_v0  ;;  %8933 = vst [vmem:[#allocation92_spill] sm:$0xff] %v7011_v62 }
 0x231   : > { %v1523_v56 = vadd.f32 %v8930_v59, %v1315_v60  ;;  %v1524_v28 = vadd.f32 %v8930_v59, %v1316_v55  ;;  %v1525_v13 = vadd.f32 %v8930_v59, %v1317_v15  ;;  %v1526_v47 = vadd.f32 %v8930_v59, %v1318_v44  ;;  %v8935_v55 = vld [vmem:[#allocation40_spill] sm:$0xff]  ;;  %v8936_v44 = vld [vmem:[#allocation154_spill] sm:$0xff] }
 0x232   : > { %v6998_v35 = vmul.f32 %v8895_v27, %v6987_v30  ;;  %v1817_v34 = vadd.f32 %v1816_v61, %v1679_v14  ;;  %v1648_v3 = vmax.f32 %v1520_v50, 0.0  ;;  %v1649_v11 = vmax.f32 %v1521_v18, 0.0  ;;  %v8938_v50 = vld [vmem:[#allocation57_spill] sm:$0xff] }
 0x233   : > { %v2377_v42 = vmul.f32 %v8896_v53, %v6987_v30  ;;  %v7004_v8 = vmul.f32 %v8897_v52, %v6987_v30  ;;  %v7008_v25 = vmul.f32 %v8898_v1, %v6987_v30  ;;  %v1527_v20 = vadd.f32 %v8930_v59, %v1319_v37  ;;  %v8937_v37 = vld [vmem:[#allocation55_spill] sm:$0xff] }
 0x234   : > { %1818 = vadd.xlane.f32.xlu0 %v1817_v34  ;;  %v1650_v63 = vmax.f32 %v1522_v24, 0.0  ;;  %v1651_v41 = vmax.f32 %v1523_v56, 0.0  ;;  %v1652_v5 = vmax.f32 %v1524_v28, 0.0  ;;  %v1784_v14 = vadd.f32 %v1649_v11, %v1648_v3  ;;  %v8940_v34 = vld [vmem:[#allocation158_spill] sm:$0xff] }
 0x235   : > { %8931 = vst [vmem:[#allocation114_spill] sm:$0xff] %v7004_v8  ;;  %8932 = vst [vmem:[#allocation190_spill] sm:$0xff] %v7008_v25  ;;  %v1653_v18 = vmax.f32 %v1525_v13, 0.0  ;;  %v1654_v6 = vmax.f32 %v1526_v47, 0.0  ;;  %v2082_v9 = vmul.f32 %v8787_v33, %v8934_v40  ;;  %v2083_v57 = vmul.f32 %v8789_v54, %v8934_v40  ;;  %v8939_v13 = vld [vmem:[#allocation156_spill] sm:$0xff] }
 0x236   : > { %v1785_v2 = vadd.f32 %v1784_v14, %v1650_v63  ;;  %v2084_v45 = vmul.f32 %v8799_v46, %v8934_v40  ;;  %v2085_v0 = vmul.f32 %v8800_v23, %v8934_v40  ;;  %v2086_v60 = vmul.f32 %v8801_v4, %v8934_v40  ;;  %v8942_v54 = vld [vmem:[#allocation48_spill] sm:$0xff] }
 0x237   : > { %v2087_v15 = vmul.f32 %v8935_v55, %v8934_v40  ;;  %v2348_v61 = vmul.f32 %v8937_v37, %v8936_v44  ;;  %v2349_v59 = vmul.f32 %v8856_v22, %v8936_v44  ;;  %v2350_v24 = vmul.f32 %v8938_v50, %v8936_v44  ;;  %v8941_v40 = vld [vmem:[#allocation175_spill] sm:$0xff]  ;;  %v7041_v50 = vpop.permute.xlu1 %1037 }
 0x238   : > { %v1786_v56 = vadd.f32 %v1785_v2, %v1651_v41  ;;  %v2351_v28 = vmul.f32 %v8858_v48, %v8936_v44  ;;  %v2474_v47 = vadd.f32 %v8939_v13, %v2082_v9  ;;  %v2475_v3 = vadd.f32 %v8940_v34, %v2083_v57  ;;  %v8943_v41 = vld [vmem:[#allocation49_spill] sm:$0xff]  ;;  %v8944_v9 = vld [vmem:[#allocation50_spill] sm:$0xff] }
 0x239   : > { %v2476_v11 = vadd.f32 %v2348_v61, %v2084_v45  ;;  %v2477_v63 = vadd.f32 %v2349_v59, %v2085_v0  ;;  %v2478_v14 = vadd.f32 %v2350_v24, %v2086_v60  ;;  %v2739_v25 = vmul.f32 %v8860_v17, %v8941_v40  ;;  %v8945_v57 = vld [vmem:[#allocation54_spill] sm:$0xff]  ;;  %v8946_v0 = vld [vmem:[#allocation164_spill] sm:$0xff]  ;;  %v8951_v48 = vld [vmem:[#allocation129_spill] sm:$0xff] }
 0x23a   : > { %v1787_v8 = vadd.f32 %v1786_v56, %v1652_v5  ;;  %v2479_v30 = vadd.f32 %v2351_v28, %v2087_v15  ;;  %v2740_v33 = vmul.f32 %v8942_v54, %v8941_v40  ;;  %v2741_v2 = vmul.f32 %v8943_v41, %v8941_v40  ;;  %v8947_v60 = vld [vmem:[#allocation76_spill] sm:$0xff]  ;;  %v8948_v59 = vld [vmem:[#allocation118_spill] sm:$0xff]  ;;  %v8950_v56 = vld [vmem:[#allocation79_spill] sm:$0xff] }
 0x23b   : > { %v2742_v44 = vmul.f32 %v8944_v9, %v8941_v40  ;;  %v2743_v45 = vmul.f32 %v8945_v57, %v8941_v40  ;;  %v2864_v61 = vadd.f32 %v8947_v60, %v8946_v0  ;;  %v8949_v5 = vld [vmem:[#allocation78_spill] sm:$0xff]  ;;  %v2866_v28 = vadd.f32 %v8950_v56, %v2474_v47 }
 0x23c   : > { %v2865_v15 = vadd.f32 %v8949_v5, %v8948_v59  ;;  %v1788_v24 = vadd.f32 %v1787_v8, %v1653_v18  ;;  %v2867_v13 = vadd.f32 %v2739_v25, %v2475_v3  ;;  %v2868_v34 = vadd.f32 %v2740_v33, %v2476_v11  ;;  %v8952_v3 = vld [vmem:[#allocation121_spill] sm:$0xff] }
 0x23d   : > { %v2869_v41 = vadd.f32 %v2741_v2, %v2477_v63  ;;  %v2870_v54 = vadd.f32 %v2742_v44, %v2478_v14  ;;  %v2871_v17 = vadd.f32 %v2743_v45, %v2479_v30  ;;  %v3056_v22 = vadd.f32 %v8951_v48, %v2864_v61  ;;  %v8958_v45 = vld [vmem:[#allocation207_spill] sm:$0xff] }
 0x23e   : > { %v1655_v9 = vmax.f32 %v1527_v20, 0.0  ;;  %v1789_v37 = vadd.f32 %v1788_v24, %v1654_v6  ;;  %v3057_v40 = vadd.f32 %v8951_v48, %v2865_v15  ;;  %v3058_v57 = vadd.f32 %v8951_v48, %v2866_v28  ;;  %v8954_v6 = vld [vmem:[#allocation87_spill] sm:$0xff] }
 0x23f   : > { %v3059_v0 = vadd.f32 %v8951_v48, %v2867_v13  ;;  %v3060_v60 = vadd.f32 %v8951_v48, %v2868_v34  ;;  %v3061_v8 = vadd.f32 %v8951_v48, %v2869_v41  ;;  %v3062_v25 = vadd.f32 %v8951_v48, %v2870_v54  ;;  %v7071_v41 = vpop.permute.xlu1 %1428 }
 0x240   : > { %v1790_v33 = vadd.f32 %v1789_v37, %v1655_v9  ;;  %v3063_v18 = vadd.f32 %v8951_v48, %v2871_v17  ;;  %v3184_v30 = vmax.f32 %v3056_v22, 0.0  ;;  %v3185_v47 = vmax.f32 %v3057_v40, 0.0 }
 0x241   : > { %v7062_v20 = vadd.f32 %v6998_v35, %v8952_v3  ;;  %v7065_v11 = vadd.f32 %v2377_v42, %v8954_v6  ;;  %v2384_v63 = vmul.f32 %v8895_v27, %v7011_v62  ;;  %v2385_v14 = vmul.f32 %v8896_v53, %v7011_v62 }
 0x242   : > { %v7075_v54 = vmul.f32 %v8897_v52, %v7011_v62  ;;  %v7079_v48 = vmul.f32 %v8898_v1, %v7011_v62  ;;  %1791 = vadd.xlane.f32.xlu1 %v1790_v33  ;;  %v3186_v22 = vmax.f32 %v3058_v57, 0.0  ;;  %v3320_v17 = vadd.f32 %v3185_v47, %v3184_v30  ;;  %v8959_v57 = vld [vmem:[#allocation122_spill] sm:$0xff]  ;;  %v8963_v30 = vld [vmem:[#allocation157_spill] sm:$0xff] }
 0x243   : > { %8953 = vst [vmem:[#allocation115_spill] sm:$0xff] %v7062_v20  ;;  %8955 = vst [vmem:[#allocation166_spill] sm:$0xff] %v7065_v11  ;;  %v3187_v35 = vmax.f32 %v3059_v0, 0.0  ;;  %v3188_v42 = vmax.f32 %v3060_v60, 0.0  ;;  %v3189_v37 = vmax.f32 %v3061_v8, 0.0  ;;  %v3190_v2 = vmax.f32 %v3062_v25, 0.0  ;;  %v7099_v0 = vpop.permute.xlu1 %2585 }
 0x244   : > { %8956 = vst [vmem:[#allocation93_spill] sm:$0xff] %v7075_v54  ;;  %8957 = vst [vmem:[#allocation98_spill] sm:$0xff] %v7079_v48  ;;  %v3191_v9 = vmax.f32 %v3063_v18, 0.0  ;;  %v3321_v44 = vadd.f32 %v3320_v17, %v3186_v22  ;;  %v548_v61 = vmul.f32 %v8826_v38, %v8958_v45  ;;  %v549_v59 = vmul.f32 %v8827_v19, %v8958_v45  ;;  %v8961_v8 = vld [vmem:[#allocation214_spill] sm:$0xff] }
 0x245   : > { %v550_v5 = vmul.f32 %v8828_v43, %v8958_v45  ;;  %v551_v15 = vmul.f32 %v8832_v16, %v8958_v45  ;;  %v810_v24 = vmul.f32 %v8919_v7, %v8959_v57  ;;  %v811_v56 = vmul.f32 %v8920_v29, %v8959_v57  ;;  %8960 = vst [vmem:[#allocation143_spill] sm:$0xff] %v7099_v0  ;;  %v8962_v33 = vld [vmem:[#allocation186_spill] sm:$0xff]  ;;  %v8985_v7 = vld [vmem:[#allocation48_spill] sm:$0xff] }
 0x246   : > { %v3322_v28 = vadd.f32 %v3321_v44, %v3187_v35  ;;  %v812_v13 = vmul.f32 %v8872_v36, %v8959_v57  ;;  %v813_v34 = vmul.f32 %v8873_v12, %v8959_v57  ;;  %v814_v40 = vmul.f32 %v8874_v32, %v8959_v57 }
 0x247   : > { %v815_v60 = vmul.f32 %v8842_v10, %v8959_v57  ;;  %v938_v25 = vadd.f32 %v810_v24, %v8961_v8  ;;  %v939_v18 = vadd.f32 %v811_v56, %v8962_v33  ;;  %v1200_v47 = vmul.f32 %v8922_v39, %v8963_v30  ;;  %v8995_v10 = vld [vmem:[#allocation130_spill] sm:$0xff] }
 0x248   : > { %v3323_v3 = vadd.f32 %v3322_v28, %v3188_v42  ;;  %v940_v6 = vadd.f32 %v812_v13, %v548_v61  ;;  %v941_v22 = vadd.f32 %v813_v34, %v549_v59  ;;  %v942_v17 = vadd.f32 %v814_v40, %v550_v5  ;;  %v8964_v61 = vld [vmem:[#allocation30_spill] sm:$0xff]  ;;  %v8966_v13 = vld [vmem:[#allocation191_spill] sm:$0xff] }
 0x249   : > { %v943_v35 = vadd.f32 %v815_v60, %v551_v15  ;;  %v1201_v44 = vmul.f32 %v8925_v49, %v8963_v30  ;;  %v1202_v45 = vmul.f32 %v8926_v58, %v8963_v30  ;;  %v1203_v57 = vmul.f32 %v8672_v21, %v8963_v30  ;;  %v8965_v15 = vld [vmem:[#allocation142_spill] sm:$0xff] }
 0x24a   : > { %v3324_v24 = vadd.f32 %v3323_v3, %v3189_v37  ;;  %v1204_v56 = vmul.f32 %v8909_v26, %v8963_v30  ;;  %v1205_v42 = vmul.f32 %v8910_v51, %v8963_v30  ;;  %v1206_v59 = vmul.f32 %v8964_v61, %v8963_v30  ;;  %v7123_v3 = vpop.permute.xlu1 %2589  ;;  %v8990_v61 = vld [vmem:[#allocation172_spill] sm:$0xff] }
 0x24b   : > { %v1207_v5 = vmul.f32 %v8911_v31, %v8963_v30  ;;  %v1328_v28 = vadd.f32 %v1200_v47, %v8965_v15  ;;  %v1329_v34 = vadd.f32 %v1201_v44, %v8966_v13  ;;  %v1330_v40 = vadd.f32 %v1202_v45, %v938_v25  ;;  %8967 = vst [vmem:[#allocation99_spill] sm:$0xff] %v7123_v3  ;;  %v8968_v25 = vld [vmem:[#allocation135_spill] sm:$0xff]  ;;  %v8989_v31 = vld [vmem:[#allocation81_spill] sm:$0xff] }
 0x24c   : > { %v3325_v60 = vadd.f32 %v3324_v24, %v3190_v2  ;;  %v1331_v8 = vadd.f32 %v1203_v57, %v939_v18  ;;  %v1332_v37 = vadd.f32 %v1204_v56, %v940_v6  ;;  %v1333_v33 = vadd.f32 %v1205_v42, %v941_v22  ;;  %v8970_v18 = vld [vmem:[#allocation90_spill] sm:$0xff] }
 0x24d   : > { %v1334_v48 = vadd.f32 %v1206_v59, %v942_v17  ;;  %v1335_v54 = vadd.f32 %v1207_v5, %v943_v35  ;;  %v1536_v62 = vadd.f32 %v7071_v41, %v1328_v28  ;;  %v1537_v11 = vadd.f32 %v7071_v41, %v1329_v34  ;;  %v8976_v28 = vld [vmem:[#allocation56_spill] sm:$0xff]  ;;  %v8977_v34 = vld [vmem:[#allocation57_spill] sm:$0xff] }
 0x24e   : > { %v3326_v20 = vadd.f32 %v3325_v60, %v3191_v9  ;;  %v1538_v30 = vadd.f32 %v7071_v41, %v1330_v40  ;;  %v1539_v47 = vadd.f32 %v7071_v41, %v1331_v8  ;;  %v1540_v44 = vadd.f32 %v7071_v41, %v1332_v37  ;;  %v8978_v8 = vld [vmem:[#allocation58_spill] sm:$0xff] }
 0x24f   : > { %v7131_v2 = vadd.f32 %v2384_v63, %v8968_v25  ;;  %v7134_v6 = vadd.f32 %v2385_v14, %v8970_v18  ;;  %v1541_v22 = vadd.f32 %v7071_v41, %v1333_v33  ;;  %v1664_v17 = vmax.f32 %v1536_v62, 0.0  ;;  %v8973_v14 = vld [vmem:[#allocation126_spill] sm:$0xff]  ;;  %v8982_v25 = vld [vmem:[#allocation45_spill] sm:$0xff] }
 0x250   : > { %v7139_v35 = vmul.f32 %v8922_v39, %v7041_v50  ;;  %3327 = vadd.xlane.f32.xlu1 %v3326_v20  ;;  %v1542_v9 = vadd.f32 %v7071_v41, %v1334_v48  ;;  %v1543_v45 = vadd.f32 %v7071_v41, %v1335_v54  ;;  %v1665_v57 = vmax.f32 %v1537_v11, 0.0  ;;  %v7149_v20 = vpop.permute.xlu1 %2973  ;;  %v8974_v11 = vld [vmem:[#allocation128_spill] sm:$0xff]  ;;  %v8975_v54 = vld [vmem:[#allocation55_spill] sm:$0xff]  ;;  %v8979_v33 = vld [vmem:[#allocation66_spill] sm:$0xff] }
 0x251   : > { %8969 = vst [vmem:[#allocation144_spill] sm:$0xff] %v7131_v2  ;;  %8971 = vst [vmem:[#allocation145_spill] sm:$0xff] %v7134_v6  ;;  %v1666_v24 = vmax.f32 %v1538_v30, 0.0  ;;  %v1667_v56 = vmax.f32 %v1539_v47, 0.0  ;;  %v1668_v63 = vmax.f32 %v1540_v44, 0.0  ;;  %v1669_v42 = vmax.f32 %v1541_v22, 0.0 }
 0x252   : > { %8972 = vst [vmem:[#allocation146_spill] sm:$0xff] %v7139_v35  ;;  %v1802_v59 = vadd.f32 %v1665_v57, %v1664_v17  ;;  %v2100_v5 = vmul.f32 %v8799_v46, %v8973_v14  ;;  %v2101_v62 = vmul.f32 %v8800_v23, %v8973_v14  ;;  %v2102_v15 = vmul.f32 %v8801_v4, %v8973_v14  ;;  %v8980_v30 = vld [vmem:[#allocation209_spill] sm:$0xff]  ;;  %v8981_v44 = vld [vmem:[#allocation88_spill] sm:$0xff]  ;;  %v8983_v22 = vld [vmem:[#allocation95_spill] sm:$0xff] }
 0x253   : > { %v2103_v41 = vmul.f32 %v8935_v55, %v8973_v14  ;;  %v2364_v48 = vmul.f32 %v8975_v54, %v8974_v11  ;;  %v2365_v13 = vmul.f32 %v8976_v28, %v8974_v11  ;;  %v2366_v40 = vmul.f32 %v8977_v34, %v8974_v11  ;;  %v8984_v17 = vld [vmem:[#allocation80_spill] sm:$0xff] }
 0x254   : > { %v1803_v60 = vadd.f32 %v1802_v59, %v1666_v24  ;;  %v2367_v37 = vmul.f32 %v8978_v8, %v8974_v11  ;;  %v2490_v47 = vadd.f32 %v8980_v30, %v8979_v33  ;;  %v2755_v18 = vmul.f32 %v8982_v25, %v8981_v44  ;;  %v8986_v24 = vld [vmem:[#allocation49_spill] sm:$0xff]  ;;  %v8987_v11 = vld [vmem:[#allocation50_spill] sm:$0xff] }
 0x255   : > { %v2491_v57 = vadd.f32 %v8984_v17, %v8983_v22  ;;  %v2492_v14 = vadd.f32 %v2364_v48, %v2100_v5  ;;  %v2493_v6 = vadd.f32 %v2365_v13, %v2101_v62  ;;  %v2494_v2 = vadd.f32 %v2366_v40, %v2102_v15  ;;  %v8988_v33 = vld [vmem:[#allocation54_spill] sm:$0xff]  ;;  %v8992_v5 = vld [vmem:[#allocation173_spill] sm:$0xff]  ;;  %v7180_v17 = vpop.permute.xlu1 %1933 }
 0x256   : > { %v1804_v29 = vadd.f32 %v1803_v60, %v1667_v56  ;;  %v2756_v39 = vmul.f32 %v8985_v7, %v8981_v44  ;;  %v2757_v59 = vmul.f32 %v8986_v24, %v8981_v44  ;;  %v2758_v35 = vmul.f32 %v8987_v11, %v8981_v44  ;;  %v8991_v22 = vld [vmem:[#allocation82_spill] sm:$0xff]  ;;  %v8993_v15 = vld [vmem:[#allocation177_spill] sm:$0xff]  ;;  %8994 = vst [vmem:[#allocation100_spill] sm:$0xff] %v7180_v17 }
 0x257   : > { %v2759_v30 = vmul.f32 %v8988_v33, %v8981_v44  ;;  %v2880_v51 = vadd.f32 %v8990_v61, %v8989_v31  ;;  %v2881_v62 = vadd.f32 %v8992_v5, %v8991_v22  ;;  %v2882_v56 = vadd.f32 %v8993_v15, %v2490_v47 }
 0x258   : > { %v1805_v48 = vadd.f32 %v1804_v29, %v1668_v63  ;;  %v2495_v13 = vadd.f32 %v2367_v37, %v2103_v41  ;;  %v2883_v40 = vadd.f32 %v2755_v18, %v2491_v57  ;;  %v2884_v60 = vadd.f32 %v2756_v39, %v2492_v14  ;;  %v8996_v39 = vld [vmem:[#allocation42_spill] sm:$0xff] }
 0x259   : > { %v2885_v26 = vadd.f32 %v2757_v59, %v2493_v6  ;;  %v2886_v21 = vadd.f32 %v2758_v35, %v2494_v2  ;;  %v3072_v32 = vadd.f32 %v8995_v10, %v2880_v51  ;;  %v3073_v44 = vadd.f32 %v8995_v10, %v2881_v62  ;;  %v9007_v62 = vld [vmem:[#allocation33_spill] sm:$0xff] }
 0x25a   : > { %v1670_v12 = vmax.f32 %v1542_v9, 0.0  ;;  %v1806_v36 = vadd.f32 %v1805_v48, %v1669_v42  ;;  %v2887_v31 = vadd.f32 %v2759_v30, %v2495_v13  ;;  %v3074_v61 = vadd.f32 %v8995_v10, %v2882_v56  ;;  %v8998_v42 = vld [vmem:[#allocation43_spill] sm:$0xff]  ;;  %v7230_v13 = vpop.permute.xlu0 %1443 }
 0x25b   : > { %v7187_v47 = vmul.f32 %v8925_v49, %v7041_v50  ;;  %v7191_v29 = vmul.f32 %v8926_v58, %v7041_v50  ;;  %v7195_v2 = vmul.f32 %v8996_v39, %v7099_v0  ;;  %v3200_v51 = vmax.f32 %v3072_v32, 0.0 }
 0x25c   : > { %v1671_v6 = vmax.f32 %v1543_v45, 0.0  ;;  %v1807_v35 = vadd.f32 %v1806_v36, %v1670_v12  ;;  %v3075_v9 = vadd.f32 %v8995_v10, %v2883_v40  ;;  %v3201_v63 = vmax.f32 %v3073_v44, 0.0  ;;  %v9000_v36 = vld [vmem:[#allocation44_spill] sm:$0xff]  ;;  %v9008_v40 = vld [vmem:[#allocation34_spill] sm:$0xff]  ;;  %v9010_v44 = vld [vmem:[#allocation35_spill] sm:$0xff] }
 0x25d   : > { %8997 = vst [vmem:[#allocation101_spill] sm:$0xff] %v7195_v2  ;;  %v7200_v41 = vmul.f32 %v8998_v42, %v7099_v0  ;;  %v3076_v37 = vadd.f32 %v8995_v10, %v2884_v60  ;;  %v3077_v18 = vadd.f32 %v8995_v10, %v2885_v26  ;;  %v3078_v57 = vadd.f32 %v8995_v10, %v2886_v21  ;;  %v7222_v26 = vpop.permute.xlu1 %2201 }
 0x25e   : > { %v1808_v14 = vadd.f32 %v1807_v35, %v1671_v6  ;;  %v3079_v59 = vadd.f32 %v8995_v10, %v2887_v31  ;;  %v3202_v30 = vmax.f32 %v3074_v61, 0.0  ;;  %v3338_v32 = vadd.f32 %v3201_v63, %v3200_v51  ;;  %9005 = vst [vmem:[#allocation102_spill] sm:$0xff] %v7222_v26  ;;  %v9006_v10 = vld [vmem:[#allocation32_spill] sm:$0xff] }
 0x25f   : > { %8999 = vst [vmem:[#allocation147_spill] sm:$0xff] %v7200_v41  ;;  %v7208_v12 = vmul.f32 %v9000_v36, %v7099_v0  ;;  %v7212_v45 = vmul.f32 %v8996_v39, %v7123_v3  ;;  %v7216_v22 = vmul.f32 %v8998_v42, %v7123_v3  ;;  %v7220_v21 = vmul.f32 %v9000_v36, %v7123_v3  ;;  %v7275_v42 = vpop.permute.xlu0 %1453  ;;  %v9018_v39 = vld [vmem:[#allocation181_spill] sm:$0xff] }
 0x260   : > { %v2128_v5 = vmul.f32 %v9006_v10, %v7180_v17  ;;  %v7228_v15 = vmul.f32 %v9007_v62, %v7180_v17  ;;  %1809 = vadd.xlane.f32.xlu1 %v1808_v14  ;;  %v3203_v56 = vmax.f32 %v3075_v9, 0.0  ;;  %v3339_v48 = vadd.f32 %v3338_v32, %v3202_v30  ;;  %9017 = vst [vmem:[#allocation215_spill] sm:$0xff] %v7275_v42 }
 0x261   : > { %9001 = vst [vmem:[#allocation148_spill] sm:$0xff] %v7208_v12  ;;  %9002 = vst [vmem:[#allocation138_spill] sm:$0xff] %v7212_v45  ;;  %v7234_v60 = vmul.f32 %v9008_v40, %v7180_v17  ;;  %v7238_v31 = vmul.f32 %v9010_v44, %v7180_v17  ;;  %v3204_v61 = vmax.f32 %v3076_v37, 0.0  ;;  %v3205_v51 = vmax.f32 %v3077_v18, 0.0  ;;  %v9014_v37 = vld [vmem:[#allocation46_spill] sm:$0xff]  ;;  %v9016_v17 = vld [vmem:[#allocation180_spill] sm:$0xff]  ;;  %v7333_v41 = vpop.permute.xlu1 %2205 }
 0x262   : > { %9003 = vst [vmem:[#allocation167_spill] sm:$0xff] %v7216_v22  ;;  %9004 = vst [vmem:[#allocation199_spill] sm:$0xff] %v7220_v21  ;;  %v3206_v6 = vmax.f32 %v3078_v57, 0.0  ;;  %v3207_v35 = vmax.f32 %v3079_v59, 0.0  ;;  %v3340_v63 = vadd.f32 %v3339_v48, %v3203_v56  ;;  %v2392_v14 = vmul.f32 %v8895_v27, %v7222_v26  ;;  %v9019_v22 = vld [vmem:[#allocation27_spill] sm:$0xff] }
 0x263   : > { %9009 = vst [vmem:[#allocation200_spill] sm:$0xff] %v7234_v60  ;;  %9011 = vst [vmem:[#allocation201_spill] sm:$0xff] %v7238_v31  ;;  %v7244_v9 = vmul.f32 %v8896_v53, %v7222_v26  ;;  %v7248_v30 = vmul.f32 %v8897_v52, %v7222_v26  ;;  %v7252_v32 = vmul.f32 %v8898_v1, %v7222_v26 }
 0x264   : > { %v2106_v18 = vmul.f32 %v9008_v40, %v9014_v37  ;;  %v3341_v57 = vadd.f32 %v3340_v63, %v3204_v61  ;;  %v2107_v59 = vmul.f32 %v9010_v44, %v9014_v37  ;;  %v2108_v56 = vmul.f32 %v8799_v46, %v9014_v37  ;;  %9039 = vst [vmem:[#allocation61_spill] sm:$0xff] %v7333_v41 }
 0x265   : > { %9012 = vst [vmem:[#allocation202_spill] sm:$0xff] %v7248_v30  ;;  %9013 = vst [vmem:[#allocation203_spill] sm:$0xff] %v7252_v32  ;;  %v2109_v48 = vmul.f32 %v8800_v23, %v9014_v37  ;;  %v2110_v31 = vmul.f32 %v8801_v4, %v9014_v37  ;;  %v2111_v1 = vmul.f32 %v8935_v55, %v9014_v37  ;;  %v9015_v32 = vld [vmem:[#allocation75_spill] sm:$0xff] }
 0x266   : > { %v2372_v30 = vmul.f32 %v8975_v54, %v9015_v32  ;;  %v2373_v61 = vmul.f32 %v8976_v28, %v9015_v32  ;;  %v3342_v63 = vadd.f32 %v3341_v57, %v3205_v51  ;;  %v2374_v60 = vmul.f32 %v8977_v34, %v9015_v32 }
 0x267   : > { %v2375_v26 = vmul.f32 %v8978_v8, %v9015_v32  ;;  %v2498_v36 = vadd.f32 %v9016_v17, %v2106_v18  ;;  %v2499_v52 = vadd.f32 %v9018_v39, %v2107_v59  ;;  %v2763_v45 = vmul.f32 %v8982_v25, %v9019_v22  ;;  %v9021_v18 = vld [vmem:[#allocation178_spill] sm:$0xff] }
 0x268   : > { %v2500_v37 = vadd.f32 %v2372_v30, %v2108_v56  ;;  %v2501_v21 = vadd.f32 %v2373_v61, %v2109_v48  ;;  %v3343_v3 = vadd.f32 %v3342_v63, %v3206_v6  ;;  %v2502_v44 = vadd.f32 %v2374_v60, %v2110_v31  ;;  %v9020_v30 = vld [vmem:[#allocation182_spill] sm:$0xff]  ;;  %v9022_v48 = vld [vmem:[#allocation183_spill] sm:$0xff]  ;;  %v9023_v6 = vld [vmem:[#allocation120_spill] sm:$0xff]  ;;  %v7293_v61 = vpop.xlane.xlu0 %1719 }
 0x269   : > { %v2503_v51 = vadd.f32 %v2375_v26, %v2111_v1  ;;  %v2764_v57 = vmul.f32 %v8985_v7, %v9019_v22  ;;  %v2765_v32 = vmul.f32 %v8986_v24, %v9019_v22  ;;  %v2766_v17 = vmul.f32 %v8987_v11, %v9019_v22  ;;  %v9024_v1 = vld [vmem:[#allocation83_spill] sm:$0xff]  ;;  %v9041_v24 = vld [vmem:[#allocation29_spill] sm:$0xff] }
 0x26a   : > { %v2767_v39 = vmul.f32 %v8988_v33, %v9019_v22  ;;  %v2888_v59 = vadd.f32 %v9021_v18, %v9020_v30  ;;  %v3344_v56 = vadd.f32 %v3343_v3, %v3207_v35  ;;  %v2889_v60 = vadd.f32 %v9023_v6, %v9022_v48  ;;  %v9025_v35 = vld [vmem:[#allocation74_spill] sm:$0xff]  ;;  %v9029_v48 = vld [vmem:[#allocation8_spill] sm:$0xff] }
 0x26b   : > { %v2890_v26 = vadd.f32 %v9024_v1, %v2498_v36  ;;  %v2891_v31 = vadd.f32 %v2763_v45, %v2499_v52  ;;  %v2892_v63 = vadd.f32 %v2764_v57, %v2500_v37  ;;  %v2893_v42 = vadd.f32 %v2765_v32, %v2501_v21  ;;  %v9040_v33 = vld [vmem:[#allocation28_spill] sm:$0xff] }
 0x26c   : > { %v2894_v40 = vadd.f32 %v2766_v17, %v2502_v44  ;;  %v2895_v58 = vadd.f32 %v2767_v39, %v2503_v51  ;;  %3345 = vadd.xlane.f32.xlu1 %v3344_v56  ;;  %v3080_v12 = vadd.f32 %v7149_v20, %v2888_v59  ;;  %v3081_v22 = vadd.f32 %v7149_v20, %v2889_v60  ;;  %v9030_v60 = vld [vmem:[#allocation9_spill] sm:$0xff]  ;;  %v3256_v1 = vpop.xlane.xlu0 %3255 }
 0x26d   : > { %v3082_v30 = vadd.f32 %v7149_v20, %v2890_v26  ;;  %v3083_v3 = vadd.f32 %v7149_v20, %v2891_v31  ;;  %v7301_v18 = vmul.f32 %v9006_v10, %v9025_v35  ;;  %v3084_v52 = vadd.f32 %v7149_v20, %v2892_v63  ;;  %v9028_v10 = vld [vmem:[#allocation22_spill] sm:$0xff]  ;;  %v9032_v26 = vld [vmem:[#allocation17_spill] sm:$0xff] }
 0x26e   : > { %v3085_v36 = vadd.f32 %v7149_v20, %v2893_v42  ;;  %v3086_v45 = vadd.f32 %v7149_v20, %v2894_v40  ;;  %v7306_v21 = vadd.f32 %v2392_v14, %v2128_v5  ;;  %v3087_v44 = vadd.f32 %v7149_v20, %v2895_v58  ;;  %v9031_v14 = vld [vmem:[#allocation65_spill] sm:$0xff]  ;;  %v9033_v63 = vld [vmem:[#allocation18_spill] sm:$0xff] }
 0x26f   : > { %9026 = vst [vmem:[#allocation216_spill] sm:$0xff] %v7301_v18  ;;  %v3208_v37 = vmax.f32 %v3080_v12, 0.0  ;;  %v3209_v51 = vmax.f32 %v3081_v22, 0.0  ;;  %v3210_v57 = vmax.f32 %v3082_v30, 0.0  ;;  %v3211_v32 = vmax.f32 %v3083_v3, 0.0  ;;  %v9034_v30 = vld [vmem:[#allocation19_spill] sm:$0xff] }
 0x270   : > { %9027 = vst [vmem:[#allocation217_spill] sm:$0xff] %v7306_v21  ;;  %v3212_v17 = vmax.f32 %v3084_v52, 0.0  ;;  %v3213_v39 = vmax.f32 %v3085_v36, 0.0  ;;  %v3214_v59 = vmax.f32 %v3086_v45, 0.0  ;;  %v570_v6 = vmul.f32 %v9029_v48, %v9028_v10  ;;  %v9035_v52 = vld [vmem:[#allocation20_spill] sm:$0xff]  ;;  %v9036_v45 = vld [vmem:[#allocation106_spill] sm:$0xff] }
 0x271   : > { %v3347_v56 = vadd.f32 %v3209_v51, %v3208_v37  ;;  %v571_v42 = vmul.f32 %v9030_v60, %v9028_v10  ;;  %v572_v5 = vmul.f32 %v8826_v38, %v9028_v10  ;;  %v573_v58 = vmul.f32 %v8827_v19, %v9028_v10  ;;  %v9037_v51 = vld [vmem:[#allocation108_spill] sm:$0xff]  ;;  %v9038_v21 = vld [vmem:[#allocation26_spill] sm:$0xff] }
 0x272   : > { %v574_v20 = vmul.f32 %v8828_v43, %v9028_v10  ;;  %v575_v12 = vmul.f32 %v8832_v16, %v9028_v10  ;;  %v836_v31 = vmul.f32 %v9032_v26, %v9031_v14  ;;  %v837_v22 = vmul.f32 %v9033_v63, %v9031_v14 }
 0x273   : > { %v3348_v40 = vadd.f32 %v3347_v56, %v3210_v57  ;;  %v838_v3 = vmul.f32 %v9034_v30, %v9031_v14  ;;  %v839_v36 = vmul.f32 %v9035_v52, %v9031_v14  ;;  %v962_v37 = vadd.f32 %v9036_v45, %v570_v6  ;;  %v9042_v6 = vld [vmem:[#allocation30_spill] sm:$0xff] }
 0x274   : > { %v963_v18 = vadd.f32 %v9037_v51, %v571_v42  ;;  %v1227_v10 = vmul.f32 %v9038_v21, %v7041_v50  ;;  %v964_v56 = vadd.f32 %v836_v31, %v572_v5  ;;  %v965_v60 = vadd.f32 %v837_v22, %v573_v58  ;;  %v9043_v51 = vld [vmem:[#allocation31_spill] sm:$0xff]  ;;  %v9045_v5 = vld [vmem:[#allocation146_spill] sm:$0xff] }
 0x275   : > { %v3349_v57 = vadd.f32 %v3348_v40, %v3211_v32  ;;  %v966_v48 = vadd.f32 %v838_v3, %v574_v20  ;;  %v967_v2 = vadd.f32 %v839_v36, %v575_v12  ;;  %v1228_v11 = vmul.f32 %v9040_v33, %v7041_v50  ;;  %v9044_v32 = vld [vmem:[#allocation109_spill] sm:$0xff]  ;;  %v9046_v20 = vld [vmem:[#allocation110_spill] sm:$0xff]  ;;  %v3265_v12 = vpop.xlane.xlu0 %3264 }
 0x276   : > { %v1229_v14 = vmul.f32 %v9041_v24, %v7041_v50  ;;  %v1230_v45 = vmul.f32 %v9042_v6, %v7041_v50  ;;  %v1231_v7 = vmul.f32 %v9043_v51, %v7041_v50  ;;  %v1352_v58 = vadd.f32 %v9045_v5, %v9044_v32 }
 0x277   : > { %v3350_v42 = vadd.f32 %v3349_v57, %v3212_v17  ;;  %v1353_v40 = vadd.f32 %v7187_v47, %v9046_v20  ;;  %v1354_v31 = vadd.f32 %v7191_v29, %v962_v37  ;;  %v1355_v22 = vadd.f32 %v1227_v10, %v963_v18 }
 0x278   : > { %v1356_v3 = vadd.f32 %v1228_v11, %v964_v56  ;;  %v1357_v36 = vadd.f32 %v1229_v14, %v965_v60  ;;  %v1358_v0 = vadd.f32 %v1230_v45, %v966_v48  ;;  %v1359_v8 = vadd.f32 %v1231_v7, %v967_v2  ;;  %v7360_v7 = vpop.permute.xlu1 %1045 }
 0x279   : > { %v3351_v25 = vadd.f32 %v3350_v42, %v3213_v39  ;;  %v1560_v17 = vadd.f32 %v7230_v13, %v1352_v58  ;;  %v7351_v50 = vadd.f32 %v7244_v9, %v7228_v15  ;;  %v7355_v57 = vmul.f32 %v9007_v62, %v9025_v35 }
 0x27a   : > { %v1561_v47 = vadd.f32 %v7230_v13, %v1353_v40  ;;  %v1562_v29 = vadd.f32 %v7230_v13, %v1354_v31  ;;  %v3215_v18 = vmax.f32 %v3087_v44, 0.0  ;;  %v3393_v60 = vmul.f32 0.0009765625, %v3265_v12 }
 0x27b   : > { %9047 = vst [vmem:[#allocation133_spill] sm:$0xff] %v7351_v50  ;;  %9048 = vst [vmem:[#allocation37_spill] sm:$0xff] %v7355_v57  ;;  %v3352_v11 = vadd.f32 %v3351_v25, %v3214_v59  ;;  %v1563_v39 = vadd.f32 %v7230_v13, %v1355_v22  ;;  %v1564_v2 = vadd.f32 %v7230_v13, %v1356_v3  ;;  %v1688_v9 = vmax.f32 %v1560_v17, 0.0  ;;  %v9054_v3 = vld [vmem:[#allocation140_spill] sm:$0xff] }
 0x27c   : > { %v1565_v15 = vadd.f32 %v7230_v13, %v1357_v36  ;;  %v1689_v48 = vmax.f32 %v1561_v47, 0.0  ;;  %v3392_v37 = vmul.f32 0.0009765625, %v3256_v1  ;;  %v1566_v10 = vadd.f32 %v7230_v13, %v1358_v0  ;;  %v9052_v1 = vld [vmem:[#allocation23_spill] sm:$0xff]  ;;  %v9055_v36 = vld [vmem:[#allocation14_spill] sm:$0xff] }
 0x27d   : > { %v3353_v62 = vadd.f32 %v3352_v11, %v3215_v18  ;;  %v1567_v56 = vadd.f32 %v7230_v13, %v1359_v8  ;;  %v7368_v25 = vmul.f32 %v8895_v27, %v7333_v41  ;;  %v1690_v44 = vmax.f32 %v1562_v29, 0.0  ;;  %v9056_v47 = vld [vmem:[#allocation15_spill] sm:$0xff] }
 0x27e   : > { %v1829_v59 = vadd.f32 %v1689_v48, %v1688_v9  ;;  %v7371_v14 = vmul.f32 0.0009765625, %v7293_v61  ;;  %v7375_v45 = vmul.f32 %v8896_v53, %v7333_v41  ;;  %v7379_v42 = vmul.f32 %v9052_v1, %v7360_v7  ;;  %v9053_v53 = vld [vmem:[#allocation213_spill] sm:$0xff]  ;;  %v9058_v48 = vld [vmem:[#allocation163_spill] sm:$0xff] }
 0x27f   : > { %9049 = vst [vmem:[#allocation38_spill] sm:$0xff] %v7368_v25  ;;  %3354 = vadd.xlane.f32.xlu0 %v3353_v62  ;;  %v8123_v0 = vmov 0.0|0.0   ;;  %v3808_v8 = vpack.c.bf16 %v3393_v60, %v3392_v37  ;;  %v1691_v27 = vmax.f32 %v1563_v39, 0.0  ;;  %v1692_v13 = vmax.f32 %v1564_v2, 0.0  ;;  %v9059_v62 = vld [vmem:[#allocation68_spill] sm:$0xff] }
 0x280   : > { %9050 = vst [vmem:[#allocation39_spill] sm:$0xff] %v7371_v14  ;;  %9051 = vst [vmem:[#allocation123_spill] sm:$0xff] %v7375_v45  ;;  %3807 = vmatprep.subr.bf16.mxu0 %v8123_v0  ;;  %v1693_v32 = vmax.f32 %v1565_v15, 0.0  ;;  %v1830_v5 = vadd.f32 %v1829_v59, %v1690_v44  ;;  %3831 = vmatprep.subr.bf16.mxu1 %v8123_v0  ;;  %v1694_v61 = vmax.f32 %v1566_v10, 0.0  ;;  %v1695_v58 = vmax.f32 %v1567_v56, 0.0  ;;  %v9057_v15 = vld [vmem:[#allocation192_spill] sm:$0xff] }
 0x281   : > { %3809 = vmatpush3.bf16.msra.mxu0 %v3808_v8  ;;  %v564_v20 = vmul.f32 %v8826_v38, %v9053_v53  ;;  %v565_v40 = vmul.f32 %v8827_v19, %v9053_v53  ;;  %v566_v31 = vmul.f32 %v8828_v43, %v9053_v53  ;;  %v567_v22 = vmul.f32 %v8832_v16, %v9053_v53  ;;  %v1439_v8 = vpop.permute.xlu1 %1438 }
 0x282   : > { %v1831_v12 = vadd.f32 %v1830_v5, %v1691_v27  ;;  %v826_v17 = vmul.f32 %v9055_v36, %v9054_v3  ;;  %3810 = vmatprep.subr.bf16.mxu0 %v8123_v0  ;;  %v827_v29 = vmul.f32 %v9056_v47, %v9054_v3  ;;  %v828_v18 = vmul.f32 %v9032_v26, %v9054_v3  ;;  %v9085_v47 = vld [vmem:[#allocation84_spill] sm:$0xff] }
 0x283   : > { %v829_v11 = vmul.f32 %v9033_v63, %v9054_v3  ;;  %v830_v60 = vmul.f32 %v9034_v30, %v9054_v3  ;;  %v831_v2 = vmul.f32 %v9035_v52, %v9054_v3  ;;  %v1219_v37 = vmul.f32 %v9038_v21, %v9058_v48  ;;  %v9060_v3 = vld [vmem:[#allocation69_spill] sm:$0xff] }
 0x284   : > { %v1832_v39 = vadd.f32 %v1831_v12, %v1692_v13  ;;  %v954_v9 = vadd.f32 %v826_v17, %v9057_v15  ;;  %v955_v10 = vadd.f32 %v827_v29, %v9059_v62  ;;  %v956_v56 = vadd.f32 %v828_v18, %v564_v20  ;;  %v9061_v17 = vld [vmem:[#allocation184_spill] sm:$0xff] }
 0x285   : > { %v957_v44 = vadd.f32 %v829_v11, %v565_v40  ;;  %v958_v59 = vadd.f32 %v830_v60, %v566_v31  ;;  %v959_v27 = vadd.f32 %v831_v2, %v567_v22  ;;  %v1220_v5 = vmul.f32 %v9040_v33, %v9058_v48  ;;  %v9062_v40 = vld [vmem:[#allocation159_spill] sm:$0xff]  ;;  %v9063_v31 = vld [vmem:[#allocation185_spill] sm:$0xff]  ;;  %v9064_v22 = vld [vmem:[#allocation188_spill] sm:$0xff] }
 0x286   : > { %v1833_v1 = vadd.f32 %v1832_v39, %v1693_v32  ;;  %v1221_v13 = vmul.f32 %v9041_v24, %v9058_v48  ;;  %v1222_v53 = vmul.f32 %v9042_v6, %v9058_v48  ;;  %v1223_v12 = vmul.f32 %v9043_v51, %v9058_v48 }
 0x287   : > { %v1344_v20 = vadd.f32 %v9061_v17, %v9060_v3  ;;  %v1345_v32 = vadd.f32 %v9063_v31, %v9062_v40  ;;  %v1346_v18 = vadd.f32 %v9064_v22, %v954_v9  ;;  %v1347_v11 = vadd.f32 %v1219_v37, %v955_v10  ;;  %v9070_v40 = vld [vmem:[#allocation114_spill] sm:$0xff] }
 0x288   : > { %v1834_v29 = vadd.f32 %v1833_v1, %v1694_v61  ;;  %v1348_v60 = vadd.f32 %v1220_v5, %v956_v56  ;;  %v1349_v39 = vadd.f32 %v1221_v13, %v957_v44  ;;  %v1350_v2 = vadd.f32 %v1222_v53, %v958_v59  ;;  %v7429_v13 = vpop.permute.xlu1 %2593  ;;  %v9068_v53 = vld [vmem:[#allocation58_spill] sm:$0xff] }
 0x289   : > { %v1351_v15 = vadd.f32 %v1223_v12, %v959_v27  ;;  %v1552_v62 = vadd.f32 %v1439_v8, %v1344_v20  ;;  %v1553_v14 = vadd.f32 %v1439_v8, %v1345_v32  ;;  %v1554_v35 = vadd.f32 %v1439_v8, %v1346_v18  ;;  %v9065_v27 = vld [vmem:[#allocation174_spill] sm:$0xff]  ;;  %9066 = vst [vmem:[#allocation111_spill] sm:$0xff] %v7429_v13  ;;  %v9071_v32 = vld [vmem:[#allocation89_spill] sm:$0xff] }
 0x28a   : > { %v1835_v0 = vadd.f32 %v1834_v29, %v1695_v58  ;;  %v1555_v45 = vadd.f32 %v1439_v8, %v1347_v11  ;;  %v1556_v48 = vadd.f32 %v1439_v8, %v1348_v60  ;;  %v1557_v57 = vadd.f32 %v1439_v8, %v1349_v39  ;;  %v9069_v20 = vld [vmem:[#allocation134_spill] sm:$0xff]  ;;  %v9073_v60 = vld [vmem:[#allocation143_spill] sm:$0xff]  ;;  %v9074_v39 = vld [vmem:[#allocation45_spill] sm:$0xff] }
 0x28b   : > { %v1558_v25 = vadd.f32 %v1439_v8, %v1350_v2  ;;  %v1559_v3 = vadd.f32 %v1439_v8, %v1351_v15  ;;  %v7423_v17 = vmul.f32 %v8925_v49, %v7360_v7  ;;  %v1680_v61 = vmax.f32 %v1552_v62, 0.0  ;;  %v9072_v29 = vld [vmem:[#allocation190_spill] sm:$0xff] }
 0x28c   : > { %1836 = vadd.xlane.f32.xlu0 %v1835_v0  ;;  %v1681_v9 = vmax.f32 %v1553_v14, 0.0  ;;  %v1682_v37 = vmax.f32 %v1554_v35, 0.0  ;;  %v1683_v10 = vmax.f32 %v1555_v45, 0.0  ;;  %v1684_v56 = vmax.f32 %v1556_v48, 0.0  ;;  %v9067_v14 = vld [vmem:[#allocation113_spill] sm:$0xff] }
 0x28d   : > { %v1685_v44 = vmax.f32 %v1557_v57, 0.0  ;;  %v1686_v59 = vmax.f32 %v1558_v25, 0.0  ;;  %v1687_v58 = vmax.f32 %v1559_v3, 0.0  ;;  %v2116_v5 = vmul.f32 %v8799_v46, %v9065_v27  ;;  %v9075_v3 = vld [vmem:[#allocation48_spill] sm:$0xff] }
 0x28e   : > { %v1820_v1 = vadd.f32 %v1681_v9, %v1680_v61  ;;  %v2117_v8 = vmul.f32 %v8800_v23, %v9065_v27  ;;  %v2118_v49 = vmul.f32 %v8801_v4, %v9065_v27  ;;  %v2119_v35 = vmul.f32 %v8935_v55, %v9065_v27  ;;  %v9076_v9 = vld [vmem:[#allocation49_spill] sm:$0xff] }
 0x28f   : > { %v2380_v57 = vmul.f32 %v8975_v54, %v9067_v14  ;;  %v2381_v25 = vmul.f32 %v8976_v28, %v9067_v14  ;;  %v2382_v0 = vmul.f32 %v8977_v34, %v9067_v14  ;;  %v2383_v12 = vmul.f32 %v9068_v53, %v9067_v14  ;;  %v9078_v14 = vld [vmem:[#allocation54_spill] sm:$0xff] }
 0x290   : > { %v1821_v45 = vadd.f32 %v1820_v1, %v1682_v37  ;;  %v2506_v31 = vadd.f32 %v9070_v40, %v9069_v20  ;;  %v2507_v22 = vadd.f32 %v9072_v29, %v9071_v32  ;;  %v2771_v2 = vmul.f32 %v9074_v39, %v9073_v60  ;;  %v9077_v1 = vld [vmem:[#allocation50_spill] sm:$0xff] }
 0x291   : > { %v2508_v18 = vadd.f32 %v2380_v57, %v2116_v5  ;;  %v2509_v11 = vadd.f32 %v2381_v25, %v2117_v8  ;;  %v2510_v62 = vadd.f32 %v2382_v0, %v2118_v49  ;;  %v2511_v48 = vadd.f32 %v2383_v12, %v2119_v35  ;;  %v9079_v5 = vld [vmem:[#allocation115_spill] sm:$0xff]  ;;  %v9080_v8 = vld [vmem:[#allocation101_spill] sm:$0xff]  ;;  %v9081_v40 = vld [vmem:[#allocation166_spill] sm:$0xff]  ;;  %v7462_v12 = vpop.permute.xlu1 %2597 }
 0x292   : > { %v1822_v15 = vadd.f32 %v1821_v45, %v1683_v10  ;;  %v2772_v61 = vmul.f32 %v9075_v3, %v9073_v60  ;;  %v2773_v37 = vmul.f32 %v9076_v9, %v9073_v60  ;;  %v2774_v27 = vmul.f32 %v9077_v1, %v9073_v60  ;;  %v9082_v10 = vld [vmem:[#allocation147_spill] sm:$0xff]  ;;  %v9083_v35 = vld [vmem:[#allocation148_spill] sm:$0xff]  ;;  %9084 = vst [vmem:[#allocation168_spill] sm:$0xff] %v7462_v12 }
 0x293   : > { %v2775_v20 = vmul.f32 %v9078_v14, %v9073_v60  ;;  %v2896_v57 = vadd.f32 %v9080_v8, %v9079_v5  ;;  %v2897_v49 = vadd.f32 %v9082_v10, %v9081_v40  ;;  %v2898_v45 = vadd.f32 %v9083_v35, %v2506_v31 }
 0x294   : > { %v1823_v25 = vadd.f32 %v1822_v15, %v1684_v56  ;;  %v2899_v0 = vadd.f32 %v2771_v2, %v2507_v22  ;;  %v2900_v32 = vadd.f32 %v2772_v61, %v2508_v18  ;;  %v2901_v29 = vadd.f32 %v2773_v37, %v2509_v11 }
 0x295   : > { %v2902_v50 = vadd.f32 %v2774_v27, %v2510_v62  ;;  %v2903_v13 = vadd.f32 %v2775_v20, %v2511_v48  ;;  %v3088_v36 = vadd.f32 %v9085_v47, %v2896_v57  ;;  %v3089_v60 = vadd.f32 %v9085_v47, %v2897_v49  ;;  %v2982_v40 = vpop.permute.xlu1 %2981  ;;  %v9087_v49 = vld [vmem:[#allocation63_spill] sm:$0xff] }
 0x296   : > { %v1824_v41 = vadd.f32 %v1823_v25, %v1685_v44  ;;  %v3090_v5 = vadd.f32 %v9085_v47, %v2898_v45  ;;  %v3091_v56 = vadd.f32 %v9085_v47, %v2899_v0  ;;  %v3092_v15 = vadd.f32 %v9085_v47, %v2900_v32  ;;  %v9086_v44 = vld [vmem:[#allocation25_spill] sm:$0xff]  ;;  %v9090_v0 = vld [vmem:[#allocation92_spill] sm:$0xff] }
 0x297   : > { %v3093_v31 = vadd.f32 %v9085_v47, %v2901_v29  ;;  %v3094_v22 = vadd.f32 %v9085_v47, %v2902_v50  ;;  %v3095_v18 = vadd.f32 %v9085_v47, %v2903_v13  ;;  %v3216_v11 = vmax.f32 %v3088_v36, 0.0  ;;  %v9088_v50 = vld [vmem:[#allocation34_spill] sm:$0xff]  ;;  %v9089_v47 = vld [vmem:[#allocation35_spill] sm:$0xff] }
 0x298   : > { %v1825_v2 = vadd.f32 %v1824_v41, %v1686_v59  ;;  %v3217_v62 = vmax.f32 %v3089_v60, 0.0  ;;  %v7474_v48 = vmul.f32 %v9086_v44, %v7360_v7  ;;  %v3218_v61 = vmax.f32 %v3090_v5, 0.0 }
 0x299   : > { %v3219_v37 = vmax.f32 %v3091_v56, 0.0  ;;  %v3220_v27 = vmax.f32 %v3092_v15, 0.0  ;;  %v3221_v8 = vmax.f32 %v3093_v31, 0.0  ;;  %v3222_v57 = vmax.f32 %v3094_v22, 0.0  ;;  %v9091_v15 = vld [vmem:[#allocation93_spill] sm:$0xff]  ;;  %v9092_v22 = vld [vmem:[#allocation98_spill] sm:$0xff] }
 0x29a   : > { %v1826_v20 = vadd.f32 %v1825_v2, %v1687_v58  ;;  %v3356_v25 = vadd.f32 %v3217_v62, %v3216_v11  ;;  %v3223_v10 = vmax.f32 %v3095_v18, 0.0  ;;  %v2122_v41 = vmul.f32 %v9088_v50, %v9087_v49  ;;  %v9093_v18 = vld [vmem:[#allocation99_spill] sm:$0xff] }
 0x29b   : > { %v2123_v36 = vmul.f32 %v9089_v47, %v9087_v49  ;;  %v2124_v59 = vmul.f32 %v8799_v46, %v9087_v49  ;;  %v2125_v35 = vmul.f32 %v8800_v23, %v9087_v49  ;;  %v2126_v58 = vmul.f32 %v8801_v4, %v9087_v49 }
 0x29c   : > { %1827 = vadd.xlane.f32.xlu1 %v1826_v20  ;;  %v3357_v13 = vadd.f32 %v3356_v25, %v3218_v61  ;;  %v2127_v45 = vmul.f32 %v8935_v55, %v9087_v49  ;;  %v2388_v32 = vmul.f32 %v8975_v54, %v9090_v0  ;;  %v2389_v29 = vmul.f32 %v8976_v28, %v9090_v0 }
 0x29d   : > { %v2390_v60 = vmul.f32 %v8977_v34, %v9090_v0  ;;  %v2391_v5 = vmul.f32 %v9068_v53, %v9090_v0  ;;  %v2514_v31 = vadd.f32 %v9091_v15, %v2122_v41  ;;  %v2515_v2 = vadd.f32 %v9092_v22, %v2123_v36  ;;  %v7506_v41 = vpop.permute.xlu1 %1448  ;;  %v9098_v0 = vld [vmem:[#allocation199_spill] sm:$0xff] }
 0x29e   : > { %v3358_v56 = vadd.f32 %v3357_v13, %v3219_v37  ;;  %v2779_v11 = vmul.f32 %v9074_v39, %v9093_v18  ;;  %v2516_v62 = vadd.f32 %v2388_v32, %v2124_v59  ;;  %v2517_v44 = vadd.f32 %v2389_v29, %v2125_v35  ;;  %v9094_v13 = vld [vmem:[#allocation144_spill] sm:$0xff]  ;;  %v9095_v59 = vld [vmem:[#allocation138_spill] sm:$0xff] }
 0x29f   : > { %v2518_v61 = vadd.f32 %v2390_v60, %v2126_v58  ;;  %v2519_v20 = vadd.f32 %v2391_v5, %v2127_v45  ;;  %v2780_v49 = vmul.f32 %v9075_v3, %v9093_v18  ;;  %v2781_v47 = vmul.f32 %v9076_v9, %v9093_v18  ;;  %v9096_v58 = vld [vmem:[#allocation145_spill] sm:$0xff]  ;;  %v9097_v45 = vld [vmem:[#allocation167_spill] sm:$0xff] }
 0x2a0   : > { %v3359_v25 = vadd.f32 %v3358_v56, %v3220_v27  ;;  %v2782_v37 = vmul.f32 %v9077_v1, %v9093_v18  ;;  %v2783_v36 = vmul.f32 %v9078_v14, %v9093_v18  ;;  %v2904_v35 = vadd.f32 %v9095_v59, %v9094_v13 }
 0x2a1   : > { %v2905_v27 = vadd.f32 %v9097_v45, %v9096_v58  ;;  %v2906_v32 = vadd.f32 %v9098_v0, %v2514_v31  ;;  %v2907_v60 = vadd.f32 %v2779_v11, %v2515_v2  ;;  %v2908_v5 = vadd.f32 %v2780_v49, %v2516_v62  ;;  %v7517_v2 = vpop.permute.xlu1 %2985  ;;  %v9104_v0 = vld [vmem:[#allocation136_spill] sm:$0xff] }
 0x2a2   : > { %v3360_v29 = vadd.f32 %v3359_v25, %v3221_v8  ;;  %v2909_v56 = vadd.f32 %v2781_v47, %v2517_v44  ;;  %v2910_v15 = vadd.f32 %v2782_v37, %v2518_v61  ;;  %v2911_v22 = vadd.f32 %v2783_v36, %v2519_v20  ;;  %v9099_v61 = vld [vmem:[#allocation36_spill] sm:$0xff] }
 0x2a3   : > { %v3096_v50 = vadd.f32 %v2982_v40, %v2904_v35  ;;  %v3097_v12 = vadd.f32 %v2982_v40, %v2905_v27  ;;  %v3098_v9 = vadd.f32 %v2982_v40, %v2906_v32  ;;  %v3099_v3 = vadd.f32 %v2982_v40, %v2907_v60  ;;  %v9100_v20 = vld [vmem:[#allocation8_spill] sm:$0xff] }
 0x2a4   : > { %v3361_v1 = vadd.f32 %v3360_v29, %v3222_v57  ;;  %v3100_v18 = vadd.f32 %v2982_v40, %v2908_v5  ;;  %v3101_v14 = vadd.f32 %v2982_v40, %v2909_v56  ;;  %v3102_v39 = vadd.f32 %v2982_v40, %v2910_v15  ;;  %v9103_v35 = vld [vmem:[#allocation116_spill] sm:$0xff] }
 0x2a5   : > { %v7515_v13 = vadd.f32 %v2982_v40, %v2911_v22  ;;  %v3224_v59 = vmax.f32 %v3096_v50, 0.0  ;;  %v3225_v45 = vmax.f32 %v3097_v12, 0.0  ;;  %v3226_v31 = vmax.f32 %v3098_v9, 0.0  ;;  %v9101_v40 = vld [vmem:[#allocation9_spill] sm:$0xff] }
 0x2a6   : > { %v3362_v58 = vadd.f32 %v3361_v1, %v3223_v10  ;;  %v3227_v8 = vmax.f32 %v3099_v3, 0.0  ;;  %v3228_v47 = vmax.f32 %v3100_v18, 0.0  ;;  %v3229_v11 = vmax.f32 %v3101_v14, 0.0  ;;  %v9102_v14 = vld [vmem:[#allocation105_spill] sm:$0xff]  ;;  %v7544_v18 = vpop.permute.xlu1 %2989 }
 0x2a7   : > { %v3230_v62 = vmax.f32 %v3102_v39, 0.0  ;;  %v3231_v44 = vmax.f32 %v7515_v13, 0.0  ;;  %v3365_v57 = vadd.f32 %v3225_v45, %v3224_v59  ;;  %v586_v25 = vmul.f32 %v9100_v20, %v9099_v61 }
 0x2a8   : > { %3363 = vadd.xlane.f32.xlu1 %v3362_v58  ;;  %v587_v49 = vmul.f32 %v9101_v40, %v9099_v61  ;;  %v588_v1 = vmul.f32 %v8826_v38, %v9099_v61  ;;  %v589_v3 = vmul.f32 %v8827_v19, %v9099_v61  ;;  %v590_v9 = vmul.f32 %v8828_v43, %v9099_v61 }
 0x2a9   : > { %v591_v39 = vmul.f32 %v8832_v16, %v9099_v61  ;;  %v852_v12 = vmul.f32 %v9032_v26, %v9102_v14  ;;  %v3366_v10 = vadd.f32 %v3365_v57, %v3226_v31  ;;  %v853_v50 = vmul.f32 %v9033_v63, %v9102_v14  ;;  %v9105_v57 = vld [vmem:[#allocation137_spill] sm:$0xff]  ;;  %v9106_v61 = vld [vmem:[#allocation94_spill] sm:$0xff] }
 0x2aa   : > { %v854_v37 = vmul.f32 %v9034_v30, %v9102_v14  ;;  %v855_v36 = vmul.f32 %v9035_v52, %v9102_v14  ;;  %v978_v27 = vadd.f32 %v9103_v35, %v586_v25  ;;  %v979_v32 = vadd.f32 %v9104_v0, %v587_v49  ;;  %v9107_v14 = vld [vmem:[#allocation215_spill] sm:$0xff] }
 0x2ab   : > { %v980_v29 = vadd.f32 %v852_v12, %v588_v1  ;;  %v1243_v60 = vmul.f32 %v9038_v21, %v7360_v7  ;;  %v3367_v5 = vadd.f32 %v3366_v10, %v3227_v8  ;;  %v981_v56 = vadd.f32 %v853_v50, %v589_v3  ;;  %v7565_v50 = vpop.xlane.xlu1 %1728 }
 0x2ac   : > { %v982_v15 = vadd.f32 %v854_v37, %v590_v9  ;;  %v983_v22 = vadd.f32 %v855_v36, %v591_v39  ;;  %v1244_v13 = vmul.f32 %v9040_v33, %v7360_v7  ;;  %v1245_v59 = vmul.f32 %v9041_v24, %v7360_v7 }
 0x2ad   : > { %v1246_v58 = vmul.f32 %v9042_v6, %v7360_v7  ;;  %v1247_v45 = vmul.f32 %v9043_v51, %v7360_v7  ;;  %v3368_v31 = vadd.f32 %v3367_v5, %v3228_v47  ;;  %v1368_v8 = vadd.f32 %v7379_v42, %v9105_v57  ;;  %v9111_v57 = vld [vmem:[#allocation15_spill] sm:$0xff] }
 0x2ae   : > { %v1369_v20 = vadd.f32 %v7423_v17, %v9106_v61  ;;  %v1370_v25 = vadd.f32 %v7474_v48, %v978_v27  ;;  %v1371_v40 = vadd.f32 %v1243_v60, %v979_v32  ;;  %v1372_v49 = vadd.f32 %v1244_v13, %v980_v29 }
 0x2af   : > { %v1373_v1 = vadd.f32 %v1245_v59, %v981_v56  ;;  %v1374_v3 = vadd.f32 %v1246_v58, %v982_v15  ;;  %v3369_v9 = vadd.f32 %v3368_v31, %v3229_v11  ;;  %v1375_v39 = vadd.f32 %v1247_v45, %v983_v22  ;;  %v9108_v22 = vld [vmem:[#allocation189_spill] sm:$0xff]  ;;  %v9109_v45 = vld [vmem:[#allocation150_spill] sm:$0xff] }
 0x2b0   : > { %v1576_v12 = vadd.f32 %v9107_v14, %v1368_v8  ;;  %v1577_v10 = vadd.f32 %v9107_v14, %v1369_v20  ;;  %v1578_v7 = vadd.f32 %v9107_v14, %v1370_v25  ;;  %v1579_v47 = vadd.f32 %v9107_v14, %v1371_v40  ;;  %v9112_v25 = vld [vmem:[#allocation160_spill] sm:$0xff] }
 0x2b1   : > { %v1580_v42 = vadd.f32 %v9107_v14, %v1372_v49  ;;  %v1581_v17 = vadd.f32 %v9107_v14, %v1373_v1  ;;  %v3370_v48 = vadd.f32 %v3369_v9, %v3230_v62  ;;  %v1582_v37 = vadd.f32 %v9107_v14, %v1374_v3  ;;  %v9113_v49 = vld [vmem:[#allocation5_spill] sm:$0xff]  ;;  %v9114_v9 = vld [vmem:[#allocation179_spill] sm:$0xff] }
 0x2b2   : > { %v7569_v11 = vadd.f32 %v9107_v14, %v1375_v39  ;;  %v1704_v36 = vmax.f32 %v1576_v12, 0.0  ;;  %v1705_v35 = vmax.f32 %v1577_v10, 0.0  ;;  %v1706_v27 = vmax.f32 %v1578_v7, 0.0 }
 0x2b3   : > { %v1707_v0 = vmax.f32 %v1579_v47, 0.0  ;;  %v1708_v32 = vmax.f32 %v1580_v42, 0.0  ;;  %v3371_v29 = vadd.f32 %v3370_v48, %v3231_v44  ;;  %v1709_v60 = vmax.f32 %v1581_v17, 0.0  ;;  %v9110_v44 = vld [vmem:[#allocation14_spill] sm:$0xff]  ;;  %v9115_v42 = vld [vmem:[#allocation151_spill] sm:$0xff]  ;;  %v9117_v48 = vld [vmem:[#allocation152_spill] sm:$0xff] }
 0x2b4   : > { %v1710_v5 = vmax.f32 %v1582_v37, 0.0  ;;  %v1711_v56 = vmax.f32 %v7569_v11, 0.0  ;;  %v1847_v15 = vadd.f32 %v1705_v35, %v1704_v36  ;;  %v580_v13 = vmul.f32 %v8826_v38, %v9108_v22  ;;  %v9116_v17 = vld [vmem:[#allocation195_spill] sm:$0xff]  ;;  %v9118_v37 = vld [vmem:[#allocation196_spill] sm:$0xff]  ;;  %v9119_v36 = vld [vmem:[#allocation198_spill] sm:$0xff] }
 0x2b5   : > { %v581_v62 = vmul.f32 %v8827_v19, %v9108_v22  ;;  %v582_v59 = vmul.f32 %v8828_v43, %v9108_v22  ;;  %3372 = vadd.xlane.f32.xlu0 %v3371_v29  ;;  %v583_v58 = vmul.f32 %v8832_v16, %v9108_v22  ;;  %v842_v31 = vmul.f32 %v9110_v44, %v9109_v45  ;;  %v7592_v16 = vpop.xlane.xlu1 %1737 }
 0x2b6   : > { %v843_v8 = vmul.f32 %v9111_v57, %v9109_v45  ;;  %v844_v61 = vmul.f32 %v9032_v26, %v9109_v45  ;;  %v1848_v38 = vadd.f32 %v1847_v15, %v1706_v27  ;;  %v845_v19 = vmul.f32 %v9033_v63, %v9109_v45  ;;  %v9120_v57 = vld [vmem:[#allocation61_spill] sm:$0xff] }
 0x2b7   : > { %v846_v43 = vmul.f32 %v9034_v30, %v9109_v45  ;;  %v847_v20 = vmul.f32 %v9035_v52, %v9109_v45  ;;  %v970_v40 = vadd.f32 %v842_v31, %v9112_v25  ;;  %v1235_v26 = vmul.f32 %v9038_v21, %v9114_v9 }
 0x2b8   : > { %v971_v1 = vadd.f32 %v843_v8, %v9113_v49  ;;  %v972_v3 = vadd.f32 %v844_v61, %v580_v13  ;;  %v1849_v39 = vadd.f32 %v1848_v38, %v1707_v0  ;;  %v973_v14 = vadd.f32 %v845_v19, %v581_v62  ;;  %v9121_v8 = vld [vmem:[#allocation52_spill] sm:$0xff]  ;;  %v9122_v38 = vld [vmem:[#allocation111_spill] sm:$0xff]  ;;  %v9123_v19 = vld [vmem:[#allocation42_spill] sm:$0xff] }
 0x2b9   : > { %v974_v12 = vadd.f32 %v846_v43, %v582_v59  ;;  %v975_v63 = vadd.f32 %v847_v20, %v583_v58  ;;  %v1236_v30 = vmul.f32 %v9040_v33, %v9114_v9  ;;  %v1237_v52 = vmul.f32 %v9041_v24, %v9114_v9  ;;  %v7619_v58 = vpop.xlane.xlu0 %1746  ;;  %v9124_v20 = vld [vmem:[#allocation43_spill] sm:$0xff]  ;;  %v9125_v49 = vld [vmem:[#allocation44_spill] sm:$0xff] }
 0x2ba   : > { %v1238_v10 = vmul.f32 %v9042_v6, %v9114_v9  ;;  %v1239_v7 = vmul.f32 %v9043_v51, %v9114_v9  ;;  %v1850_v47 = vadd.f32 %v1849_v39, %v1708_v32  ;;  %v1360_v21 = vadd.f32 %v9116_v17, %v9115_v42  ;;  %v7613_v51 = vpop.xlane.xlu1 %3273 }
 0x2bb   : > { %v1361_v11 = vadd.f32 %v9118_v37, %v9117_v48  ;;  %v1362_v35 = vadd.f32 %v9119_v36, %v970_v40  ;;  %v1363_v27 = vadd.f32 %v1235_v26, %v971_v1  ;;  %v1364_v33 = vadd.f32 %v1236_v30, %v972_v3  ;;  %v9129_v36 = vld [vmem:[#allocation200_spill] sm:$0xff] }
 0x2bc   : > { %v1365_v0 = vadd.f32 %v1237_v52, %v973_v14  ;;  %v1366_v29 = vadd.f32 %v1238_v10, %v974_v12  ;;  %v1851_v24 = vadd.f32 %v1850_v47, %v1709_v60  ;;  %v1367_v15 = vadd.f32 %v1239_v7, %v975_v63  ;;  %v9126_v63 = vld [vmem:[#allocation100_spill] sm:$0xff]  ;;  %v9127_v10 = vld [vmem:[#allocation102_spill] sm:$0xff] }
 0x2bd   : > { %v1568_v6 = vadd.f32 %v7506_v41, %v1360_v21  ;;  %v1569_v22 = vadd.f32 %v7506_v41, %v1361_v11  ;;  %v1570_v32 = vadd.f32 %v7506_v41, %v1362_v35  ;;  %v1571_v13 = vadd.f32 %v7506_v41, %v1363_v27  ;;  %v3283_v48 = vpop.xlane.xlu0 %3282  ;;  %v9130_v35 = vld [vmem:[#allocation202_spill] sm:$0xff] }
 0x2be   : > { %v1572_v62 = vadd.f32 %v7506_v41, %v1364_v33  ;;  %v1573_v59 = vadd.f32 %v7506_v41, %v1365_v0  ;;  %v1852_v45 = vadd.f32 %v1851_v24, %v1710_v5  ;;  %v1574_v60 = vadd.f32 %v7506_v41, %v1366_v29  ;;  %v7642_v47 = vpop.xlane.xlu1 %1755  ;;  %v9131_v33 = vld [vmem:[#allocation45_spill] sm:$0xff] }
 0x2bf   : > { %v7623_v44 = vadd.f32 %v7506_v41, %v1367_v15  ;;  %v1696_v31 = vmax.f32 %v1568_v6, 0.0  ;;  %v7627_v61 = vmul.f32 %v9121_v8, %v9120_v57  ;;  %v2784_v43 = vmul.f32 %v9123_v19, %v9122_v38  ;;  %9128 = vst [vmem:[#allocation169_spill] sm:$0xff] %v7642_v47  ;;  %v9132_v24 = vld [vmem:[#allocation201_spill] sm:$0xff]  ;;  %v9133_v15 = vld [vmem:[#allocation203_spill] sm:$0xff] }
 0x2c0   : > { %v2785_v25 = vmul.f32 %v9124_v20, %v9122_v38  ;;  %v1697_v40 = vmax.f32 %v1569_v22, 0.0  ;;  %v2786_v5 = vmul.f32 %v9125_v49, %v9122_v38  ;;  %v1853_v1 = vadd.f32 %v1852_v45, %v1711_v56  ;;  %v9136_v45 = vld [vmem:[#allocation50_spill] sm:$0xff]  ;;  %v9138_v8 = vld [vmem:[#allocation217_spill] sm:$0xff] }
 0x2c1   : > { %v1698_v3 = vmax.f32 %v1570_v32, 0.0  ;;  %v1699_v9 = vmax.f32 %v1571_v13, 0.0  ;;  %v1700_v41 = vmax.f32 %v1572_v62, 0.0  ;;  %v1701_v26 = vmax.f32 %v1573_v59, 0.0  ;;  %v9134_v32 = vld [vmem:[#allocation48_spill] sm:$0xff]  ;;  %v9135_v62 = vld [vmem:[#allocation49_spill] sm:$0xff]  ;;  %v7675_v47 = vpop.xlane.xlu0 %1764 }
 0x2c2   : > { %v1702_v39 = vmax.f32 %v1574_v60, 0.0  ;;  %v1838_v14 = vadd.f32 %v1697_v40, %v1696_v31  ;;  %1854 = vadd.xlane.f32.xlu0 %v1853_v1  ;;  %v1703_v12 = vmax.f32 %v7623_v44, 0.0  ;;  %v2132_v30 = vmul.f32 %v8799_v46, %v9126_v63  ;;  %v9137_v44 = vld [vmem:[#allocation54_spill] sm:$0xff] }
 0x2c3   : > { %v2133_v52 = vmul.f32 %v8800_v23, %v9126_v63  ;;  %v2396_v7 = vmul.f32 %v8975_v54, %v9127_v10  ;;  %v2134_v42 = vmul.f32 %v8801_v4, %v9126_v63  ;;  %v2135_v17 = vmul.f32 %v8935_v55, %v9126_v63 }
 0x2c4   : > { %v1839_v56 = vadd.f32 %v1838_v14, %v1698_v3  ;;  %v2397_v21 = vmul.f32 %v8976_v28, %v9127_v10  ;;  %v2398_v37 = vmul.f32 %v8977_v34, %v9127_v10  ;;  %v2399_v11 = vmul.f32 %v9068_v53, %v9127_v10 }
 0x2c5   : > { %v2522_v27 = vadd.f32 %v9130_v35, %v9129_v36  ;;  %v2787_v0 = vmul.f32 %v9131_v33, %v9122_v38  ;;  %v2523_v6 = vadd.f32 %v9133_v15, %v9132_v24  ;;  %v2524_v22 = vadd.f32 %v2396_v7, %v2132_v30  ;;  %v7671_v36 = vpop.xlane.xlu1 %3291 }
 0x2c6   : > { %v1840_v29 = vadd.f32 %v1839_v56, %v1699_v9  ;;  %v2788_v13 = vmul.f32 %v9134_v32, %v9122_v38  ;;  %v2789_v59 = vmul.f32 %v9135_v62, %v9122_v38  ;;  %v2790_v60 = vmul.f32 %v9136_v45, %v9122_v38  ;;  %v9139_v9 = vld [vmem:[#allocation133_spill] sm:$0xff] }
 0x2c7   : > { %v2791_v31 = vmul.f32 %v9137_v44, %v9122_v38  ;;  %v2912_v40 = vadd.f32 %v2784_v43, %v9138_v8  ;;  %v2525_v3 = vadd.f32 %v2397_v21, %v2133_v52  ;;  %v2913_v14 = vadd.f32 %v2785_v25, %v9139_v9 }
 0x2c8   : > { %v1841_v1 = vadd.f32 %v1840_v29, %v1700_v41  ;;  %v2914_v63 = vadd.f32 %v2786_v5, %v2522_v27  ;;  %v2526_v30 = vadd.f32 %v2398_v37, %v2134_v42  ;;  %v2527_v10 = vadd.f32 %v2399_v11, %v2135_v17  ;;  %v9140_v37 = vld [vmem:[#allocation53_spill] sm:$0xff]  ;;  %v9141_v29 = vld [vmem:[#allocation216_spill] sm:$0xff] }
 0x2c9   : > { %v2915_v7 = vadd.f32 %v2787_v0, %v2523_v6  ;;  %v3104_v56 = vadd.f32 %v7517_v2, %v2912_v40  ;;  %v2916_v24 = vadd.f32 %v2788_v13, %v2524_v22  ;;  %v3105_v15 = vadd.f32 %v7517_v2, %v2913_v14  ;;  %v9142_v6 = vld [vmem:[#allocation38_spill] sm:$0xff]  ;;  %v7694_v14 = vpop.xlane.xlu0 %3300 }
 0x2ca   : > { %v1842_v35 = vadd.f32 %v1841_v1, %v1701_v26  ;;  %v3106_v38 = vadd.f32 %v7517_v2, %v2914_v63  ;;  %v2917_v43 = vadd.f32 %v2789_v59, %v2525_v3  ;;  %v2918_v41 = vadd.f32 %v2790_v60, %v2526_v30  ;;  %v9145_v1 = vld [vmem:[#allocation168_spill] sm:$0xff] }
 0x2cb   : > { %v2919_v52 = vadd.f32 %v2791_v31, %v2527_v10  ;;  %v3107_v25 = vadd.f32 %v7517_v2, %v2915_v7  ;;  %v3108_v42 = vadd.f32 %v7517_v2, %v2916_v24  ;;  %v3232_v17 = vmax.f32 %v3104_v56, 0.0  ;;  %v9144_v31 = vld [vmem:[#allocation123_spill] sm:$0xff]  ;;  %v9147_v24 = vld [vmem:[#allocation34_spill] sm:$0xff] }
 0x2cc   : > { %v1843_v5 = vadd.f32 %v1842_v35, %v1702_v39  ;;  %v3233_v21 = vmax.f32 %v3105_v15, 0.0  ;;  %v2403_v26 = vmul.f32 %v9140_v37, %v9120_v57  ;;  %v3109_v11 = vadd.f32 %v7517_v2, %v2917_v43  ;;  %v9143_v39 = vld [vmem:[#allocation37_spill] sm:$0xff]  ;;  %v9146_v35 = vld [vmem:[#allocation74_spill] sm:$0xff] }
 0x2cd   : > { %v3110_v27 = vadd.f32 %v7517_v2, %v2918_v41  ;;  %v3111_v0 = vadd.f32 %v7517_v2, %v2919_v52  ;;  %v2528_v22 = vadd.f32 %v9142_v6, %v9141_v29  ;;  %v3234_v59 = vmax.f32 %v3106_v38, 0.0  ;;  %v7696_v2 = vpop.xlane.xlu1 %1773 }
 0x2ce   : > { %v1844_v13 = vadd.f32 %v1843_v5, %v1703_v12  ;;  %v3374_v60 = vadd.f32 %v3233_v21, %v3232_v17  ;;  %v2529_v8 = vadd.f32 %v9144_v31, %v9143_v39  ;;  %v7688_v40 = vmul.f32 0.0009765625, %v3283_v48 }
 0x2cf   : > { %v2792_v3 = vmul.f32 %v9123_v19, %v9145_v1  ;;  %v2793_v9 = vmul.f32 %v9124_v20, %v9145_v1  ;;  %v2794_v12 = vmul.f32 %v9125_v49, %v9145_v1  ;;  %v3235_v63 = vmax.f32 %v3107_v25, 0.0  ;;  %v9148_v20 = vld [vmem:[#allocation35_spill] sm:$0xff] }
 0x2d0   : > { %1845 = vadd.xlane.f32.xlu1 %v1844_v13  ;;  %v3236_v30 = vmax.f32 %v3108_v42, 0.0  ;;  %v3375_v10 = vadd.f32 %v3374_v60, %v3234_v59  ;;  %v3237_v7 = vmax.f32 %v3109_v11, 0.0  ;;  %v3238_v48 = vmax.f32 %v3110_v27, 0.0 }
 0x2d1   : > { %v3239_v56 = vmax.f32 %v3111_v0, 0.0  ;;  %v2138_v19 = vmul.f32 %v9147_v24, %v9146_v35  ;;  %v2139_v38 = vmul.f32 %v9148_v20, %v9146_v35  ;;  %v2140_v43 = vmul.f32 %v8799_v46, %v9146_v35  ;;  %v9149_v20 = vld [vmem:[#allocation39_spill] sm:$0xff] }
 0x2d2   : > { %v3376_v15 = vadd.f32 %v3375_v10, %v3235_v63  ;;  %v2404_v49 = vmul.f32 %v8975_v54, %v9120_v57  ;;  %v2141_v41 = vmul.f32 %v8800_v23, %v9146_v35  ;;  %v2142_v52 = vmul.f32 %v8801_v4, %v9146_v35  ;;  %v7719_v54 = vpop.xlane.xlu0 %1782 }
 0x2d3   : > { %v2530_v25 = vadd.f32 %v7627_v61, %v2138_v19  ;;  %v2795_v5 = vmul.f32 %v9131_v33, %v9145_v1  ;;  %v2405_v17 = vmul.f32 %v8976_v28, %v9120_v57  ;;  %v2406_v46 = vmul.f32 %v8977_v34, %v9120_v57  ;;  %v3310_v61 = vpop.xlane.xlu1 %3309 }
 0x2d4   : > { %v3377_v42 = vadd.f32 %v3376_v15, %v3236_v30  ;;  %v2531_v21 = vadd.f32 %v2403_v26, %v2139_v38  ;;  %v2796_v23 = vmul.f32 %v9134_v32, %v9145_v1  ;;  %v2920_v37 = vadd.f32 %v2792_v3, %v2528_v22 }
 0x2d5   : > { %v2921_v4 = vadd.f32 %v2793_v9, %v2529_v8  ;;  %v2922_v11 = vadd.f32 %v2794_v12, %v2530_v25  ;;  %v2407_v33 = vmul.f32 %v9068_v53, %v9120_v57  ;;  %v2532_v0 = vadd.f32 %v2404_v49, %v2140_v43  ;;  %v9150_v25 = vld [vmem:[#allocation169_spill] sm:$0xff] }
 0x2d6   : > { %v3378_v27 = vadd.f32 %v3377_v42, %v3237_v7  ;;  %v2797_v28 = vmul.f32 %v9135_v62, %v9145_v1  ;;  %v2923_v29 = vadd.f32 %v2795_v5, %v2531_v21  ;;  %v3112_v34 = vadd.f32 %v7544_v18, %v2920_v37  ;;  %v3319_v39 = vpop.xlane.xlu0 %3318 }
 0x2d7   : > { %v3113_v26 = vadd.f32 %v7544_v18, %v2921_v4  ;;  %v3114_v6 = vadd.f32 %v7544_v18, %v2922_v11  ;;  %v2143_v22 = vmul.f32 %v8935_v55, %v9146_v35  ;;  %v2533_v13 = vadd.f32 %v2405_v17, %v2141_v41  ;;  %v1792_v10 = vpop.xlane.xlu1 %1791 }
 0x2d8   : > { %v3379_v32 = vadd.f32 %v3378_v27, %v3238_v48  ;;  %v2798_v59 = vmul.f32 %v9136_v45, %v9145_v1  ;;  %v2924_v53 = vadd.f32 %v2796_v23, %v2532_v0  ;;  %v3115_v57 = vadd.f32 %v7544_v18, %v2923_v29 }
 0x2d9   : > { %v3240_v60 = vmax.f32 %v3112_v34, 0.0  ;;  %v3241_v62 = vmax.f32 %v3113_v26, 0.0  ;;  %v2534_v8 = vadd.f32 %v2406_v46, %v2142_v52  ;;  %v2535_v3 = vadd.f32 %v2407_v33, %v2143_v22 }
 0x2da   : > { %v3380_v31 = vadd.f32 %v3379_v32, %v3239_v56  ;;  %v2799_v9 = vmul.f32 %v9137_v44, %v9145_v1  ;;  %v2925_v12 = vadd.f32 %v2797_v28, %v2533_v13  ;;  %v3116_v63 = vadd.f32 %v7544_v18, %v2924_v53 }
 0x2db   : > { %v3242_v55 = vmax.f32 %v3114_v6, 0.0  ;;  %v3383_v30 = vadd.f32 %v3241_v62, %v3240_v60  ;;  %v2926_v45 = vadd.f32 %v2798_v59, %v2534_v8  ;;  %v1857_v7 = vmul.f32 0.0009765625, %v7565_v50 }
 0x2dc   : > { %3381 = vadd.xlane.f32.xlu1 %v3380_v31  ;;  %v1858_v48 = vmul.f32 0.0009765625, %v7592_v16  ;;  %v3394_v35 = vmul.f32 0.0009765625, %v7613_v51  ;;  %v3117_v56 = vadd.f32 %v7544_v18, %v2925_v12  ;;  %v3243_v24 = vmax.f32 %v3115_v57, 0.0  ;;  %v1801_v51 = vpop.xlane.xlu0 %1800 }
 0x2dd   : > { %v3384_v19 = vadd.f32 %v3383_v30, %v3242_v55  ;;  %v3396_v44 = vmul.f32 0.0009765625, %v7671_v36  ;;  %v1859_v1 = vmul.f32 0.0009765625, %v7619_v58  ;;  %v3397_v15 = vmul.f32 0.0009765625, %v7694_v14 }
 0x2de   : > { %v3832_v38 = vpack.c.bf16 %v1857_v7, %v9149_v20  ;;  %v3811_v43 = vpack.c.bf16 %v7688_v40, %v3394_v35  ;;  %v2927_v49 = vadd.f32 %v2799_v9, %v2535_v3  ;;  %v3118_v50 = vadd.f32 %v7544_v18, %v2926_v45  ;;  %v3328_v40 = vpop.xlane.xlu1 %3327  ;;  %v3409_v20 = vld [vmem:[%s7822_s4 + $0x10] sm:$0xff] }
 0x2df   : > { %v3244_v16 = vmax.f32 %v3116_v63, 0.0  ;;  %v3385_v41 = vadd.f32 %v3384_v19, %v3243_v24  ;;  %v3835_v52 = vpack.c.bf16 %v1859_v1, %v1858_v48  ;;  %v1860_v5 = vmul.f32 0.0009765625, %v9150_v25  ;;  %v3413_v25 = vld [vmem:[%s7822_s4 + $0x28] sm:$0xff] }
 0x2e0   : > { %3833 = vmatpush3.bf16.msra.mxu1 %v3832_v38  ;;  %3812 = vmatpush3.bf16.msra.mxu0 %v3811_v43  ;;  %v3814_v36 = vpack.c.bf16 %v3397_v15, %v3396_v44  ;;  %v3398_v42 = vmul.f32 0.0009765625, %v3310_v61  ;;  %v3119_v58 = vadd.f32 %v7544_v18, %v2927_v49  ;;  %v3245_v14 = vmax.f32 %v3117_v56, 0.0  ;;  %v3337_v11 = vpop.xlane.xlu0 %3336  ;;  %v3408_v15 = vld [vmem:[%s7822_s4] sm:$0xff] }
 0x2e1   : > { %v3386_v17 = vadd.f32 %v3385_v41, %v3244_v16  ;;  %v9151_v46 = vmov 0.0|0.0   ;;  %v1861_v21 = vmul.f32 0.0009765625, %v7675_v47  ;;  %v3399_v23 = vmul.f32 0.0009765625, %v3319_v39  ;;  %v3410_v38 = vld [vmem:[%s7822_s4 + $0x20] sm:$0xff] }
 0x2e2   : > { %3834 = vmatprep.subr.bf16.mxu1 %v9151_v46  ;;  %3813 = vmatprep.subr.bf16.mxu0 %v9151_v46  ;;  %v3246_v37 = vmax.f32 %v3118_v50, 0.0  ;;  %v1862_v33 = vmul.f32 0.0009765625, %v7696_v2  ;;  %v3400_v18 = vmul.f32 0.0009765625, %v3328_v40  ;;  %v3247_v0 = vmax.f32 %v3119_v58, 0.0  ;;  %v3574_v40 = vld [vmem:[%s7823_s5] sm:$0xff] }
 0x2e3   : > { %v3387_v4 = vadd.f32 %v3386_v17, %v3245_v14  ;;  %v3838_v27 = vpack.c.bf16 %v1861_v21, %v1860_v5  ;;  %v3817_v61 = vpack.c.bf16 %v3399_v23, %v3398_v42  ;;  %v1863_v29 = vmul.f32 0.0009765625, %v7719_v54 }
 0x2e4   : > { %3836 = vmatpush3.bf16.msra.mxu1 %v3835_v52  ;;  %3815 = vmatpush3.bf16.msra.mxu0 %v3814_v36  ;;  %v3401_v47 = vmul.f32 0.0009765625, %v3337_v11  ;;  %v1864_v6 = vmul.f32 0.0009765625, %v1792_v10  ;;  %v1865_v2 = vmul.f32 0.0009765625, %v1801_v51  ;;  %v1819_v22 = vpop.xlane.xlu0 %1818  ;;  %v3962_v60 = vmov 0.0   ;;  %v3411_v51 = vld [vmem:[%s7822_s4 + $0x8] sm:$0xff]  ;;  %v3412_v52 = vld [vmem:[%s7822_s4 + $0x18] sm:$0xff] }
 0x2e5   : > { %v3388_v28 = vadd.f32 %v3387_v4, %v3246_v37  ;;  %3837 = vmatprep.subr.bf16.mxu1 %v9151_v46  ;;  %3816 = vmatprep.subr.bf16.mxu0 %v9151_v46  ;;  %v3841_v26 = vpack.c.bf16 %v1863_v29, %v1862_v33  ;;  %v1867_v59 = vmul.f32 0.0009765625, %v1819_v22  ;;  %v3575_v11 = vld [vmem:[%s7823_s5 + $0x8] sm:$0xff] }
 0x2e6   : > { %v3820_v32 = vpack.c.bf16 %v3401_v47, %v3400_v18  ;;  %v3844_v13 = vpack.c.bf16 %v1865_v2, %v1864_v6  ;;  %3798 = vmatprep.mubr.msk.f32.mxu1 %vm3961_vm0, %v3962_v60  ;;  %3757 = vmatprep.mubr.msk.f32.mxu0 %vm3961_vm0, %v3962_v60 }
 0x2e7   : > { %v3389_v34 = vadd.f32 %v3388_v28, %v3247_v0  ;;  %v3576_v0 = vld [vmem:[%s7823_s5 + $0x10] sm:$0xff] }
 0x2e8   : > { %3839 = vmatpush3.bf16.msra.mxu1 %v3838_v27  ;;  %3818 = vmatpush3.bf16.msra.mxu0 %v3817_v61 }
 0x2e9   : > { %3390 = vadd.xlane.f32.xlu0 %v3389_v34  ;;  %3840 = vmatprep.subr.bf16.mxu1 %v9151_v46 }
 0x2ea   : > { %3819 = vmatprep.subr.bf16.mxu0 %v9151_v46 }
 0x2ec   : > { %3842 = vmatpush3.bf16.msra.mxu1 %v3841_v26  ;;  %3821 = vmatpush3.bf16.msra.mxu0 %v3820_v32 }
 0x2ed   : > { %3843 = vmatprep.subr.bf16.mxu1 %v9151_v46  ;;  %3822 = vmatprep.subr.bf16.mxu0 %v9151_v46  ;;  %v1810_v54 = vpop.xlane.xlu1 %1809 }
 0x2ee   : > { %v1866_v53 = vmul.f32 0.0009765625, %v1810_v54 }
 0x2f0   : > { %3845 = vmatpush3.bf16.msra.mxu1 %v3844_v13  ;;  %v3847_v57 = vpack.c.bf16 %v1867_v59, %v1866_v53 }
 0x2f1   : > { %3846 = vmatprep.subr.bf16.mxu1 %v9151_v46 }
 0x2f4   : > { %3848 = vmatpush3.bf16.msra.mxu1 %v3847_v57 }
 0x2f5   : > { %3849 = vmatprep.subr.bf16.mxu1 %v9151_v46 }
 0x2f9   : > { %v3346_v62 = vpop.xlane.xlu1 %3345 }
 0x2fa   : > { %v3402_v31 = vmul.f32 0.0009765625, %v3346_v62 }
 0x30c   : > { %v3355_v39 = vpop.xlane.xlu0 %3354 }
 0x30d   : > { %v3403_v8 = vmul.f32 0.0009765625, %v3355_v39 }
 0x30f   : > { %v3823_v3 = vpack.c.bf16 %v3403_v8, %v3402_v31 }
 0x311   : > { %3824 = vmatpush3.bf16.msra.mxu0 %v3823_v3 }
 0x312   : > { %3825 = vmatprep.subr.bf16.mxu0 %v9151_v46 }
 0x319   : > { %v1837_v9 = vpop.xlane.xlu0 %1836 }
 0x31a   : > { %v1869_v63 = vmul.f32 0.0009765625, %v1837_v9 }
 0x329   : > { %v1828_v12 = vpop.xlane.xlu1 %1827 }
 0x32a   : > { %v1868_v55 = vmul.f32 0.0009765625, %v1828_v12 }
 0x32c   : > { %v3850_v30 = vpack.c.bf16 %v1869_v63, %v1868_v55 }
 0x32e   : > { %3851 = vmatpush3.bf16.msra.mxu1 %v3850_v30 }
 0x32f   : > { %3852 = vmatprep.subr.bf16.mxu1 %v9151_v46 }
 0x335   : > { %v3364_v10 = vpop.xlane.xlu1 %3363 }
 0x336   : > { %v3404_v7 = vmul.f32 0.0009765625, %v3364_v10 }
 0x342   : > { %v3373_v45 = vpop.xlane.xlu0 %3372 }
 0x343   : > { %v3405_v48 = vmul.f32 0.0009765625, %v3373_v45 }
 0x345   : > { %v3826_v35 = vpack.c.bf16 %v3405_v48, %v3404_v7 }
 0x347   : > { %3827 = vmatpush3.bf16.msra.mxu0 %v3826_v35 }
 0x348   : > { %3828 = vmatprep.subr.bf16.mxu0 %v9151_v46 }
 0x34f   : > { %v1855_v56 = vpop.xlane.xlu0 %1854 }
 0x350   : > { %v1871_v24 = vmul.f32 0.0009765625, %v1855_v56 }
 0x35d   : > { %v1846_v19 = vpop.xlane.xlu1 %1845 }
 0x35e   : > { %v1870_v44 = vmul.f32 0.0009765625, %v1846_v19 }
 0x360   : > { %v3853_v1 = vpack.c.bf16 %v1871_v24, %v1870_v44 }
 0x362   : > { %3854 = vmatpush3.bf16.msra.mxu1 %v3853_v1 }
 0x365   : > { %3799 = vmatmul.mubr.f32.vlgmr.msra.gmra.mrb[0].mxu1 %v3408_v15 }
 0x366   : > { %3801 = vmatprep.mubr.msk.f32.mxu1 %vm3961_vm0, %v3962_v60 }
 0x369   : > { %3802 = vmatmul.mubr.f32.gmra.mrb[2].mxu1 %v3409_v20  ;;  %v3382_v43 = vpop.xlane.xlu1 %3381 }
 0x36a   : > { %3804 = vmatprep.mubr.msk.f32.mxu1 %vm3961_vm0, %v3962_v60  ;;  %v3406_v50 = vmul.f32 0.0009765625, %v3382_v43 }
 0x36d   : > { %3805 = vmatmul.mubr.f32.gmra.mrb[4].mxu1 %v3410_v38 }
 0x376   : > { %v3391_v49 = vpop.xlane.xlu0 %3390 }
 0x377   : > { %v3407_v16 = vmul.f32 0.0009765625, %v3391_v49 }
 0x379   : > { %v3829_v41 = vpack.c.bf16 %v3407_v16, %v3406_v50 }
 0x37b   : > { %3830 = vmatpush3.bf16.msra.mxu0 %v3829_v41 }
 0x37e   : > { %3758 = vmatmul.mubr.f32.vlgmr.msra.gmra.mrb[0].mxu0 %v3411_v51 }
 0x37f   : > { %3760 = vmatprep.mubr.msk.f32.mxu0 %vm3961_vm0, %v3962_v60 }
 0x382   : > { %3761 = vmatmul.mubr.f32.gmra.mrb[2].mxu0 %v3412_v52 }
 0x383   : > { %3763 = vmatprep.mubr.msk.f32.mxu0 %vm3961_vm0, %v3962_v60 }
 0x386   : > { %3764 = vmatmul.mubr.f32.gmra.mrb[4].mxu0 %v3413_v25 }
 0x438   : > { %v3560_v5 = vpop.f32.mrb[0].mxu1 }
 0x439   : > { %v3800_v36 = vpop.f32.mrb[1].mxu1 }
 0x43c   : > { %v3565_v42 = vpop.f32.mrb[2].mxu1 }
 0x43d   : > { %v3803_v58 = vpop.f32.mrb[3].mxu1 }
 0x440   : > { %v3570_v14 = vpop.f32.mrb[4].mxu1 }
 0x441   : > { %v3806_v17 = vpop.f32.mrb[5].mxu1 }
 0x451   : > { %v3480_v46 = vpop.f32.mrb[0].mxu0 }
 0x452   : > { %v3561_v21 = vadd.f32 %v3560_v5, %v3480_v46  ;;  %v3759_v23 = vpop.f32.mrb[1].mxu0 }
 0x454   : > { %v3577_v37 = vadd.f32 %v3574_v40, %v3561_v21 }
 0x455   : > { %v3485_v4 = vpop.f32.mrb[2].mxu0 }
 0x456   : > { %3600 = vst.msk [vmem:[%s7797_s28] sm:$0xff] %vm3580_vm1, %v3577_v37  ;;  %v3566_v27 = vadd.f32 %v3565_v42, %v3485_v4  ;;  %v3762_v33 = vpop.f32.mrb[3].mxu0 }
 0x458   : > { %v3578_v61 = vadd.f32 %v3575_v11, %v3566_v27 }
 0x459   : > { %v3490_v18 = vpop.f32.mrb[4].mxu0 }
 0x45a   : > { %3601 = vst.msk [vmem:[%s7797_s28 + $0x8] sm:$0xff] %vm3580_vm1, %v3578_v61  ;;  %v3571_v28 = vadd.f32 %v3570_v14, %v3490_v18  ;;  %v3765_v29 = vpop.f32.mrb[5].mxu0 }
 0x45c   : > { %v3579_v47 = vadd.f32 %v3576_v0, %v3571_v28 }
 0x45e   : > { %v3581_v34 = vsel %vm3580_vm1, %v3579_v47, -inf  ;;  %3602 = vst.msk [vmem:[%s7797_s28 + $0x10] sm:$0xff] %vm3580_vm1, %v3579_v47 }
 0x45f   : > { %v3582_v26 = vrot.slane %v3581_v34, 4 }
 0x461   : > { %v3583_v6 = vmax.f32 %v3581_v34, %v3582_v26 }
 0x463   : > { %v3584_v32 = vrot.slane %v3583_v6, 2 }
 0x465   : > { %v3585_v2 = vmax.f32 %v3583_v6, %v3584_v32 }
 0x467   : > { %v3586_v22 = vrot.slane %v3585_v2, 1 }
 0x469   : > { %v3587_v13 = vmax.f32 %v3585_v2, %v3586_v22 }
 0x46b   : > { %v3588_v54 = vsub.f32 %v3579_v47, %v3587_v13 }
 0x46d   : > { %v3589_v59 = vmul.f32 1.442695, %v3588_v54 }
 0x46f   : > { %3928 = vpow2.f32 %v3589_v59 }
 0x479   : > { %v3929_v53 = vpop.eup %3928 }
 0x47a   : > { %v3591_v57 = vsel %vm3580_vm1, %v3929_v53, 0.0 }
 0x47b   : > { %v3592_v60 = vrot.slane %v3591_v57, 4 }
 0x47d   : > { %v3593_v62 = vadd.f32 %v3592_v60, %v3591_v57 }
 0x47f   : > { %v3594_v39 = vrot.slane %v3593_v62, 2 }
 0x481   : > { %v3595_v31 = vadd.f32 %v3594_v39, %v3593_v62 }
 0x483   : > { %v3596_v8 = vrot.slane %v3595_v31, 1 }
 0x485   : > { %v3597_v3 = vadd.f32 %v3596_v8, %v3595_v31 }
 0x487   : > { %3930 = vrcp.f32 %v3597_v3 }
 0x491   : > { %v3931_v9 = vpop.eup %3930 }
 0x492   : > { %v3599_v12 = vmul.f32 %v3931_v9, %v3929_v53 }
 0x494   : > { %3603 = vst.msk [vmem:[%s7797_s28 + $0x18] sm:$0xff] %vm3580_vm1, %v3599_v12 }
 0x495 PF: > { %s16_s21 = sadd.s32 1, %s3952_s21  }
 0x496   : > { %p13_p4 = scmp.ge.s32.totalorder %s16_s21, 4  }
 0x498   :  { %15 = sbr.rel (!%p13_p4) target bundleno = 1 (0x1), region = 77 }

</bundles_post_ra>
